<compile_context>
chip_gen: v6e
topology: v6e:2x2x1
jax: 0.10.0
libtpu: 0.0.40
codegen_flags: <defaults>
</compile_context>

<pallas_src>
import numpy as np
import jax
import jax.numpy as jnp
from jax.experimental import pallas as pl
from jax.experimental.pallas import tpu as pltpu


def _round_up(x, m):
    return (x + m - 1) // m * m


def _appearance_kernel(g_ref, qsel_ref, key_ref, qc_ref, out_ref):
    # g_ref    : (H*W, N) f32  one-hot unfold/interleave matrix (grid-invariant)
    # qsel_ref : (L,   N) f32  one-hot patch->lane replication matrix (grid-invariant)
    # key_ref  : (m_blk, H*W)  flattened key rows, one row per (b, c)
    # qc_ref   : (m_blk, L)    patch-center query values
    # out_ref  : (m_blk, N)    N = L*k*k  (PyTorch row-major output layout)
    gathered = jnp.dot(key_ref[...], g_ref[...],
                       preferred_element_type=jnp.float32,
                       precision=jax.lax.Precision.HIGHEST)
    q_exp = jnp.dot(qc_ref[...], qsel_ref[...],
                    preferred_element_type=jnp.float32,
                    precision=jax.lax.Precision.HIGHEST)
    out_ref[...] = (gathered * q_exp).astype(out_ref.dtype)


def _pick_row_block(m_rows, per_row_bytes, const_bytes, budget):
    """Largest divisor of m_rows whose (padded, double-buffered) working set
    fits `budget`; prefers the full extent or multiples of 8 so the block's
    sublane dim stays aligned."""
    def fits(d):
        return const_bytes + d * per_row_bytes <= budget
    if fits(m_rows):
        return m_rows
    divs = [d for d in range(1, m_rows) if m_rows % d == 0]
    aligned = [d for d in divs if d % 8 == 0 and fits(d)]
    if aligned:
        return max(aligned)
    fitting = [d for d in divs if fits(d)]
    return max(fitting) if fitting else 1


def appearance_composability(key_map, query_map, k, stride):
    """key_map, query_map: NCHW float32. Returns (B, C, L, k, k), PyTorch-exact."""
    B, C, H, W = key_map.shape
    assert query_map.shape == key_map.shape
    out_h = (H - k) // stride + 1
    out_w = (W - k) // stride + 1
    L = out_h * out_w
    N = L * k * k
    M = B * C
    ci, cj = divmod(k * k // 2, k)

    # Only the patch-center query values are ever used: slice them out once
    # (tiny tensor), so the kernel never DMAs the full query image.
    q_center = query_map[:, :,
                         ci: ci + (out_h - 1) * stride + 1: stride,
                         cj: cj + (out_w - 1) * stride + 1: stride]   # (B, C, out_h, out_w)
    key_flat = key_map.reshape(M, H * W)      # free reshape (contiguous NCHW)
    qc_flat = q_center.reshape(M, L)          # free reshape

    # Host-built one-hot matrices (grid-invariant kernel constants).
    p = np.arange(N)
    lidx = p // (k * k)
    rem = p % (k * k)
    ki = rem // k
    kj = rem % k
    oh = lidx // out_w
    ow = lidx % out_w
    src = (oh * stride + ki) * W + (ow * stride + kj)
    G = np.zeros((H * W, N), np.float32)
    G[src, p] = 1.0
    Qsel = np.zeros((L, N), np.float32)
    Qsel[lidx, p] = 1.0

    # VMEM accounting: lane/sublane padding + double-buffering + temporaries.
    hw_pad = _round_up(H * W, 128)
    l_pad = _round_up(L, 128)
    n_pad = _round_up(N, 128)
    const_bytes = 4 * 2 * (_round_up(H * W, 8) * n_pad + _round_up(L, 8) * n_pad)
    per_row_bytes = 4 * (2 * hw_pad          # key block (double-buffered)
                         + 2 * l_pad         # query-center block
                         + 2 * n_pad         # output block
                         + 2 * n_pad)        # gathered / q_exp temporaries
    m_blk = _pick_row_block(M, per_row_bytes, const_bytes, budget=6 << 20)

    cost = pl.CostEstimate(
        flops=2 * M * (H * W) * N + 2 * M * L * N,
        transcendentals=0,
        bytes_accessed=4 * (M * H * W + M * L + M * N + H * W * N + L * N))

    out = pl.pallas_call(
        _appearance_kernel,
        out_shape=jax.ShapeDtypeStruct((M, N), key_map.dtype),
        grid=(M // m_blk,),
        in_specs=[
            pl.BlockSpec((H * W, N), lambda i: (0, 0)),   # G (resident)
            pl.BlockSpec((L, N), lambda i: (0, 0)),       # Qsel (resident)
            pl.BlockSpec((m_blk, H * W), lambda i: (i, 0)),
            pl.BlockSpec((m_blk, L), lambda i: (i, 0)),
        ],
        out_specs=pl.BlockSpec((m_blk, N), lambda i: (i, 0)),
        compiler_params=pltpu.CompilerParams(
            dimension_semantics=("parallel",),
            vmem_limit_bytes=48 * 1024 * 1024),
        cost_estimate=cost,
    )(jnp.asarray(G), jnp.asarray(Qsel), key_flat, qc_flat)

    # (M, L*k*k) -> (B, C, L, k, k): pure free reshape, kernel already emitted
    # the exact PyTorch memory order.
    return out.reshape(B, C, L, k, k)


def _reference(key_map, query_map, k, stride):
    """Pure numpy reference implementing the PyTorch forward semantics."""
    key_np = np.asarray(key_map)
    q_np = np.asarray(query_map)
    B, C, H, W = key_np.shape
    out_h = (H - k) // stride + 1
    out_w = (W - k) // stride + 1
    ci, cj = divmod(k * k // 2, k)
    out = np.zeros((B, C, out_h * out_w, k, k), np.float32)
    for oh in range(out_h):
        for ow in range(out_w):
            p = oh * out_w + ow
            center = q_np[:, :, oh * stride + ci, ow * stride + cj]   # (B, C)
            for ki in range(k):
                for kj in range(k):
                    out[:, :, p, ki, kj] = (
                        key_np[:, :, oh * stride + ki, ow * stride + kj] * center)
    return out


if __name__ == "__main__":
    rng = jax.random.PRNGKey(0)
    r1, r2 = jax.random.split(rng)

    configs = [
        dict(k=3, stride=2, B=2, C=4, H=16, W=16),   # main module config
        dict(k=3, stride=1, B=1, C=4, H=12, W=12),   # stride-1 sanity check
    ]
    for cfg in configs:
        k, stride = cfg["k"], cfg["stride"]
        B, C, H, W = cfg["B"], cfg["C"], cfg["H"], cfg["W"]
        key_map = jax.random.normal(r1, (B, C, H, W), dtype=jnp.float32)
        query_map = jax.random.normal(r2, (B, C, H, W), dtype=jnp.float32)

        out = appearance_composability(key_map, query_map, k, stride)
        out = jax.block_until_ready(out)

        ref = _reference(key_map, query_map, k, stride)
        assert out.shape == ref.shape, (out.shape, ref.shape)
        np.testing.assert_allclose(np.asarray(out), ref, rtol=1e-5, atol=1e-6)

    print("KERNEL_OK")
</pallas_src>

<mosaic_0001>
module attributes {stable_mosaic.version = 11 : i64} {
  func.func @_appearance_kernel(%arg0: i32, %arg1: memref<256x441xf32, #tpu.memory_space<vmem>>, %arg2: memref<49x441xf32, #tpu.memory_space<vmem>>, %arg3: memref<8x256xf32, #tpu.memory_space<vmem>>, %arg4: memref<8x49xf32, #tpu.memory_space<vmem>>, %arg5: memref<8x441xf32, #tpu.memory_space<vmem>>) attributes {dimension_semantics = [#tpu.dimension_semantics<parallel>], iteration_bounds = array<i64: 1>, scalar_prefetch = 0 : i64, scratch_operands = 0 : i64, tpu.core_type = #tpu.core_type<tc>, window_params = [{pipeline_mode = #tpu.pipeline_mode<synchronous>, transform_indices = @transform_0, window_bounds = array<i64: 256, 441>}, {pipeline_mode = #tpu.pipeline_mode<synchronous>, transform_indices = @transform_1, window_bounds = array<i64: 49, 441>}, {transform_indices = @transform_2, window_bounds = array<i64: 8, 256>}, {transform_indices = @transform_3, window_bounds = array<i64: 8, 49>}, {transform_indices = @transform_4, window_bounds = array<i64: 8, 441>}]} {
    %c0 = arith.constant 0 : index
    %c0_0 = arith.constant 0 : index
    %0 = vector.load %arg3[%c0, %c0_0] : memref<8x256xf32, #tpu.memory_space<vmem>>, vector<8x256xf32>
    %c0_1 = arith.constant 0 : index
    %c0_2 = arith.constant 0 : index
    %1 = vector.load %arg1[%c0_1, %c0_2] : memref<256x441xf32, #tpu.memory_space<vmem>>, vector<256x441xf32>
    %cst = arith.constant dense<0.000000e+00> : vector<8x441xf32>
    %2 = tpu.matmul %0, %1, %cst {dimension_numbers = #tpu.dot_dimension_numbers<[1], [0], [0], [1], [0, 0, 1, 1], [], []>, precision = #tpu.contract_precision<fp32>} : vector<8x256xf32>, vector<256x441xf32>, vector<8x441xf32> -> vector<8x441xf32>
    %c0_3 = arith.constant 0 : index
    %c0_4 = arith.constant 0 : index
    %3 = vector.load %arg4[%c0_3, %c0_4] : memref<8x49xf32, #tpu.memory_space<vmem>>, vector<8x49xf32>
    %c0_5 = arith.constant 0 : index
    %c0_6 = arith.constant 0 : index
    %4 = vector.load %arg2[%c0_5, %c0_6] : memref<49x441xf32, #tpu.memory_space<vmem>>, vector<49x441xf32>
    %cst_7 = arith.constant dense<0.000000e+00> : vector<8x441xf32>
    %5 = tpu.matmul %3, %4, %cst_7 {dimension_numbers = #tpu.dot_dimension_numbers<[1], [0], [0], [1], [0, 0, 1, 1], [], []>, precision = #tpu.contract_precision<fp32>} : vector<8x49xf32>, vector<49x441xf32>, vector<8x441xf32> -> vector<8x441xf32>
    %6 = arith.mulf %2, %5 : vector<8x441xf32>
    %c0_8 = arith.constant 0 : index
    %c0_9 = arith.constant 0 : index
    %7 = vector.load %arg5[%c0_8, %c0_9] : memref<8x441xf32, #tpu.memory_space<vmem>>, vector<8x441xf32>
    tpu.vector_store %arg5[%c0_8, %c0_9], %6 {strides = array<i32>} : memref<8x441xf32, #tpu.memory_space<vmem>>, vector<8x441xf32>,
    return
  }
  func.func @transform_0(%arg0: i32) -> (i32, i32) {
    %c0_i32 = arith.constant 0 : i32
    %c0_i32_0 = arith.constant 0 : i32
    %c0_i32_1 = arith.constant 0 : i32
    return %c0_i32, %c0_i32_0 : i32, i32
  }
  func.func @transform_1(%arg0: i32) -> (i32, i32) {
    %c0_i32 = arith.constant 0 : i32
    %c0_i32_0 = arith.constant 0 : i32
    %c0_i32_1 = arith.constant 0 : i32
    return %c0_i32, %c0_i32_0 : i32, i32
  }
  func.func @transform_2(%arg0: i32) -> (i32, i32) {
    %c0_i32 = arith.constant 0 : i32
    %c0_i32_0 = arith.constant 0 : i32
    return %arg0, %c0_i32 : i32, i32
  }
  func.func @transform_3(%arg0: i32) -> (i32, i32) {
    %c0_i32 = arith.constant 0 : i32
    %c0_i32_0 = arith.constant 0 : i32
    return %arg0, %c0_i32 : i32, i32
  }
  func.func @transform_4(%arg0: i32) -> (i32, i32) {
    %c0_i32 = arith.constant 0 : i32
    %c0_i32_0 = arith.constant 0 : i32
    return %arg0, %c0_i32 : i32, i32
  }
}

</mosaic_0001>

<bundles_post_ra>
// kernel: tpu_custom_call.1
= control target key start
LH: loop header
LB: loop body
LE: loop exit
PB: predicated region body
PF: predicated region fallthrough
CT: control target
= control target key end

     0   :  { %s7419_s0 = inlined_call_operand.vmem [shape: f32[256,441], index: 0, kind: input, shape index: {}]   ;;  %s7420_s1 = inlined_call_operand.vmem [shape: f32[49,441], index: 1, kind: input, shape index: {}]   ;;  %s7421_s2 = inlined_call_operand.vmem [shape: f32[8,256], index: 2, kind: input, shape index: {}]   ;;  %s7422_s3 = inlined_call_operand.vmem [shape: f32[8,49], index: 3, kind: input, shape index: {}]   ;;  %s7423_s4 = inlined_call_operand.hbm [shape: f32[8,441], index: 4, kind: output, shape index: {}]  }
   0x1   :  { %v81_v0 = vld [vmem:[%s7419_s0 + $0x1e8] sm:$0xff]  ;;  %v80_v1 = vld [vmem:[%s7419_s0 + $0x1e0] sm:$0xff] }
   0x2   :  { %v77_v2 = vld [vmem:[%s7419_s0 + $0x1c8] sm:$0xff]  ;;  %v4087_v3 = vand.u32 4294901760, %v81_v0  ;;  %v4089_v4 = vand.u32 4294901760, %v80_v1  ;;  %v76_v6 = vld [vmem:[%s7419_s0 + $0x1c0] sm:$0xff] }
   0x3   :  { %v4091_v5 = vand.u32 4294901760, %v77_v2  ;;  %v73_v7 = vld [vmem:[%s7419_s0 + $0x1a8] sm:$0xff]  ;;  %v72_v8 = vld [vmem:[%s7419_s0 + $0x1a0] sm:$0xff]  ;;  %v4102_v9 = vand.u32 4294901760, %v76_v6 }
   0x4   :  { %v4104_v10 = vand.u32 4294901760, %v73_v7  ;;  %v4106_v11 = vand.u32 4294901760, %v72_v8  ;;  %v69_v12 = vld [vmem:[%s7419_s0 + $0x188] sm:$0xff]  ;;  %v68_v13 = vld [vmem:[%s7419_s0 + $0x180] sm:$0xff]  ;;  %149 = vmatprep.subr.mxu0 %v4087_v3  ;;  %v4125_v18 = vsub.f32 %v81_v0, %v4087_v3  ;;  %v4147_v23 = vsub.f32 %v80_v1, %v4089_v4 }
   0x5   :  { %v65_v14 = vld [vmem:[%s7419_s0 + $0x168] sm:$0xff]  ;;  %v4118_v15 = vand.u32 4294901760, %v69_v12  ;;  %v4120_v16 = vand.u32 4294901760, %v68_v13  ;;  %v4130_v19 = vld [vmem:[%s7419_s0 + $0x160] sm:$0xff]  ;;  %151 = vmatpush1.msra.mxu0 %v4089_v4  ;;  %v4153_v25 = vsub.f32 %v77_v2, %v4091_v5  ;;  %v4176_v31 = vsub.f32 %v76_v6, %v4102_v9 }
   0x6   :  { %v4122_v17 = vand.u32 4294901760, %v65_v14  ;;  %v4135_v20 = vld [vmem:[%s7419_s0 + $0x148] sm:$0xff]  ;;  %v4140_v21 = vld [vmem:[%s7419_s0 + $0x140] sm:$0xff]  ;;  %v4144_v22 = vand.u32 4294901760, %v4130_v19  ;;  %153 = vmatprep.subr.mxu0 %v4091_v5  ;;  %v7437_v29 = vand.u32 4294901760, %v4125_v18  ;;  %v7436_v33 = vand.u32 4294901760, %v4147_v23 }
   0x7   :  { %v4150_v24 = vand.u32 4294901760, %v4135_v20  ;;  %v4158_v26 = vld [vmem:[%s7419_s0 + $0x128] sm:$0xff]  ;;  %v4163_v27 = vld [vmem:[%s7419_s0 + $0x120] sm:$0xff]  ;;  %v4173_v30 = vand.u32 4294901760, %v4140_v21  ;;  %155 = vmatpush1.msra.mxu0 %v4102_v9  ;;  %v7434_v34 = vand.u32 4294901760, %v4153_v25  ;;  %v4185_v35 = vsub.f32 %v73_v7, %v4104_v10 }
   0x8   :  { %v4168_v28 = vld [vmem:[%s7419_s0 + $0x108] sm:$0xff]  ;;  %v4179_v32 = vand.u32 4294901760, %v4158_v26  ;;  %v4188_v36 = vand.u32 4294901760, %v4163_v27  ;;  %v4193_v37 = vld [vmem:[%s7419_s0 + $0x100] sm:$0xff]  ;;  %157 = vmatprep.subr.mxu0 %v4104_v10  ;;  %v296_v38 = vsub.f32 %v4125_v18, %v7437_v29  ;;  %v7433_v39 = vand.u32 4294901760, %v4176_v31 }
   0x9   :  { %7841 = vst [vmem:[#allocation5_spill] sm:$0xff] %v4173_v30  ;;  %v4201_v40 = vsub.f32 %v72_v8, %v4106_v11  ;;  %v4204_v41 = vand.u32 4294901760, %v4168_v28  ;;  %159 = vmatpush1.msra.mxu0 %v4106_v11  ;;  %v302_v42 = vsub.f32 %v4147_v23, %v7436_v33  ;;  %v308_v43 = vsub.f32 %v4153_v25, %v7434_v34  ;;  %v4220_v46 = vld [vmem:[%s7419_s0 + $0xe8] sm:$0xff]  ;;  %v4233_v51 = vld [vmem:[%s7419_s0 + $0xe0] sm:$0xff] }
   0xa   :  { %7842 = vst [vmem:[#allocation6_spill] sm:$0xff] %v4179_v32  ;;  %7843 = vst [vmem:[#allocation7_spill] sm:$0xff] %v4188_v36  ;;  %v7431_v44 = vand.u32 4294901760, %v4185_v35  ;;  %v4215_v45 = vsub.f32 %v69_v12, %v4118_v15  ;;  %161 = vmatprep.subr.mxu0 %v4118_v15  ;;  %v297_v47 = vand.u32 4294901760, %v296_v38  ;;  %v314_v48 = vsub.f32 %v4176_v31, %v7433_v39  ;;  %v4243_v56 = vld [vmem:[%s7419_s0 + $0xc8] sm:$0xff]  ;;  %v4258_v61 = vld [vmem:[%s7419_s0 + $0xc0] sm:$0xff] }
   0xb   :  { %7844 = vst [vmem:[#allocation8_spill] sm:$0xff] %v4204_v41  ;;  %v7429_v49 = vand.u32 4294901760, %v4201_v40  ;;  %v4228_v50 = vand.u32 4294901760, %v4193_v37  ;;  %163 = vmatpush1.msra.mxu0 %v4120_v16  ;;  %v303_v52 = vand.u32 4294901760, %v302_v42  ;;  %v309_v53 = vand.u32 4294901760, %v308_v43  ;;  %v4273_v2 = vld [vmem:[%s7419_s0 + $0xa8] sm:$0xff] }
   0xc   :  { %v320_v54 = vsub.f32 %v4185_v35, %v7431_v44  ;;  %v7428_v55 = vand.u32 4294901760, %v4215_v45  ;;  %165 = vmatprep.subr.mxu0 %v4122_v17  ;;  %298 = vmatprep.subr.mxu1 %v297_v47  ;;  %v315_v57 = vand.u32 4294901760, %v314_v48  ;;  %v4250_v59 = vsub.f32 %v68_v13, %v4120_v16  ;;  %v4287_v13 = vld [vmem:[%s7419_s0 + $0xa0] sm:$0xff]  ;;  %v4382_v44 = vld [vmem:[%s7419_s0 + $0x48] sm:$0xff] }
   0xd   :  { %7845 = vst [vmem:[#allocation9_spill] sm:$0xff] %v4228_v50  ;;  %v326_v58 = vsub.f32 %v4201_v40, %v7429_v49  ;;  %v4253_v60 = vand.u32 4294901760, %v4220_v46  ;;  %167 = vmatpush1.msra.mxu0 %v4144_v22  ;;  %304 = vmatpush1.msra.mxu1 %v303_v52  ;;  %v4265_v0 = vsub.f32 %v65_v14, %v4122_v17  ;;  %v4268_v1 = vand.u32 4294901760, %v4233_v51  ;;  %v4366_v49 = vld [vmem:[%s7419_s0 + $0x60] sm:$0xff]  ;;  %v4409_v33 = vld [vmem:[%s7419_s0 + $0x28] sm:$0xff] }
   0xe   :  { %v321_v62 = vand.u32 4294901760, %v320_v54  ;;  %v332_v63 = vsub.f32 %v4215_v45, %v7428_v55  ;;  %169 = vmatprep.subr.mxu0 %v4150_v24  ;;  %310 = vmatprep.subr.mxu1 %v309_v53  ;;  %v7426_v7 = vand.u32 4294901760, %v4250_v59  ;;  %v4279_v8 = vsub.f32 %v4130_v19, %v4144_v22 }
   0xf   :  { %7846 = vst [vmem:[#allocation10_spill] sm:$0xff] %v4253_v60  ;;  %7847 = vst [vmem:[#allocation11_spill] sm:$0xff] %v4268_v1  ;;  %v327_v6 = vand.u32 4294901760, %v326_v58  ;;  %v4282_v12 = vand.u32 4294901760, %v4243_v56  ;;  %171 = vmatpush1.msra.mxu0 %v4173_v30  ;;  %316 = vmatpush1.msra.mxu1 %v315_v57  ;;  %v7424_v38 = vand.u32 4294901760, %v4265_v0  ;;  %v4293_v42 = vsub.f32 %v4135_v20, %v4150_v24  ;;  %v4313_v20 = vld [vmem:[%s7419_s0 + $0x88] sm:$0xff] }
  0x10   :  { %v333_v14 = vand.u32 4294901760, %v332_v63  ;;  %v4296_v19 = vand.u32 4294901760, %v4258_v61  ;;  %173 = vmatprep.subr.mxu0 %v4179_v32  ;;  %322 = vmatprep.subr.mxu1 %v321_v62  ;;  %v338_v43 = vsub.f32 %v4250_v59, %v7426_v7  ;;  %v7425_v47 = vand.u32 4294901760, %v4279_v8 }
  0x11   :  { %7848 = vst [vmem:[#allocation12_spill] sm:$0xff] %v4282_v12  ;;  %v4305_v48 = vsub.f32 %v4140_v21, %v4173_v30  ;;  %v4308_v52 = vand.u32 4294901760, %v4273_v2  ;;  %175 = vmatpush1.msra.mxu0 %v4188_v36  ;;  %328 = vmatpush1.msra.mxu1 %v327_v6  ;;  %v344_v53 = vsub.f32 %v4265_v0, %v7424_v38  ;;  %v7427_v54 = vand.u32 4294901760, %v4293_v42 }
  0x12   :  { %7849 = vst [vmem:[#allocation13_spill] sm:$0xff] %v4296_v19  ;;  %v4322_v21 = vsub.f32 %v4158_v26, %v4179_v32  ;;  %v4325_v57 = vand.u32 4294901760, %v4287_v13  ;;  %177 = vmatprep.subr.mxu0 %v4204_v41  ;;  %334 = vmatprep.subr.mxu1 %v333_v14  ;;  %v339_v58 = vand.u32 4294901760, %v338_v43  ;;  %v350_v62 = vsub.f32 %v4279_v8, %v7425_v47  ;;  %v4339_v26 = vld [vmem:[%s7419_s0 + $0x80] sm:$0xff] }
  0x13   :  { %7850 = vst [vmem:[#allocation14_spill] sm:$0xff] %v4308_v52  ;;  %v7430_v63 = vand.u32 4294901760, %v4305_v48  ;;  %v4334_v6 = vsub.f32 %v4163_v27, %v4188_v36  ;;  %179 = vmatpush1.msra.mxu0 %v4228_v50  ;;  %v345_v38 = vand.u32 4294901760, %v344_v53  ;;  %v356_v14 = vsub.f32 %v4293_v42, %v7427_v54  ;;  %v4352_v27 = vld [vmem:[%s7419_s0 + $0x68] sm:$0xff] }
  0x14   :  { %7851 = vst [vmem:[#allocation15_spill] sm:$0xff] %v4325_v57  ;;  %v7432_v43 = vand.u32 4294901760, %v4322_v21  ;;  %v4347_v47 = vand.u32 4294901760, %v4313_v20  ;;  %340 = vmatpush1.msra.mxu1 %v339_v58  ;;  %181 = vmatprep.subr.mxu0 %v4253_v60  ;;  %v351_v7 = vand.u32 4294901760, %v350_v62  ;;  %v4361_v55 = vsub.f32 %v4168_v28, %v4204_v41 }
  0x15   :  { %v362_v53 = vsub.f32 %v4305_v48, %v7430_v63  ;;  %v7435_v54 = vand.u32 4294901760, %v4334_v6  ;;  %346 = vmatprep.subr.mxu1 %v345_v38  ;;  %183 = vmatpush1.msra.mxu0 %v4268_v1  ;;  %v357_v58 = vand.u32 4294901760, %v356_v14  ;;  %v4373_v63 = vand.u32 4294901760, %v4339_v26 }
  0x16   :  { %7852 = vst [vmem:[#allocation16_spill] sm:$0xff] %v4347_v47  ;;  %v368_v62 = vsub.f32 %v4322_v21, %v7432_v43  ;;  %v4377_v28 = vsub.f32 %v4193_v37, %v4228_v50  ;;  %352 = vmatpush1.msra.mxu1 %v351_v7  ;;  %185 = vmatprep.subr.mxu0 %v4282_v12  ;;  %v7440_v43 = vand.u32 4294901760, %v4361_v55  ;;  %v4390_v39 = vand.u32 4294901760, %v4352_v27  ;;  %v4395_v37 = vld [vmem:[%s7419_s0 + $0x40] sm:$0xff] }
  0x17   :  { %7853 = vst [vmem:[#allocation17_spill] sm:$0xff] %v4373_v63  ;;  %v363_v38 = vand.u32 4294901760, %v362_v53  ;;  %v374_v14 = vsub.f32 %v4334_v6, %v7435_v54  ;;  %358 = vmatprep.subr.mxu1 %v357_v58  ;;  %187 = vmatpush1.msra.mxu0 %v4296_v19  ;;  %v4401_v34 = vsub.f32 %v4220_v46, %v4253_v60  ;;  %v4404_v54 = vand.u32 4294901760, %v4366_v49 }
  0x18   :  { %7854 = vst [vmem:[#allocation18_spill] sm:$0xff] %v4390_v39  ;;  %v369_v7 = vand.u32 4294901760, %v368_v62  ;;  %v7441_v53 = vand.u32 4294901760, %v4377_v28 }
  0x19   :  { %7855 = vst [vmem:[#allocation19_spill] sm:$0xff] %v4404_v54 }
  0x1a   :  { %9 = vsyncpa [#allocation3], 0  ;;  %364 = vmatpush1.msra.mxu1 %v363_v38  ;;  %189 = vmatprep.subr.mxu0 %v4308_v52  ;;  %v375_v58 = vand.u32 4294901760, %v374_v14  ;;  %v380_v62 = vsub.f32 %v4361_v55, %v7440_v43  ;;  %v4417_v46 = vsub.f32 %v4233_v51, %v4268_v1  ;;  %v4420_v29 = vand.u32 4294901760, %v4382_v44  ;;  %v4437_v51 = vld [vmem:[%s7419_s0 + $0x20] sm:$0xff]  ;;  %v4520_v36 = vld [vmem:[%s7419_s0 + $0x3c8] sm:$0xff] }
  0x1b   :  { %370 = vmatprep.subr.mxu1 %v369_v7  ;;  %191 = vmatpush1.msra.mxu0 %v4325_v57  ;;  %v386_v38 = vsub.f32 %v4377_v28, %v7441_v53  ;;  %v4429_v60 = vsub.f32 %v4243_v56, %v4282_v12  ;;  %v4432_v43 = vand.u32 4294901760, %v4395_v37  ;;  %v4443_v14 = vsub.f32 %v4258_v61, %v4296_v19  ;;  %v4451_v12 = vld [vmem:[%s7419_s0 + $0x8] sm:$0xff]  ;;  %v4504_v41 = vld [vmem:[%s7419_s0 + $0x3e0] sm:$0xff] }
  0x1c   :  { %7856 = vst [vmem:[#allocation20_spill] sm:$0xff] %v4420_v29  ;;  %376 = vmatpush1.msra.mxu1 %v375_v58  ;;  %193 = vmatprep.subr.mxu0 %v4347_v47  ;;  %v381_v7 = vand.u32 4294901760, %v380_v62  ;;  %v4446_v56 = vand.u32 4294901760, %v4409_v33  ;;  %v7860_v1 = vand.u32 4294901760, %v4401_v34  ;;  %v4460_v61 = vsub.f32 %v4273_v2, %v4308_v52  ;;  %v4477_v2 = vld [vmem:[%s7419_s0] sm:$0xff] }
  0x1d   :  { %7857 = vst [vmem:[#allocation21_spill] sm:$0xff] %v4432_v43  ;;  %7858 = vst [vmem:[#allocation22_spill] sm:$0xff] %v4443_v14  ;;  %195 = vmatpush1.msra.mxu0 %v4373_v63  ;;  %v387_v58 = vand.u32 4294901760, %v386_v38  ;;  %v7458_v53 = vand.u32 4294901760, %v4429_v60  ;;  %v7862_v19 = vand.u32 4294901760, %v4417_v46  ;;  %v4468_v38 = vand.u32 4294901760, %v4437_v51 }
  0x1e   :  { %7859 = vst [vmem:[#allocation23_spill] sm:$0xff] %v4446_v56  ;;  %v392_v62 = vsub.f32 %v4401_v34, %v7860_v1  ;;  %7861 = vst [vmem:[#allocation24_spill] sm:$0xff] %v4460_v61  ;;  %382 = vmatprep.subr.mxu1 %v381_v7  ;;  %197 = vmatprep.subr.mxu0 %v4390_v39  ;;  %v4472_v1 = vsub.f32 %v4287_v13, %v4325_v57  ;;  %v4485_v52 = vand.u32 4294901760, %v4451_v12  ;;  %v4490_v13 = vld [vmem:[%s7419_s0 + $0x3e8] sm:$0xff]  ;;  %vm2749_vm0 = vcmask 1040384  }
  0x1f   :  { %v398_v50 = vsub.f32 %v4417_v46, %v7862_v19  ;;  %7863 = vst [vmem:[#allocation25_spill] sm:$0xff] %v4468_v38  ;;  %388 = vmatpush1.msra.mxu1 %v387_v58  ;;  %199 = vmatpush1.msra.mxu0 %v4404_v54  ;;  %v404_v19 = vsub.f32 %v4429_v60, %v7458_v53  ;;  %v7866_v58 = vand.u32 4294901760, %v4443_v14  ;;  %vm2745_vm1 = vcmask 400384  }
  0x20   :  { %7864 = vst [vmem:[#allocation26_spill] sm:$0xff] %v4472_v1  ;;  %v393_v7 = vand.u32 4294901760, %v392_v62  ;;  %7865 = vst [vmem:[#allocation27_spill] sm:$0xff] %v4485_v52  ;;  %201 = vmatprep.subr.mxu0 %v4420_v29  ;;  %v4499_v53 = vsub.f32 %v4313_v20, %v4347_v47  ;;  %v4515_v20 = vsub.f32 %v4339_v26, %v4373_v63  ;;  %v4533_v26 = vld [vmem:[%s7419_s0 + $0x3c0] sm:$0xff]  ;;  %v4547_v47 = vld [vmem:[%s7419_s0 + $0x3a8] sm:$0xff]  ;;  %vm4011_vm2 = vcmask 465920  }
  0x21   :  { %v399_v57 = vand.u32 4294901760, %v398_v50  ;;  %v410_v62 = vsub.f32 %v4443_v14, %v7866_v58  ;;  %v405_v32 = vand.u32 4294901760, %v404_v19  ;;  %203 = vmatpush1.msra.mxu0 %v4432_v43  ;;  %v7868_v50 = vand.u32 4294901760, %v4460_v61 }
  0x22   :  { %7867 = vst [vmem:[#allocation28_spill] sm:$0xff] %v4499_v53  ;;  %394 = vmatprep.subr.mxu1 %v393_v7  ;;  %v4511_v58 = vand.u32 4294901760, %v4477_v2  ;;  %7870 = vst [vmem:[#allocation30_spill] sm:$0xff] %v4515_v20  ;;  %205 = vmatprep.subr.mxu0 %v4446_v56  ;;  %v7871_v19 = vand.u32 4294901760, %v4472_v1  ;;  %v4567_v14 = vsub.f32 %v4382_v44, %v4420_v29  ;;  %v4584_v44 = vand.u32 4294901760, %v4547_v47  ;;  %v4589_v29 = vld [vmem:[%s7419_s0 + $0x388] sm:$0xff] }
  0x23   :  { %v416_v30 = vsub.f32 %v4460_v61, %v7868_v50  ;;  %400 = vmatpush1.msra.mxu1 %v399_v57  ;;  %v411_v7 = vand.u32 4294901760, %v410_v62  ;;  %v4528_v61 = vand.u32 4294901760, %v4490_v13  ;;  %207 = vmatpush1.msra.mxu0 %v4468_v38  ;;  %v4539_v62 = vsub.f32 %v4352_v27, %v4390_v39 }
  0x24   :  { %7869 = vst [vmem:[#allocation29_spill] sm:$0xff] %v4511_v58  ;;  %v422_v50 = vsub.f32 %v4472_v1, %v7871_v19  ;;  %406 = vmatprep.subr.mxu1 %v405_v32  ;;  %v4542_v19 = vand.u32 4294901760, %v4504_v41  ;;  %209 = vmatprep.subr.mxu0 %v4485_v52  ;;  %v4555_v27 = vsub.f32 %v4366_v49, %v4404_v54  ;;  %v4558_v57 = vand.u32 4294901760, %v4520_v36  ;;  %v4575_v49 = vld [vmem:[%s7419_s0 + $0x3a0] sm:$0xff] }
  0x25   :  { %7872 = vst [vmem:[#allocation31_spill] sm:$0xff] %v4528_v61  ;;  %v417_v63 = vand.u32 4294901760, %v416_v30  ;;  %7873 = vst [vmem:[#allocation32_spill] sm:$0xff] %v4539_v62  ;;  %412 = vmatpush1.msra.mxu1 %v411_v7  ;;  %v7875_v30 = vand.u32 4294901760, %v4499_v53  ;;  %211 = vmatpush1.msra.mxu0 %v4511_v58  ;;  %v7878_v39 = vand.u32 4294901760, %v4515_v20 }
  0x26   :  { %7874 = vst [vmem:[#allocation33_spill] sm:$0xff] %v4542_v19  ;;  %v423_v1 = vand.u32 4294901760, %v422_v50  ;;  %7876 = vst [vmem:[#allocation34_spill] sm:$0xff] %v4555_v27  ;;  %213 = vmatprep.subr.mxu0 %v4528_v61  ;;  %v4581_v50 = vsub.f32 %v4395_v37, %v4432_v43  ;;  %v4598_v37 = vsub.f32 %v4409_v33, %v4446_v56  ;;  %v7885_v43 = vand.u32 4294901760, %v4555_v27  ;;  %v4615_v33 = vld [vmem:[%s7419_s0 + $0x380] sm:$0xff] }
  0x27   :  { %v428_v32 = vsub.f32 %v4499_v53, %v7875_v30  ;;  %7877 = vst [vmem:[#allocation35_spill] sm:$0xff] %v4558_v57  ;;  %418 = vmatprep.subr.mxu1 %v417_v63  ;;  %v434_v7 = vsub.f32 %v4515_v20, %v7878_v39  ;;  %7879 = vst [vmem:[#allocation36_spill] sm:$0xff] %v4567_v14  ;;  %v4570_v30 = vand.u32 4294901760, %v4533_v26  ;;  %215 = vmatpush2.msra.mxu0 %v4542_v19 }
  0x28   :  { %424 = vmatpush1.msra.mxu1 %v423_v1  ;;  %7881 = vst [vmem:[#allocation38_spill] sm:$0xff] %v4581_v50  ;;  %7882 = vst [vmem:[#allocation39_spill] sm:$0xff] %v4584_v44  ;;  %v7883_v1 = vand.u32 4294901760, %v4539_v62  ;;  %v7489_v39 = vand.u32 4294901760, %v4567_v14  ;;  %v446_v20 = vsub.f32 %v4555_v27, %v7885_v43  ;;  %217 = vmatprep.subr.mxu0 %v4558_v57  ;;  %v4606_v53 = vand.u32 4294901760, %v4575_v49 }
  0x29   :  { %7880 = vst [vmem:[#allocation37_spill] sm:$0xff] %v4570_v30  ;;  %v429_v63 = vand.u32 4294901760, %v428_v32  ;;  %v435_v54 = vand.u32 4294901760, %v434_v7  ;;  %7884 = vst [vmem:[#allocation40_spill] sm:$0xff] %v4598_v37  ;;  %219 = vmatpush2.msra.mxu0 %v4570_v30  ;;  %v4623_v56 = vand.u32 4294901760, %v4589_v29  ;;  %v4637_v7 = vsub.f32 %v4451_v12, %v4485_v52  ;;  %v4685_v52 = vld [vmem:[%s7419_s0 + $0x328] sm:$0xff] }
  0x2a   :  { %v440_v32 = vsub.f32 %v4539_v62, %v7883_v1  ;;  %7886 = vst [vmem:[#allocation41_spill] sm:$0xff] %v4606_v53  ;;  %v4610_v1 = vsub.f32 %v4437_v51, %v4468_v38  ;;  %v452_v43 = vsub.f32 %v4567_v14, %v7489_v39  ;;  %v4628_v51 = vld [vmem:[%s7419_s0 + $0x368] sm:$0xff]  ;;  %v447_v38 = vand.u32 4294901760, %v446_v20  ;;  %221 = vmatprep.subr.mxu0 %v4584_v44  ;;  %v4642_v14 = vld [vmem:[%s7419_s0 + $0x360] sm:$0xff] }
  0x2b   :  { %430 = vmatprep.subr.mxu1 %v429_v63  ;;  %7888 = vst [vmem:[#allocation43_spill] sm:$0xff] %v4623_v56  ;;  %7890 = vst [vmem:[#allocation44_spill] sm:$0xff] %v4637_v7  ;;  %v7891_v20 = vand.u32 4294901760, %v4598_v37  ;;  %223 = vmatpush2.msra.mxu0 %v4606_v53  ;;  %v4653_v12 = vsub.f32 %v4477_v2, %v4511_v58  ;;  %v4658_v39 = vld [vmem:[%s7419_s0 + $0x348] sm:$0xff]  ;;  %v4671_v2 = vld [vmem:[%s7419_s0 + $0x340] sm:$0xff] }
  0x2c   :  { %7887 = vst [vmem:[#allocation42_spill] sm:$0xff] %v4610_v1  ;;  %436 = vmatpush1.msra.mxu1 %v435_v54  ;;  %v441_v63 = vand.u32 4294901760, %v440_v32  ;;  %v7889_v54 = vand.u32 4294901760, %v4581_v50  ;;  %v453_v27 = vand.u32 4294901760, %v452_v43  ;;  %v7894_v43 = vand.u32 4294901760, %v4610_v1  ;;  %225 = vmatprep.subr.mxu0 %v4623_v56 }
  0x2d   :  { %v464_v62 = vsub.f32 %v4598_v37, %v7891_v20  ;;  %7893 = vst [vmem:[#allocation46_spill] sm:$0xff] %v4653_v12  ;;  %v4666_v37 = vand.u32 4294901760, %v4628_v51 }
  0x2e   :  { %v458_v32 = vsub.f32 %v4581_v50, %v7889_v54  ;;  %442 = vmatprep.subr.mxu1 %v441_v63  ;;  %v4649_v54 = vand.u32 4294901760, %v4615_v33  ;;  %v470_v20 = vsub.f32 %v4610_v1, %v7894_v43  ;;  %v4680_v43 = vand.u32 4294901760, %v4642_v14 }
  0x2f   :  { %448 = vmatpush1.msra.mxu1 %v447_v38  ;;  %7895 = vst [vmem:[#allocation47_spill] sm:$0xff] %v4666_v37  ;;  %v465_v58 = vand.u32 4294901760, %v464_v62  ;;  %v7898_v62 = vand.u32 4294901760, %v4637_v7  ;;  %v4696_v38 = vand.u32 4294901760, %v4658_v39 }
  0x30   :  { %7892 = vst [vmem:[#allocation45_spill] sm:$0xff] %v4649_v54  ;;  %v459_v63 = vand.u32 4294901760, %v458_v32  ;;  %454 = vmatprep.subr.mxu1 %v453_v27  ;;  %227 = vmatpush2.msra.mxu0 %v4649_v54  ;;  %v4677_v32 = vsub.f32 %v4490_v13, %v4528_v61  ;;  %7897 = vst [vmem:[#allocation49_spill] sm:$0xff] %v4680_v43  ;;  %v471_v1 = vand.u32 4294901760, %v470_v20  ;;  %v7901_v61 = vand.u32 4294901760, %v4653_v12 }
  0x31   :  { %v476_v27 = vsub.f32 %v4637_v7, %v7898_v62  ;;  %229 = vmatprep.subr.mxu0 %v4666_v37  ;;  %v4693_v13 = vsub.f32 %v4504_v41, %v4542_v19  ;;  %7900 = vst [vmem:[#allocation51_spill] sm:$0xff] %v4696_v38  ;;  %v4705_v20 = vsub.f32 %v4520_v36, %v4558_v57  ;;  %v4708_v62 = vand.u32 4294901760, %v4671_v2  ;;  %v4713_v41 = vld [vmem:[%s7419_s0 + $0x320] sm:$0xff]  ;;  %v4727_v57 = vld [vmem:[%s7419_s0 + $0x308] sm:$0xff] }
  0x32   :  { %7896 = vst [vmem:[#allocation48_spill] sm:$0xff] %v4677_v32  ;;  %460 = vmatpush1.msra.mxu1 %v459_v63  ;;  %v482_v50 = vsub.f32 %v4653_v12, %v7901_v61  ;;  %231 = vmatpush2.msra.mxu0 %v4680_v43  ;;  %v4719_v63 = vsub.f32 %v4533_v26, %v4570_v30  ;;  %v4722_v36 = vand.u32 4294901760, %v4685_v52  ;;  %v4779_v7 = vld [vmem:[%s7419_s0 + $0x2e0] sm:$0xff] }
  0x33   :  { %7899 = vst [vmem:[#allocation50_spill] sm:$0xff] %v4693_v13  ;;  %466 = vmatprep.subr.mxu1 %v465_v58  ;;  %7902 = vst [vmem:[#allocation52_spill] sm:$0xff] %v4705_v20  ;;  %v477_v58 = vand.u32 4294901760, %v476_v27  ;;  %233 = vmatprep.subr.mxu0 %v4696_v38  ;;  %v7524_v61 = vand.u32 4294901760, %v4705_v20  ;;  %v4736_v26 = vsub.f32 %v4547_v47, %v4584_v44  ;;  %v7908_v30 = vand.u32 4294901760, %v4693_v13  ;;  %v4753_v47 = vld [vmem:[%s7419_s0 + $0x300] sm:$0xff] }
  0x34   :  { %7903 = vst [vmem:[#allocation53_spill] sm:$0xff] %v4708_v62  ;;  %472 = vmatpush1.msra.mxu1 %v471_v1  ;;  %7904 = vst [vmem:[#allocation54_spill] sm:$0xff] %v4719_v63  ;;  %v483_v19 = vand.u32 4294901760, %v482_v50  ;;  %v7906_v1 = vand.u32 4294901760, %v4677_v32  ;;  %235 = vmatpush2.msra.mxu0 %v4708_v62  ;;  %v4744_v50 = vand.u32 4294901760, %v4713_v41  ;;  %v4760_v44 = vand.u32 4294901760, %v4727_v57 }
  0x35   :  { %7905 = vst [vmem:[#allocation55_spill] sm:$0xff] %v4722_v36  ;;  %7907 = vst [vmem:[#allocation56_spill] sm:$0xff] %v4736_v26  ;;  %478 = vmatprep.subr.mxu1 %v477_v58  ;;  %v494_v12 = vsub.f32 %v4693_v13, %v7908_v30  ;;  %237 = vmatprep.subr.mxu0 %v4722_v36  ;;  %v500_v30 = vsub.f32 %v4705_v20, %v7524_v61  ;;  %v7912_v13 = vand.u32 4294901760, %v4719_v63 }
  0x36   :  { %v488_v27 = vsub.f32 %v4677_v32, %v7906_v1  ;;  %7909 = vst [vmem:[#allocation57_spill] sm:$0xff] %v4744_v50  ;;  %v4748_v1 = vsub.f32 %v4575_v49, %v4606_v53  ;;  %484 = vmatpush1.msra.mxu1 %v483_v19  ;;  %7911 = vst [vmem:[#allocation59_spill] sm:$0xff] %v4760_v44  ;;  %v4765_v49 = vld [vmem:[%s7419_s0 + $0x2e8] sm:$0xff]  ;;  %239 = vmatpush2.msra.mxu0 %v4744_v50 }
  0x37   :  { %v495_v53 = vand.u32 4294901760, %v494_v12  ;;  %v506_v19 = vsub.f32 %v4719_v63, %v7912_v13  ;;  %v4774_v61 = vsub.f32 %v4589_v29, %v4623_v56  ;;  %v501_v20 = vand.u32 4294901760, %v500_v30  ;;  %241 = vmatprep.subr.mxu0 %v4760_v44  ;;  %v4821_v56 = vld [vmem:[%s7419_s0 + $0x2a8] sm:$0xff] }
  0x38   :  { %7910 = vst [vmem:[#allocation58_spill] sm:$0xff] %v4748_v1  ;;  %v489_v58 = vand.u32 4294901760, %v488_v27  ;;  %v7914_v12 = vand.u32 4294901760, %v4736_v26  ;;  %v4786_v13 = vand.u32 4294901760, %v4753_v47  ;;  %v4790_v29 = vsub.f32 %v4615_v33, %v4649_v54  ;;  %v4795_v27 = vld [vmem:[%s7419_s0 + $0x2c8] sm:$0xff]  ;;  %v4807_v33 = vld [vmem:[%s7419_s0 + $0x2c0] sm:$0xff] }
  0x39   :  { %7913 = vst [vmem:[#allocation60_spill] sm:$0xff] %v4774_v61  ;;  %v7917_v30 = vand.u32 4294901760, %v4748_v1 }
  0x3a   :  { %490 = vmatprep.subr.mxu1 %v489_v58  ;;  %v512_v32 = vsub.f32 %v4736_v26, %v7914_v12  ;;  %7915 = vst [vmem:[#allocation61_spill] sm:$0xff] %v4786_v13  ;;  %7916 = vst [vmem:[#allocation62_spill] sm:$0xff] %v4790_v29  ;;  %v507_v58 = vand.u32 4294901760, %v506_v19  ;;  %v4802_v26 = vand.u32 4294901760, %v4765_v49  ;;  %243 = vmatpush2.msra.mxu0 %v4786_v13 }
  0x3b   :  { %496 = vmatpush2.msra.mxu1 %v495_v53  ;;  %v518_v12 = vsub.f32 %v4748_v1, %v7917_v30  ;;  %v4813_v19 = vsub.f32 %v4628_v51, %v4666_v37  ;;  %v4816_v30 = vand.u32 4294901760, %v4779_v7  ;;  %v4829_v51 = vsub.f32 %v4642_v14, %v4680_v43  ;;  %v4849_v14 = vld [vmem:[%s7419_s0 + $0x2a0] sm:$0xff] }
  0x3c   :  { %7918 = vst [vmem:[#allocation63_spill] sm:$0xff] %v4802_v26  ;;  %502 = vmatprep.subr.mxu1 %v501_v20  ;;  %v513_v54 = vand.u32 4294901760, %v512_v32  ;;  %v7921_v32 = vand.u32 4294901760, %v4774_v61  ;;  %245 = vmatprep.subr.mxu0 %v4802_v26  ;;  %v4832_v53 = vand.u32 4294901760, %v4795_v27  ;;  %v7924_v37 = vand.u32 4294901760, %v4790_v29 }
  0x3d   :  { %7919 = vst [vmem:[#allocation64_spill] sm:$0xff] %v4813_v19  ;;  %7920 = vst [vmem:[#allocation65_spill] sm:$0xff] %v4816_v30  ;;  %508 = vmatpush2.msra.mxu1 %v507_v58  ;;  %v519_v1 = vand.u32 4294901760, %v518_v12  ;;  %247 = vmatpush2.msra.mxu0 %v4816_v30  ;;  %v4841_v12 = vsub.f32 %v4658_v39, %v4696_v38  ;;  %v4855_v58 = vsub.f32 %v4671_v2, %v4708_v62  ;;  %v4863_v38 = vld [vmem:[%s7419_s0 + $0x288] sm:$0xff] }
  0x3e   :  { %v524_v20 = vsub.f32 %v4774_v61, %v7921_v32  ;;  %7922 = vst [vmem:[#allocation66_spill] sm:$0xff] %v4829_v51  ;;  %7923 = vst [vmem:[#allocation67_spill] sm:$0xff] %v4832_v53  ;;  %514 = vmatprep.subr.mxu1 %v513_v54  ;;  %v530_v63 = vsub.f32 %v4790_v29, %v7924_v37  ;;  %v4844_v32 = vand.u32 4294901760, %v4807_v33  ;;  %249 = vmatprep.subr.mxu0 %v4832_v53  ;;  %v4915_v61 = vld [vmem:[%s7419_s0 + $0x260] sm:$0xff] }
  0x3f   :  { %7925 = vst [vmem:[#allocation68_spill] sm:$0xff] %v4841_v12  ;;  %520 = vmatpush2.msra.mxu1 %v519_v1  ;;  %7927 = vst [vmem:[#allocation70_spill] sm:$0xff] %v4855_v58  ;;  %v4858_v39 = vand.u32 4294901760, %v4821_v56  ;;  %v7929_v1 = vand.u32 4294901760, %v4813_v19  ;;  %v7557_v37 = vand.u32 4294901760, %v4841_v12  ;;  %v4872_v2 = vsub.f32 %v4685_v52, %v4722_v36  ;;  %v4889_v52 = vld [vmem:[%s7419_s0 + $0x280] sm:$0xff] }
  0x40   :  { %7926 = vst [vmem:[#allocation69_spill] sm:$0xff] %v4844_v32  ;;  %v525_v54 = vand.u32 4294901760, %v524_v20  ;;  %v531_v43 = vand.u32 4294901760, %v530_v63  ;;  %251 = vmatpush2.msra.mxu0 %v4844_v32  ;;  %v7931_v62 = vand.u32 4294901760, %v4829_v51  ;;  %v4880_v63 = vand.u32 4294901760, %v4849_v14 }
  0x41   :  { %7928 = vst [vmem:[#allocation71_spill] sm:$0xff] %v4858_v39  ;;  %v536_v20 = vsub.f32 %v4813_v19, %v7929_v1  ;;  %7930 = vst [vmem:[#allocation72_spill] sm:$0xff] %v4872_v2  ;;  %253 = vmatprep.subr.mxu0 %v4858_v39  ;;  %v4884_v1 = vsub.f32 %v4713_v41, %v4744_v50  ;;  %v4896_v36 = vand.u32 4294901760, %v4863_v38  ;;  %v4901_v41 = vld [vmem:[%s7419_s0 + $0x268] sm:$0xff] }
  0x42   :  { %526 = vmatprep.subr.mxu1 %v525_v54  ;;  %v542_v29 = vsub.f32 %v4829_v51, %v7931_v62  ;;  %7932 = vst [vmem:[#allocation73_spill] sm:$0xff] %v4880_v63  ;;  %v548_v62 = vsub.f32 %v4841_v12, %v7557_v37  ;;  %v7935_v51 = vand.u32 4294901760, %v4855_v58  ;;  %255 = vmatpush2.msra.mxu0 %v4880_v63 }
  0x43   :  { %7933 = vst [vmem:[#allocation74_spill] sm:$0xff] %v4884_v1  ;;  %532 = vmatpush2.msra.mxu1 %v531_v43  ;;  %v537_v54 = vand.u32 4294901760, %v536_v20  ;;  %7934 = vst [vmem:[#allocation75_spill] sm:$0xff] %v4896_v36  ;;  %v4910_v37 = vsub.f32 %v4727_v57, %v4760_v44  ;;  %257 = vmatprep.subr.mxu0 %v4896_v36  ;;  %v4926_v57 = vsub.f32 %v4753_v47, %v4786_v13  ;;  %v4931_v20 = vld [vmem:[%s7419_s0 + $0x248] sm:$0xff]  ;;  %v4943_v47 = vld [vmem:[%s7419_s0 + $0x240] sm:$0xff] }
  0x44   :  { %v543_v50 = vand.u32 4294901760, %v542_v29  ;;  %v554_v43 = vsub.f32 %v4855_v58, %v7935_v51  ;;  %v549_v12 = vand.u32 4294901760, %v548_v62  ;;  %v7937_v29 = vand.u32 4294901760, %v4872_v2  ;;  %v4957_v44 = vld [vmem:[%s7419_s0 + $0x228] sm:$0xff] }
  0x45   :  { %7936 = vst [vmem:[#allocation76_spill] sm:$0xff] %v4910_v37  ;;  %538 = vmatprep.subr.mxu1 %v537_v54  ;;  %v4922_v51 = vand.u32 4294901760, %v4889_v52  ;;  %7939 = vst [vmem:[#allocation78_spill] sm:$0xff] %v4926_v57  ;;  %v7940_v62 = vand.u32 4294901760, %v4884_v1 }
  0x46   :  { %v560_v19 = vsub.f32 %v4872_v2, %v7937_v29  ;;  %544 = vmatpush2.msra.mxu1 %v543_v50  ;;  %v555_v54 = vand.u32 4294901760, %v554_v43  ;;  %v4938_v2 = vand.u32 4294901760, %v4901_v41  ;;  %v4949_v43 = vsub.f32 %v4765_v49, %v4802_v26 }
  0x47   :  { %7938 = vst [vmem:[#allocation77_spill] sm:$0xff] %v4922_v51  ;;  %v566_v29 = vsub.f32 %v4884_v1, %v7940_v62  ;;  %550 = vmatprep.subr.mxu1 %v549_v12  ;;  %259 = vmatpush2.msra.mxu0 %v4922_v51  ;;  %v4952_v62 = vand.u32 4294901760, %v4915_v61  ;;  %v4965_v49 = vsub.f32 %v4779_v7, %v4816_v30  ;;  %v4968_v50 = vand.u32 4294901760, %v4931_v20  ;;  %v4985_v7 = vld [vmem:[%s7419_s0 + $0x220] sm:$0xff] }
  0x48   :  { %v561_v13 = vand.u32 4294901760, %v560_v19  ;;  %7941 = vst [vmem:[#allocation79_spill] sm:$0xff] %v4949_v43  ;;  %556 = vmatpush2.msra.mxu1 %v555_v54  ;;  %v7942_v19 = vand.u32 4294901760, %v4910_v37  ;;  %261 = vmatprep.subr.mxu0 %v4938_v2  ;;  %v7945_v26 = vand.u32 4294901760, %v4926_v57  ;;  %v4991_v54 = vsub.f32 %v4807_v33, %v4844_v32 }
  0x49   :  { %v567_v1 = vand.u32 4294901760, %v566_v29  ;;  %7943 = vst [vmem:[#allocation80_spill] sm:$0xff] %v4965_v49  ;;  %7944 = vst [vmem:[#allocation81_spill] sm:$0xff] %v4968_v50  ;;  %263 = vmatpush2.msra.mxu0 %v4952_v62  ;;  %v4977_v29 = vsub.f32 %v4795_v27, %v4832_v53  ;;  %v4994_v27 = vand.u32 4294901760, %v4957_v44  ;;  %v4999_v53 = vld [vmem:[%s7419_s0 + $0x208] sm:$0xff]  ;;  %v5008_v33 = vsub.f32 %v4821_v56, %v4858_v39  ;;  %v5025_v56 = vld [vmem:[%s7419_s0 + $0x200] sm:$0xff] }
  0x4a   :  { %v572_v12 = vsub.f32 %v4910_v37, %v7942_v19  ;;  %562 = vmatprep.subr.mxu1 %v561_v13  ;;  %v578_v58 = vsub.f32 %v4926_v57, %v7945_v26  ;;  %v4980_v19 = vand.u32 4294901760, %v4943_v47  ;;  %265 = vmatprep.subr.mxu0 %v4968_v50  ;;  %7948 = vst [vmem:[#allocation84_spill] sm:$0xff] %v4991_v54  ;;  %v7952_v32 = vand.u32 4294901760, %v4965_v49 }
  0x4b   :  { %7946 = vst [vmem:[#allocation82_spill] sm:$0xff] %v4977_v29  ;;  %568 = vmatpush2.msra.mxu1 %v567_v1  ;;  %7949 = vst [vmem:[#allocation85_spill] sm:$0xff] %v4994_v27  ;;  %v7950_v1 = vand.u32 4294901760, %v4949_v43  ;;  %v7592_v26 = vand.u32 4294901760, %v4977_v29  ;;  %v5032_v39 = vand.u32 4294901760, %v4999_v53 }
  0x4c   :  { %7947 = vst [vmem:[#allocation83_spill] sm:$0xff] %v4980_v19  ;;  %v573_v13 = vand.u32 4294901760, %v572_v12  ;;  %v579_v30 = vand.u32 4294901760, %v578_v58  ;;  %267 = vmatpush2.msra.mxu0 %v4980_v19  ;;  %7951 = vst [vmem:[#allocation86_spill] sm:$0xff] %v5008_v33  ;;  %v590_v57 = vsub.f32 %v4965_v49, %v7952_v32  ;;  %v5016_v58 = vand.u32 4294901760, %v4985_v7 }
  0x4d   :  { %v584_v12 = vsub.f32 %v4949_v43, %v7950_v1  ;;  %269 = vmatprep.subr.mxu0 %v4994_v27  ;;  %v5020_v1 = vsub.f32 %v4849_v14, %v4880_v63  ;;  %v596_v32 = vsub.f32 %v4977_v29, %v7592_v26  ;;  %v19_v14 = vld [vmem:[%s7421_s2 + $0x8] sm:$0xff]  ;;  %v7954_v49 = vand.u32 4294901760, %v4991_v54  ;;  %v18_v26 = vld [vmem:[%s7421_s2] sm:$0xff] }
  0x4e   :  { %574 = vmatprep.subr.mxu1 %v573_v13  ;;  %v591_v63 = vand.u32 4294901760, %v590_v57  ;;  %271 = vmatpush2.msra.mxu0 %v5016_v58  ;;  %v7956_v57 = vand.u32 4294901760, %v5008_v33 }
  0x4f   :  { %7953 = vst [vmem:[#allocation87_spill] sm:$0xff] %v5020_v1  ;;  %580 = vmatpush2.msra.mxu1 %v579_v30  ;;  %v585_v13 = vand.u32 4294901760, %v584_v12  ;;  %v602_v43 = vsub.f32 %v4991_v54, %v7954_v49  ;;  %v5044_v12 = vsub.f32 %v4863_v38, %v4896_v36  ;;  %v597_v37 = vand.u32 4294901760, %v596_v32  ;;  %273 = vmatprep.subr.mxu0 %v5032_v39 }
  0x50   :  { %v608_v29 = vsub.f32 %v5008_v33, %v7956_v57  ;;  %v5054_v49 = vand.u32 4294901760, %v5025_v56  ;;  %v5058_v30 = vsub.f32 %v4889_v52, %v4922_v51  ;;  %v7958_v36 = vand.u32 4294901760, %v5020_v1 }
  0x51   :  { %7955 = vst [vmem:[#allocation88_spill] sm:$0xff] %v5044_v12  ;;  %586 = vmatprep.subr.mxu1 %v585_v13  ;;  %v603_v38 = vand.u32 4294901760, %v602_v43  ;;  %v7604_v32 = vand.u32 4294901760, %v5044_v12  ;;  %v5064_v54 = vand.u32 4294901760, %v19_v14  ;;  %v5070_v52 = vsub.f32 %v4901_v41, %v4938_v2 }
  0x52   :  { %7957 = vst [vmem:[#allocation89_spill] sm:$0xff] %v5058_v30  ;;  %592 = vmatpush2.msra.mxu1 %v591_v63  ;;  %v614_v13 = vsub.f32 %v5020_v1, %v7958_v36  ;;  %v609_v57 = vand.u32 4294901760, %v608_v29  ;;  %275 = vmatpush2.msra.mxu0 %v5054_v49  ;;  %v7603_v33 = vand.u32 4294901760, %v5058_v30  ;;  %v5072_v63 = vand.u32 4294901760, %v18_v26 }
  0x53   :  { %7959 = vst [vmem:[#allocation90_spill] sm:$0xff] %v5064_v54  ;;  %598 = vmatprep.subr.mxu1 %v597_v37  ;;  %7960 = vst [vmem:[#allocation91_spill] sm:$0xff] %v5070_v52  ;;  %v620_v36 = vsub.f32 %v5044_v12, %v7604_v32  ;;  %v5078_v51 = vsub.f32 %v19_v14, %v5064_v54  ;;  %688 = vmatprep.subr.mxu0 %v4125_v18  ;;  %v7607_v29 = vand.u32 4294901760, %v5070_v52 }
  0x54   :  { %7961 = vst [vmem:[#allocation92_spill] sm:$0xff] %v5072_v63  ;;  %604 = vmatpush2.msra.mxu1 %v603_v38  ;;  %v615_v43 = vand.u32 4294901760, %v614_v13  ;;  %v5083_v37 = vsub.f32 %v4915_v61, %v4952_v62  ;;  %v626_v41 = vsub.f32 %v5058_v30, %v7603_v33  ;;  %v5090_v38 = vsub.f32 %v18_v26, %v5072_v63 }
  0x55   :  { %7962 = vst [vmem:[#allocation93_spill] sm:$0xff] %v5078_v51  ;;  %610 = vmatprep.subr.mxu1 %v609_v57  ;;  %v5094_v14 = vsub.f32 %v4931_v20, %v4968_v50  ;;  %678 = vmatprep.mubr.f32.mxu1 %v5064_v54  ;;  %v621_v13 = vand.u32 4294901760, %v620_v36  ;;  %v5098_v61 = vand.u32 4294901760, %v5078_v51  ;;  %v5103_v33 = vsub.f32 %v4943_v47, %v4980_v19 }
  0x56   :  { %7963 = vst [vmem:[#allocation94_spill] sm:$0xff] %v5083_v37  ;;  %7964 = vst [vmem:[#allocation95_spill] sm:$0xff] %v5090_v38  ;;  %616 = vmatpush2.msra.mxu1 %v615_v43  ;;  %v7612_v57 = vand.u32 4294901760, %v5083_v37  ;;  %v627_v32 = vand.u32 4294901760, %v626_v41  ;;  %v632_v26 = vsub.f32 %v5070_v52, %v7607_v29  ;;  %v5109_v20 = vand.u32 4294901760, %v5090_v38 }
  0x57   :  { %7965 = vst [vmem:[#allocation96_spill] sm:$0xff] %v5094_v14  ;;  %7966 = vst [vmem:[#allocation97_spill] sm:$0xff] %v5098_v61  ;;  %v7619_v43 = vand.u32 4294901760, %v5094_v14  ;;  %622 = vmatprep.subr.mxu1 %v621_v13  ;;  %v279_v36 = vsub.f32 %v5078_v51, %v5098_v61  ;;  %v5120_v41 = vsub.f32 %v4957_v44, %v4994_v27  ;;  %v7971_v50 = vand.u32 4294901760, %v5103_v33 }
  0x58   :  { %7967 = vst [vmem:[#allocation98_spill] sm:$0xff] %v5109_v20  ;;  %v638_v54 = vsub.f32 %v5083_v37, %v7612_v57  ;;  %628 = vmatpush2.msra.mxu1 %v627_v32  ;;  %v633_v29 = vand.u32 4294901760, %v632_v26  ;;  %v285_v19 = vsub.f32 %v5090_v38, %v5109_v20  ;;  %v5129_v61 = vsub.f32 %v4985_v7, %v5016_v58 }
  0x59   :  { %7968 = vst [vmem:[#allocation99_spill] sm:$0xff] %v5120_v41  ;;  %v644_v13 = vsub.f32 %v5094_v14, %v7619_v43  ;;  %v5131_v57 = vand.u32 4294901760, %v279_v36  ;;  %v650_v44 = vsub.f32 %v5103_v33, %v7971_v50  ;;  %v7623_v32 = vand.u32 4294901760, %v5120_v41 }
  0x5a   :  { %7969 = vst [vmem:[#allocation100_spill] sm:$0xff] %v5129_v61  ;;  %v639_v47 = vand.u32 4294901760, %v638_v54  ;;  %634 = vmatprep.subr.mxu1 %v633_v29  ;;  %v5137_v26 = vand.u32 4294901760, %v285_v19  ;;  %v7622_v27 = vand.u32 4294901760, %v5129_v61  ;;  %v5142_v43 = vsub.f32 %v4999_v53, %v5032_v39 }
  0x5b   :  { %7970 = vst [vmem:[#allocation101_spill] sm:$0xff] %v5131_v57  ;;  %v645_v20 = vand.u32 4294901760, %v644_v13  ;;  %281 = vmatprep.mubr.f32.mxu0 %v5131_v57  ;;  %v651_v54 = vand.u32 4294901760, %v650_v44  ;;  %v656_v50 = vsub.f32 %v5120_v41, %v7623_v32  ;;  %v5150_v7 = vsub.f32 %v5025_v56, %v5054_v49  ;;  %v7986_v32 = vld [vmem:[#allocation34_spill] sm:$0xff]  ;;  %v7989_v57 = vld [vmem:[#allocation12_spill] sm:$0xff] }
  0x5c   :  { %7972 = vst [vmem:[#allocation102_spill] sm:$0xff] %v5137_v26  ;;  %640 = vmatpush2.msra.mxu1 %v639_v47  ;;  %287 = vmatmul.mubr.f32.vlgmr.msra.gmra.mxu0 %v5137_v26  ;;  %v662_v53 = vsub.f32 %v5129_v61, %v7622_v27  ;;  %v7621_v19 = vand.u32 4294901760, %v5142_v43  ;;  %v7985_v27 = vld [vmem:[#allocation10_spill] sm:$0xff]  ;;  %v7988_v26 = vld [vmem:[#allocation36_spill] sm:$0xff] }
  0x5d   :  { %7973 = vst [vmem:[#allocation103_spill] sm:$0xff] %v5150_v7  ;;  %646 = vmatprep.subr.mxu1 %v645_v20  ;;  %691 = vmatpush1.msra.mxu0 %v4147_v23  ;;  %v657_v29 = vand.u32 4294901760, %v656_v50  ;;  %v7620_v36 = vand.u32 4294901760, %v5150_v7  ;;  %v7975_v50 = vld [vmem:[#allocation5_spill] sm:$0xff] }
  0x5e   :  { %652 = vmatpush2.msra.mxu1 %v651_v54  ;;  %694 = vmatprep.subr.mxu0 %v4153_v25  ;;  %v663_v47 = vand.u32 4294901760, %v662_v53  ;;  %v668_v56 = vsub.f32 %v5142_v43, %v7621_v19  ;;  %v7974_v54 = vld [vmem:[#allocation22_spill] sm:$0xff]  ;;  %v7976_v53 = vld [vmem:[#allocation24_spill] sm:$0xff] }
  0x5f   :  { %880 = vmatprep.mubr.f32.mxu0 %v5078_v51  ;;  %697 = vmatpush1.msra.mxu0 %v4176_v31  ;;  %v674_v20 = vsub.f32 %v5150_v7, %v7620_v36  ;;  %v7983_v36 = vld [vmem:[#allocation9_spill] sm:$0xff]  ;;  %v7984_v19 = vld [vmem:[#allocation32_spill] sm:$0xff]  ;;  %v7987_v51 = vld [vmem:[#allocation11_spill] sm:$0xff] }
  0x60   :  { %658 = vmatprep.subr.mxu1 %v657_v29  ;;  %700 = vmatprep.subr.mxu0 %v4185_v35  ;;  %v669_v13 = vand.u32 4294901760, %v668_v56  ;;  %v7977_v29 = vld [vmem:[#allocation6_spill] sm:$0xff]  ;;  %v7979_v56 = vld [vmem:[#allocation7_spill] sm:$0xff] }
  0x61   :  { %664 = vmatpush2.msra.mxu1 %v663_v47  ;;  %703 = vmatpush1.msra.mxu0 %v4201_v40  ;;  %v675_v44 = vand.u32 4294901760, %v674_v20  ;;  %v7978_v47 = vld [vmem:[#allocation26_spill] sm:$0xff]  ;;  %v7980_v20 = vld [vmem:[#allocation28_spill] sm:$0xff] }
  0x62   :  { %670 = vmatprep.subr.mxu1 %v669_v13  ;;  %706 = vmatprep.subr.mxu0 %v4215_v45  ;;  %v7981_v13 = vld [vmem:[#allocation8_spill] sm:$0xff] }
  0x63   :  { %676 = vmatpush2.msra.mxu1 %v675_v44  ;;  %709 = vmatpush1.msra.mxu0 %v4250_v59  ;;  %v7982_v44 = vld [vmem:[#allocation30_spill] sm:$0xff] }
  0x64   :  { %680 = vmatmul.mubr.f32.vlgmr.msra.gmra.mxu1 %v5072_v63  ;;  %712 = vmatprep.subr.mxu0 %v4265_v0  ;;  %v7990_v63 = vld [vmem:[#allocation38_spill] sm:$0xff] }
  0x65   :  { %890 = vmatprep.subr.mxu1 %v4087_v3  ;;  %715 = vmatpush1.msra.mxu0 %v4279_v8 }
  0x66   :  { %892 = vmatpush1.msra.mxu1 %v4089_v4  ;;  %718 = vmatprep.subr.mxu0 %v4293_v42 }
  0x67   :  { %894 = vmatprep.subr.mxu1 %v4091_v5  ;;  %721 = vmatpush1.msra.mxu0 %v4305_v48 }
  0x68   :  { %896 = vmatpush1.msra.mxu1 %v4102_v9  ;;  %724 = vmatprep.subr.mxu0 %v4322_v21 }
  0x69   :  { %898 = vmatprep.subr.mxu1 %v4104_v10  ;;  %727 = vmatpush1.msra.mxu0 %v4334_v6 }
  0x6a   :  { %900 = vmatpush1.msra.mxu1 %v4106_v11  ;;  %730 = vmatprep.subr.mxu0 %v4361_v55 }
  0x6b   :  { %902 = vmatprep.subr.mxu1 %v4118_v15  ;;  %733 = vmatpush1.msra.mxu0 %v4377_v28 }
  0x6c   :  { %904 = vmatpush1.msra.mxu1 %v4120_v16  ;;  %736 = vmatprep.subr.mxu0 %v4401_v34 }
  0x6d   :  { %906 = vmatprep.subr.mxu1 %v4122_v17  ;;  %739 = vmatpush1.msra.mxu0 %v4417_v46 }
  0x6e   :  { %908 = vmatpush1.msra.mxu1 %v4144_v22  ;;  %742 = vmatprep.subr.mxu0 %v4429_v60 }
  0x6f   :  { %910 = vmatprep.subr.mxu1 %v4150_v24  ;;  %745 = vmatpush1.msra.mxu0 %v7974_v54 }
  0x70   :  { %912 = vmatpush1.msra.mxu1 %v7975_v50  ;;  %748 = vmatprep.subr.mxu0 %v7976_v53 }
  0x71   :  { %914 = vmatprep.subr.mxu1 %v7977_v29  ;;  %751 = vmatpush1.msra.mxu0 %v7978_v47 }
  0x72   :  { %916 = vmatpush1.msra.mxu1 %v7979_v56  ;;  %754 = vmatprep.subr.mxu0 %v7980_v20  ;;  %v7991_v20 = vld [vmem:[#allocation13_spill] sm:$0xff] }
  0x73   :  { %918 = vmatprep.subr.mxu1 %v7981_v13  ;;  %757 = vmatpush1.msra.mxu0 %v7982_v44  ;;  %v7992_v13 = vld [vmem:[#allocation40_spill] sm:$0xff]  ;;  %v7993_v44 = vld [vmem:[#allocation14_spill] sm:$0xff] }
  0x74   :  { %920 = vmatpush1.msra.mxu1 %v7983_v36  ;;  %760 = vmatprep.subr.mxu0 %v7984_v19  ;;  %v7994_v36 = vld [vmem:[#allocation42_spill] sm:$0xff]  ;;  %v7995_v19 = vld [vmem:[#allocation15_spill] sm:$0xff] }
  0x75   :  { %922 = vmatprep.subr.mxu1 %v7985_v27  ;;  %763 = vmatpush1.msra.mxu0 %v7986_v32  ;;  %v7996_v27 = vld [vmem:[#allocation44_spill] sm:$0xff] }
  0x76   :  { %924 = vmatpush1.msra.mxu1 %v7987_v51  ;;  %766 = vmatprep.subr.mxu0 %v7988_v26  ;;  %v7997_v32 = vld [vmem:[#allocation16_spill] sm:$0xff]  ;;  %v7998_v51 = vld [vmem:[#allocation46_spill] sm:$0xff]  ;;  %v7999_v26 = vld [vmem:[#allocation17_spill] sm:$0xff] }
  0x77   :  { %926 = vmatprep.subr.mxu1 %v7989_v57  ;;  %769 = vmatpush1.msra.mxu0 %v7990_v63  ;;  %v8000_v57 = vld [vmem:[#allocation48_spill] sm:$0xff]  ;;  %v8001_v63 = vld [vmem:[#allocation18_spill] sm:$0xff] }
  0x78   :  { %928 = vmatpush1.msra.mxu1 %v7991_v20  ;;  %772 = vmatprep.subr.mxu0 %v7992_v13  ;;  %v8002_v20 = vld [vmem:[#allocation50_spill] sm:$0xff]  ;;  %v8003_v13 = vld [vmem:[#allocation19_spill] sm:$0xff] }
  0x79   :  { %930 = vmatprep.subr.mxu1 %v7993_v44  ;;  %775 = vmatpush1.msra.mxu0 %v7994_v36  ;;  %v8004_v44 = vld [vmem:[#allocation52_spill] sm:$0xff] }
  0x7a   :  { %932 = vmatpush1.msra.mxu1 %v7995_v19  ;;  %778 = vmatprep.subr.mxu0 %v7996_v27  ;;  %v8005_v36 = vld [vmem:[#allocation20_spill] sm:$0xff]  ;;  %v8006_v19 = vld [vmem:[#allocation54_spill] sm:$0xff]  ;;  %v8007_v27 = vld [vmem:[#allocation21_spill] sm:$0xff] }
  0x7b   :  { %934 = vmatprep.subr.mxu1 %v7997_v32  ;;  %781 = vmatpush1.msra.mxu0 %v7998_v51  ;;  %v8008_v32 = vld [vmem:[#allocation56_spill] sm:$0xff]  ;;  %v8009_v51 = vld [vmem:[#allocation23_spill] sm:$0xff] }
  0x7c   :  { %936 = vmatpush1.msra.mxu1 %v7999_v26  ;;  %784 = vmatprep.subr.mxu0 %v8000_v57  ;;  %v8010_v26 = vld [vmem:[#allocation58_spill] sm:$0xff]  ;;  %v8011_v57 = vld [vmem:[#allocation25_spill] sm:$0xff] }
  0x7d   :  { %938 = vmatprep.subr.mxu1 %v8001_v63  ;;  %787 = vmatpush2.msra.mxu0 %v8002_v20  ;;  %v8012_v63 = vld [vmem:[#allocation60_spill] sm:$0xff]  ;;  %v8013_v20 = vld [vmem:[#allocation27_spill] sm:$0xff] }
  0x7e   :  { %940 = vmatpush1.msra.mxu1 %v8003_v13  ;;  %790 = vmatprep.subr.mxu0 %v8004_v44  ;;  %v8014_v13 = vld [vmem:[#allocation62_spill] sm:$0xff]  ;;  %v8015_v44 = vld [vmem:[#allocation29_spill] sm:$0xff] }
  0x7f   :  { %942 = vmatprep.subr.mxu1 %v8005_v36  ;;  %793 = vmatpush2.msra.mxu0 %v8006_v19  ;;  %v8016_v36 = vld [vmem:[#allocation64_spill] sm:$0xff]  ;;  %v8017_v19 = vld [vmem:[#allocation31_spill] sm:$0xff] }
  0x80   :  { %944 = vmatpush1.msra.mxu1 %v8007_v27  ;;  %796 = vmatprep.subr.mxu0 %v8008_v32  ;;  %v8018_v27 = vld [vmem:[#allocation66_spill] sm:$0xff]  ;;  %v8019_v32 = vld [vmem:[#allocation33_spill] sm:$0xff] }
  0x81   :  { %946 = vmatprep.subr.mxu1 %v8009_v51  ;;  %799 = vmatpush2.msra.mxu0 %v8010_v26  ;;  %v8020_v51 = vld [vmem:[#allocation68_spill] sm:$0xff]  ;;  %v8021_v26 = vld [vmem:[#allocation35_spill] sm:$0xff] }
  0x82   :  { %948 = vmatpush1.msra.mxu1 %v8011_v57  ;;  %802 = vmatprep.subr.mxu0 %v8012_v63  ;;  %v8022_v57 = vld [vmem:[#allocation70_spill] sm:$0xff]  ;;  %v8023_v63 = vld [vmem:[#allocation37_spill] sm:$0xff] }
  0x83   :  { %950 = vmatprep.subr.mxu1 %v8013_v20  ;;  %805 = vmatpush2.msra.mxu0 %v8014_v13  ;;  %v8024_v20 = vld [vmem:[#allocation72_spill] sm:$0xff]  ;;  %v8025_v13 = vld [vmem:[#allocation39_spill] sm:$0xff] }
  0x84   :  { %952 = vmatpush1.msra.mxu1 %v8015_v44  ;;  %808 = vmatprep.subr.mxu0 %v8016_v36  ;;  %v8026_v44 = vld [vmem:[#allocation74_spill] sm:$0xff]  ;;  %v8027_v36 = vld [vmem:[#allocation41_spill] sm:$0xff] }
  0x85   :  { %954 = vmatprep.subr.mxu1 %v8017_v19  ;;  %811 = vmatpush2.msra.mxu0 %v8018_v27  ;;  %v8028_v19 = vld [vmem:[#allocation76_spill] sm:$0xff]  ;;  %v8029_v27 = vld [vmem:[#allocation43_spill] sm:$0xff] }
  0x86   :  { %956 = vmatpush2.msra.mxu1 %v8019_v32  ;;  %814 = vmatprep.subr.mxu0 %v8020_v51  ;;  %v8030_v32 = vld [vmem:[#allocation78_spill] sm:$0xff]  ;;  %v8031_v51 = vld [vmem:[#allocation45_spill] sm:$0xff] }
  0x87   :  { %958 = vmatprep.subr.mxu1 %v8021_v26  ;;  %817 = vmatpush2.msra.mxu0 %v8022_v57  ;;  %v8032_v26 = vld [vmem:[#allocation79_spill] sm:$0xff] }
  0x88   :  { %960 = vmatpush2.msra.mxu1 %v8023_v63  ;;  %820 = vmatprep.subr.mxu0 %v8024_v20  ;;  %v8033_v57 = vld [vmem:[#allocation47_spill] sm:$0xff]  ;;  %v8034_v63 = vld [vmem:[#allocation80_spill] sm:$0xff]  ;;  %v8035_v20 = vld [vmem:[#allocation49_spill] sm:$0xff] }
  0x89   :  { %962 = vmatprep.subr.mxu1 %v8025_v13  ;;  %823 = vmatpush2.msra.mxu0 %v8026_v44  ;;  %v8036_v13 = vld [vmem:[#allocation82_spill] sm:$0xff]  ;;  %v8037_v44 = vld [vmem:[#allocation51_spill] sm:$0xff] }
  0x8a   :  { %964 = vmatpush2.msra.mxu1 %v8027_v36  ;;  %826 = vmatprep.subr.mxu0 %v8028_v19  ;;  %v8038_v36 = vld [vmem:[#allocation84_spill] sm:$0xff]  ;;  %v8039_v19 = vld [vmem:[#allocation53_spill] sm:$0xff] }
  0x8b   :  { %966 = vmatprep.subr.mxu1 %v8029_v27  ;;  %829 = vmatpush2.msra.mxu0 %v8030_v32  ;;  %v8040_v27 = vld [vmem:[#allocation86_spill] sm:$0xff]  ;;  %v8041_v32 = vld [vmem:[#allocation55_spill] sm:$0xff] }
  0x8c   :  { %968 = vmatpush2.msra.mxu1 %v8031_v51  ;;  %832 = vmatprep.subr.mxu0 %v8032_v26  ;;  %v8042_v26 = vld [vmem:[#allocation57_spill] sm:$0xff] }
  0x8d   :  { %970 = vmatprep.subr.mxu1 %v8033_v57  ;;  %835 = vmatpush2.msra.mxu0 %v8034_v63  ;;  %v8043_v63 = vld [vmem:[#allocation59_spill] sm:$0xff] }
  0x8e   :  { %972 = vmatpush2.msra.mxu1 %v8035_v20  ;;  %838 = vmatprep.subr.mxu0 %v8036_v13  ;;  %v8044_v13 = vld [vmem:[#allocation61_spill] sm:$0xff] }
  0x8f   :  { %974 = vmatprep.subr.mxu1 %v8037_v44  ;;  %841 = vmatpush2.msra.mxu0 %v8038_v36  ;;  %v8045_v36 = vld [vmem:[#allocation63_spill] sm:$0xff] }
  0x90   :  { %976 = vmatpush2.msra.mxu1 %v8039_v19  ;;  %844 = vmatprep.subr.mxu0 %v8040_v27  ;;  %v8046_v27 = vld [vmem:[#allocation65_spill] sm:$0xff] }
  0x91   :  { %978 = vmatprep.subr.mxu1 %v8041_v32  ;;  %847 = vmatpush2.msra.mxu0 %v5020_v1  ;;  %v8047_v1 = vld [vmem:[#allocation67_spill] sm:$0xff] }
  0x92   :  { %980 = vmatpush2.msra.mxu1 %v8042_v26  ;;  %850 = vmatprep.subr.mxu0 %v5044_v12  ;;  %v8048_v12 = vld [vmem:[#allocation69_spill] sm:$0xff] }
  0x93   :  { %982 = vmatprep.subr.mxu1 %v8043_v63  ;;  %853 = vmatpush2.msra.mxu0 %v5058_v30  ;;  %v8049_v30 = vld [vmem:[#allocation71_spill] sm:$0xff] }
  0x94   :  { %984 = vmatpush2.msra.mxu1 %v8044_v13  ;;  %856 = vmatprep.subr.mxu0 %v5070_v52  ;;  %v8050_v52 = vld [vmem:[#allocation73_spill] sm:$0xff] }
  0x95   :  { %986 = vmatprep.subr.mxu1 %v8045_v36  ;;  %859 = vmatpush2.msra.mxu0 %v5083_v37  ;;  %v8051_v37 = vld [vmem:[#allocation75_spill] sm:$0xff] }
  0x96   :  { %988 = vmatpush2.msra.mxu1 %v8046_v27  ;;  %862 = vmatprep.subr.mxu0 %v5094_v14  ;;  %v8052_v14 = vld [vmem:[#allocation77_spill] sm:$0xff] }
  0x97   :  { %990 = vmatprep.subr.mxu1 %v8047_v1  ;;  %865 = vmatpush2.msra.mxu0 %v5103_v33 }
  0x98   :  { %992 = vmatpush2.msra.mxu1 %v8048_v12  ;;  %868 = vmatprep.subr.mxu0 %v5120_v41  ;;  %v8053_v41 = vand.u32 4294901760, %v4125_v18  ;;  %v8060_v18 = vand.u32 4294901760, %v4185_v35  ;;  %v8066_v35 = vand.u32 4294901760, %v4265_v0  ;;  %v8070_v0 = vand.u32 4294901760, %v4322_v21  ;;  %v8088_v21 = vld [vmem:[#allocation10_spill] sm:$0xff] }
  0x99   :  { %994 = vmatprep.subr.mxu1 %v8049_v30  ;;  %871 = vmatpush2.msra.mxu0 %v5129_v61  ;;  %v8054_v61 = vand.u32 4294901760, %v4147_v23  ;;  %v8061_v23 = vand.u32 4294901760, %v4201_v40  ;;  %v8067_v40 = vand.u32 4294901760, %v4279_v8  ;;  %v8085_v8 = vld [vmem:[#allocation9_spill] sm:$0xff] }
  0x9a   :  { %996 = vmatpush2.msra.mxu1 %v8050_v52  ;;  %874 = vmatprep.subr.mxu0 %v5142_v43  ;;  %v8055_v52 = vld [vmem:[#allocation81_spill] sm:$0xff] }
  0x9b   :  { %998 = vmatprep.subr.mxu1 %v8051_v37  ;;  %877 = vmatpush2.msra.mxu0 %v5150_v7  ;;  %v8056_v37 = vand.u32 4294901760, %v4153_v25  ;;  %v8057_v7 = vld [vmem:[#allocation83_spill] sm:$0xff]  ;;  %v8062_v25 = vand.u32 4294901760, %v4215_v45  ;;  %v8068_v45 = vand.u32 4294901760, %v4293_v42  ;;  %v8086_v42 = vld [vmem:[#allocation32_spill] sm:$0xff] }
  0x9c   :  { %1000 = vmatpush2.msra.mxu1 %v8052_v14  ;;  %883 = vmatmul.mubr.f32.vlgmr.msra.gmra.mxu0 %v5090_v38  ;;  %v8058_v14 = vand.u32 4294901760, %v4176_v31  ;;  %v8059_v38 = vld [vmem:[#allocation85_spill] sm:$0xff]  ;;  %v8064_v31 = vand.u32 4294901760, %v4250_v59  ;;  %v8069_v59 = vand.u32 4294901760, %v4305_v48  ;;  %v8087_v48 = vand.u32 4294901760, %v8086_v42  ;;  %v8124_v42 = vld [vmem:[#allocation23_spill] sm:$0xff] }
  0x9d   :  { %1002 = vmatprep.subr.mxu1 %v4938_v2  ;;  %1033 = vmatprep.subr.mxu0 %v8053_v41 }
  0x9e   :  { %1004 = vmatpush2.msra.mxu1 %v4952_v62  ;;  %1037 = vmatpush1.msra.mxu0 %v8054_v61  ;;  %v8092_v61 = vld [vmem:[#allocation36_spill] sm:$0xff] }
  0x9f   :  { %1006 = vmatprep.subr.mxu1 %v8055_v52  ;;  %1041 = vmatprep.subr.mxu0 %v8056_v37  ;;  %v8063_v37 = vld [vmem:[#allocation97_spill] sm:$0xff]  ;;  %v8093_v41 = vand.u32 4294901760, %v8092_v61  ;;  %v8130_v61 = vld [vmem:[#allocation27_spill] sm:$0xff] }
  0xa0   :  { %1008 = vmatpush2.msra.mxu1 %v8057_v7  ;;  %1045 = vmatpush1.msra.mxu0 %v8058_v14  ;;  %v8065_v14 = vld [vmem:[#allocation98_spill] sm:$0xff] }
  0xa1   :  { %1010 = vmatprep.subr.mxu1 %v8059_v38  ;;  %1049 = vmatprep.subr.mxu0 %v8060_v18  ;;  %v8100_v18 = vld [vmem:[#allocation14_spill] sm:$0xff] }
  0xa2   :  { %1012 = vmatpush2.msra.mxu1 %v5016_v58  ;;  %1053 = vmatpush1.msra.mxu0 %v8061_v23  ;;  %v8101_v23 = vld [vmem:[#allocation42_spill] sm:$0xff] }
  0xa3   :  { %1014 = vmatprep.subr.mxu1 %v5032_v39  ;;  %1057 = vmatprep.subr.mxu0 %v8062_v25  ;;  %v8102_v25 = vand.u32 4294901760, %v8101_v23  ;;  %v79_v23 = vld [vmem:[%s7419_s0 + $0x1d8] sm:$0xff] }
  0xa4   :  { %1016 = vmatpush2.msra.mxu1 %v5054_v49  ;;  %1020 = vmatprep.mubr.f32.mxu1 %v8063_v37 }
  0xa5   :  { %1061 = vmatpush1.msra.mxu0 %v8064_v31  ;;  %1024 = vmatmul.mubr.f32.vlgmr.msra.gmra.mxu1 %v8065_v14  ;;  %v8103_v31 = vld [vmem:[#allocation15_spill] sm:$0xff] }
  0xa6   :  { %1065 = vmatprep.subr.mxu0 %v8066_v35  ;;  %1296 = vmatprep.subr.mxu1 %v4087_v3  ;;  %v8071_v3 = vand.u32 4294901760, %v4334_v6  ;;  %v8089_v6 = vld [vmem:[#allocation34_spill] sm:$0xff]  ;;  %v8104_v35 = vld [vmem:[#allocation44_spill] sm:$0xff]  ;;  %v8214_v14 = vld [vmem:[#allocation103_spill] sm:$0xff] }
  0xa7   :  { %1069 = vmatpush1.msra.mxu0 %v8067_v40  ;;  %1298 = vmatpush1.msra.mxu1 %v4089_v4  ;;  %v8072_v4 = vand.u32 4294901760, %v4361_v55  ;;  %v8082_v55 = vld [vmem:[#allocation8_spill] sm:$0xff]  ;;  %v8105_v40 = vand.u32 4294901760, %v8104_v35  ;;  %v8139_v35 = vld [vmem:[#allocation33_spill] sm:$0xff]  ;;  %v8215_v37 = vand.u32 4294901760, %v8214_v14 }
  0xa8   :  { %1073 = vmatprep.subr.mxu0 %v8068_v45  ;;  %1300 = vmatprep.subr.mxu1 %v4091_v5  ;;  %v8073_v5 = vand.u32 4294901760, %v4377_v28  ;;  %v8090_v28 = vand.u32 4294901760, %v8089_v6  ;;  %v8106_v45 = vld [vmem:[#allocation16_spill] sm:$0xff]  ;;  %v8127_v6 = vld [vmem:[#allocation25_spill] sm:$0xff] }
  0xa9   :  { %1077 = vmatpush1.msra.mxu0 %v8069_v59  ;;  %1302 = vmatpush1.msra.mxu1 %v4102_v9  ;;  %v8074_v9 = vand.u32 4294901760, %v4401_v34  ;;  %v8107_v59 = vld [vmem:[#allocation46_spill] sm:$0xff] }
  0xaa   :  { %1081 = vmatprep.subr.mxu0 %v8070_v0  ;;  %1304 = vmatprep.subr.mxu1 %v4104_v10  ;;  %v8075_v10 = vand.u32 4294901760, %v4417_v46  ;;  %v8091_v46 = vld [vmem:[#allocation11_spill] sm:$0xff]  ;;  %v8108_v0 = vand.u32 4294901760, %v8107_v59 }
  0xab   :  { %1085 = vmatpush1.msra.mxu0 %v8071_v3  ;;  %1306 = vmatpush1.msra.mxu1 %v4106_v11  ;;  %v8076_v11 = vand.u32 4294901760, %v4429_v60  ;;  %v8109_v3 = vld [vmem:[#allocation17_spill] sm:$0xff]  ;;  %v78_v59 = vld [vmem:[%s7419_s0 + $0x1d0] sm:$0xff] }
  0xac   :  { %1089 = vmatprep.subr.mxu0 %v8072_v4  ;;  %1308 = vmatprep.subr.mxu1 %v4118_v15  ;;  %v8077_v15 = vand.u32 4294901760, %v7974_v54  ;;  %v8094_v54 = vld [vmem:[#allocation12_spill] sm:$0xff] }
  0xad   :  { %1093 = vmatpush1.msra.mxu0 %v8073_v5  ;;  %1310 = vmatpush1.msra.mxu1 %v4120_v16  ;;  %v8078_v16 = vand.u32 4294901760, %v7976_v53  ;;  %v8110_v4 = vld [vmem:[#allocation48_spill] sm:$0xff] }
  0xae   :  { %1097 = vmatprep.subr.mxu0 %v8074_v9  ;;  %1312 = vmatprep.subr.mxu1 %v4122_v17  ;;  %v8079_v17 = vand.u32 4294901760, %v7978_v47  ;;  %v8098_v47 = vld [vmem:[#allocation40_spill] sm:$0xff]  ;;  %v8111_v5 = vand.u32 4294901760, %v8110_v4  ;;  %v8112_v9 = vld [vmem:[#allocation18_spill] sm:$0xff]  ;;  %v8143_v4 = vld [vmem:[#allocation35_spill] sm:$0xff] }
  0xaf   :  { %1101 = vmatpush1.msra.mxu0 %v8075_v10  ;;  %1314 = vmatpush1.msra.mxu1 %v4144_v22  ;;  %v8080_v22 = vld [vmem:[#allocation28_spill] sm:$0xff]  ;;  %v8113_v10 = vld [vmem:[#allocation50_spill] sm:$0xff] }
  0xb0   :  { %1105 = vmatprep.subr.mxu0 %v8076_v11  ;;  %1316 = vmatprep.subr.mxu1 %v4150_v24  ;;  %v8081_v34 = vand.u32 4294901760, %v8080_v22  ;;  %v8083_v24 = vld [vmem:[#allocation30_spill] sm:$0xff]  ;;  %v8114_v11 = vand.u32 4294901760, %v8113_v10  ;;  %v8118_v22 = vld [vmem:[#allocation20_spill] sm:$0xff]  ;;  %v8146_v10 = vld [vmem:[#allocation37_spill] sm:$0xff] }
  0xb1   :  { %1109 = vmatpush1.msra.mxu0 %v8077_v15  ;;  %1318 = vmatpush1.msra.mxu1 %v7975_v50  ;;  %v8084_v60 = vand.u32 4294901760, %v8083_v24  ;;  %v8095_v50 = vld [vmem:[#allocation38_spill] sm:$0xff]  ;;  %v8115_v15 = vld [vmem:[#allocation19_spill] sm:$0xff]  ;;  %v8121_v24 = vld [vmem:[#allocation21_spill] sm:$0xff] }
  0xb2   :  { %1113 = vmatprep.subr.mxu0 %v8078_v16  ;;  %1320 = vmatprep.subr.mxu1 %v7977_v29  ;;  %v8096_v53 = vand.u32 4294901760, %v8095_v50  ;;  %v8097_v29 = vld [vmem:[#allocation13_spill] sm:$0xff]  ;;  %v8116_v16 = vld [vmem:[#allocation52_spill] sm:$0xff]  ;;  %v8131_v50 = vld [vmem:[#allocation62_spill] sm:$0xff] }
  0xb3   :  { %1117 = vmatpush1.msra.mxu0 %v8079_v17  ;;  %1322 = vmatpush1.msra.mxu1 %v7979_v56  ;;  %v8099_v56 = vand.u32 4294901760, %v8098_v47  ;;  %v8117_v17 = vand.u32 4294901760, %v8116_v16  ;;  %v8134_v47 = vld [vmem:[#allocation64_spill] sm:$0xff]  ;;  %v74_v16 = vld [vmem:[%s7419_s0 + $0x1b0] sm:$0xff] }
  0xb4   :  { %1121 = vmatprep.subr.mxu0 %v8081_v34  ;;  %1324 = vmatprep.subr.mxu1 %v8082_v55  ;;  %v8119_v34 = vld [vmem:[#allocation54_spill] sm:$0xff] }
  0xb5   :  { %1125 = vmatpush1.msra.mxu0 %v8084_v60  ;;  %1326 = vmatpush1.msra.mxu1 %v8085_v8  ;;  %v8120_v55 = vand.u32 4294901760, %v8119_v34  ;;  %v8122_v60 = vld [vmem:[#allocation56_spill] sm:$0xff]  ;;  %v8150_v34 = vld [vmem:[#allocation39_spill] sm:$0xff] }
  0xb6   :  { %1129 = vmatprep.subr.mxu0 %v8087_v48  ;;  %1328 = vmatprep.subr.mxu1 %v8088_v21  ;;  %v8123_v8 = vand.u32 4294901760, %v8122_v60  ;;  %v8125_v48 = vld [vmem:[#allocation58_spill] sm:$0xff] }
  0xb7   :  { %1133 = vmatpush1.msra.mxu0 %v8090_v28  ;;  %1330 = vmatpush1.msra.mxu1 %v8091_v46  ;;  %v8126_v21 = vand.u32 4294901760, %v8125_v48  ;;  %v8128_v28 = vld [vmem:[#allocation60_spill] sm:$0xff] }
  0xb8   :  { %1137 = vmatprep.subr.mxu0 %v8093_v41  ;;  %1332 = vmatprep.subr.mxu1 %v8094_v54  ;;  %v8129_v46 = vand.u32 4294901760, %v8128_v28  ;;  %v83_v41 = vld [vmem:[%s7419_s0 + $0x1f8] sm:$0xff]  ;;  %v82_v54 = vld [vmem:[%s7419_s0 + $0x1f0] sm:$0xff] }
  0xb9   :  { %1141 = vmatpush1.msra.mxu0 %v8096_v53  ;;  %1334 = vmatpush1.msra.mxu1 %v8097_v29  ;;  %v8132_v53 = vand.u32 4294901760, %v8131_v50  ;;  %v8133_v29 = vld [vmem:[#allocation29_spill] sm:$0xff]  ;;  %v71_v48 = vld [vmem:[%s7419_s0 + $0x198] sm:$0xff]  ;;  %v5466_v50 = vand.u32 4294901760, %v74_v16 }
  0xba   :  { %1145 = vmatprep.subr.mxu0 %v8099_v56  ;;  %1336 = vmatprep.subr.mxu1 %v8100_v18  ;;  %v8135_v56 = vand.u32 4294901760, %v8134_v47  ;;  %v8136_v18 = vld [vmem:[#allocation31_spill] sm:$0xff] }
  0xbb   :  { %1149 = vmatpush1.msra.mxu0 %v8102_v25  ;;  %1338 = vmatpush1.msra.mxu1 %v8103_v31  ;;  %v8137_v25 = vld [vmem:[#allocation66_spill] sm:$0xff]  ;;  %8159 = vst [vmem:[#allocation26_spill] sm:$0xff] %v5466_v50  ;;  %v8162_v47 = vld [vmem:[#allocation79_spill] sm:$0xff] }
  0xbc   :  { %1153 = vmatprep.subr.mxu0 %v8105_v40  ;;  %1340 = vmatprep.subr.mxu1 %v8106_v45  ;;  %v8138_v31 = vand.u32 4294901760, %v8137_v25  ;;  %v5423_v40 = vand.u32 4294901760, %v83_v41  ;;  %v5425_v45 = vand.u32 4294901760, %v82_v54  ;;  %v5483_v25 = vand.u32 4294901760, %v71_v48 }
  0xbd   :  { %1157 = vmatpush1.msra.mxu0 %v8108_v0  ;;  %1342 = vmatpush1.msra.mxu1 %v8109_v3  ;;  %v8141_v0 = vld [vmem:[#allocation68_spill] sm:$0xff] }
  0xbe   :  { %1161 = vmatprep.subr.mxu0 %v8111_v5  ;;  %1344 = vmatprep.subr.mxu1 %v8112_v9  ;;  %8140 = vst [vmem:[#allocation22_spill] sm:$0xff] %v5425_v45  ;;  %v8142_v3 = vand.u32 4294901760, %v8141_v0  ;;  %v8144_v5 = vld [vmem:[#allocation70_spill] sm:$0xff]  ;;  %8164 = vst [vmem:[#allocation7_spill] sm:$0xff] %v5483_v25 }
  0xbf   :  { %1165 = vmatpush2.msra.mxu0 %v8114_v11  ;;  %1346 = vmatpush1.msra.mxu1 %v8115_v15  ;;  %v8145_v9 = vand.u32 4294901760, %v8144_v5  ;;  %v5436_v11 = vand.u32 4294901760, %v79_v23  ;;  %v75_v15 = vld [vmem:[%s7419_s0 + $0x1b8] sm:$0xff]  ;;  %v5502_v5 = vsub.f32 %v74_v16, %v5466_v50 }
  0xc0   :  { %1169 = vmatprep.subr.mxu0 %v8117_v17  ;;  %1348 = vmatprep.subr.mxu1 %v8118_v22  ;;  %v8148_v17 = vld [vmem:[#allocation72_spill] sm:$0xff] }
  0xc1   :  { %1173 = vmatpush2.msra.mxu0 %v8120_v55  ;;  %1350 = vmatpush1.msra.mxu1 %v8121_v24  ;;  %8147 = vst [vmem:[#allocation5_spill] sm:$0xff] %v5436_v11  ;;  %v8149_v22 = vand.u32 4294901760, %v8148_v17  ;;  %v5447_v55 = vand.u32 4294901760, %v78_v59  ;;  %v8152_v24 = vld [vmem:[#allocation74_spill] sm:$0xff]  ;;  %8170 = vst [vmem:[#allocation47_spill] sm:$0xff] %v5502_v5 }
  0xc2   :  { %1177 = vmatprep.subr.mxu0 %v8123_v8  ;;  %1352 = vmatprep.subr.mxu1 %v8124_v42  ;;  %v8153_v60 = vand.u32 4294901760, %v8152_v24  ;;  %v8154_v8 = vld [vmem:[#allocation41_spill] sm:$0xff]  ;;  %v5453_v42 = vsub.f32 %v82_v54, %v5425_v45  ;;  %v70_v54 = vld [vmem:[%s7419_s0 + $0x190] sm:$0xff]  ;;  %v8175_v24 = vld [vmem:[#allocation86_spill] sm:$0xff] }
  0xc3   :  { %1181 = vmatpush2.msra.mxu0 %v8126_v21  ;;  %1354 = vmatpush1.msra.mxu1 %v8127_v6  ;;  %8151 = vst [vmem:[#allocation24_spill] sm:$0xff] %v5447_v55  ;;  %v5459_v21 = vsub.f32 %v83_v41, %v5423_v40  ;;  %v8155_v6 = vld [vmem:[#allocation76_spill] sm:$0xff]  ;;  %v5475_v41 = vsub.f32 %v79_v23, %v5436_v11  ;;  %v5494_v0 = vand.u32 4294901760, %v70_v54 }
  0xc4   :  { %1185 = vmatprep.subr.mxu0 %v8129_v46  ;;  %1356 = vmatprep.subr.mxu1 %v8130_v61  ;;  %v8156_v28 = vand.u32 4294901760, %v8155_v6  ;;  %v8157_v46 = vld [vmem:[#allocation43_spill] sm:$0xff]  ;;  %v5464_v61 = vand.u32 4294901760, %v75_v15  ;;  %v8165_v23 = vld [vmem:[#allocation80_spill] sm:$0xff] }
  0xc5   :  { %1189 = vmatpush2.msra.mxu0 %v8132_v53  ;;  %1358 = vmatpush1.msra.mxu1 %v8133_v29  ;;  %v8160_v53 = vld [vmem:[#allocation78_spill] sm:$0xff]  ;;  %8167 = vst [vmem:[#allocation45_spill] sm:$0xff] %v5494_v0  ;;  %v7642_v16 = vand.u32 4294901760, %v5475_v41 }
  0xc6   :  { %1193 = vmatprep.subr.mxu0 %v8135_v56  ;;  %1360 = vmatprep.subr.mxu1 %v8136_v18  ;;  %8158 = vst [vmem:[#allocation6_spill] sm:$0xff] %v5464_v61  ;;  %v8161_v29 = vand.u32 4294901760, %v8160_v53  ;;  %v8163_v56 = vand.u32 4294901760, %v8162_v47  ;;  %v5481_v18 = vsub.f32 %v78_v59, %v5447_v55  ;;  %v7643_v59 = vand.u32 4294901760, %v5453_v42  ;;  %v59_v53 = vld [vmem:[%s7419_s0 + $0x138] sm:$0xff] }
  0xc7   :  { %1197 = vmatpush2.msra.mxu0 %v8138_v31  ;;  %1362 = vmatpush2.msra.mxu1 %v8139_v35  ;;  %v67_v31 = vld [vmem:[%s7419_s0 + $0x178] sm:$0xff]  ;;  %v8166_v35 = vand.u32 4294901760, %v8165_v23  ;;  %v7640_v23 = vand.u32 4294901760, %v5502_v5 }
  0xc8   :  { %1201 = vmatprep.subr.mxu0 %v8142_v3  ;;  %1364 = vmatprep.subr.mxu1 %v8143_v4  ;;  %v8168_v3 = vld [vmem:[#allocation82_spill] sm:$0xff] }
  0xc9   :  { %1205 = vmatpush2.msra.mxu0 %v8145_v9  ;;  %1366 = vmatpush2.msra.mxu1 %v8146_v10  ;;  %v8169_v4 = vand.u32 4294901760, %v8168_v3  ;;  %v62_v9 = vld [vmem:[%s7419_s0 + $0x150] sm:$0xff]  ;;  %v8171_v10 = vld [vmem:[#allocation84_spill] sm:$0xff] }
  0xca   :  { %1209 = vmatprep.subr.mxu0 %v8149_v22  ;;  %1368 = vmatprep.subr.mxu1 %v8150_v34  ;;  %v8172_v17 = vand.u32 4294901760, %v8171_v10  ;;  %v5513_v22 = vand.u32 4294901760, %v67_v31  ;;  %v5568_v10 = vsub.f32 %v5475_v41, %v7642_v16 }
  0xcb   :  { %1213 = vmatpush2.msra.mxu0 %v8153_v60  ;;  %1370 = vmatpush2.msra.mxu1 %v8154_v8  ;;  %v8176_v60 = vand.u32 4294901760, %v8175_v24  ;;  %v5526_v8 = vsub.f32 %v71_v48, %v5483_v25  ;;  %v5544_v48 = vand.u32 4294901760, %v62_v9  ;;  %v8189_v24 = vld [vmem:[#allocation91_spill] sm:$0xff] }
  0xcc   :  { %1217 = vmatprep.subr.mxu0 %v8156_v28  ;;  %1372 = vmatprep.subr.mxu1 %v8157_v46  ;;  %8173 = vst [vmem:[#allocation49_spill] sm:$0xff] %v5513_v22  ;;  %v5532_v28 = vsub.f32 %v70_v54, %v5494_v0  ;;  %v8182_v54 = vld [vmem:[#allocation88_spill] sm:$0xff] }
  0xcd   :  { %1221 = vmatpush2.msra.mxu0 %v8161_v29  ;;  %1374 = vmatpush2.msra.mxu1 %v8031_v51  ;;  %v66_v51 = vld [vmem:[%s7419_s0 + $0x170] sm:$0xff]  ;;  %8177 = vst [vmem:[#allocation53_spill] sm:$0xff] %v5526_v8  ;;  %8181 = vst [vmem:[#allocation57_spill] sm:$0xff] %v5544_v48  ;;  %v8183_v29 = vand.u32 4294901760, %v8182_v54  ;;  %v8193_v54 = vld [vmem:[#allocation94_spill] sm:$0xff] }
  0xce   :  { %1225 = vmatprep.subr.mxu0 %v8163_v56  ;;  %1376 = vmatprep.subr.mxu1 %v8033_v57  ;;  %v7644_v57 = vand.u32 4294901760, %v5459_v21  ;;  %v5515_v34 = vand.u32 4294901760, %v66_v51  ;;  %8180 = vst [vmem:[#allocation55_spill] sm:$0xff] %v5532_v28 }
  0xcf   :  { %1229 = vmatpush2.msra.mxu0 %v8166_v35  ;;  %1378 = vmatpush2.msra.mxu1 %v8035_v20  ;;  %v5508_v20 = vsub.f32 %v75_v15, %v5464_v61  ;;  %v7639_v15 = vand.u32 4294901760, %v5481_v18  ;;  %v8185_v35 = vld [vmem:[#allocation89_spill] sm:$0xff] }
  0xd0   :  { %1233 = vmatprep.subr.mxu0 %v8169_v4  ;;  %1380 = vmatprep.subr.mxu1 %v8037_v44  ;;  %8174 = vst [vmem:[#allocation51_spill] sm:$0xff] %v5515_v34  ;;  %v63_v44 = vld [vmem:[%s7419_s0 + $0x158] sm:$0xff]  ;;  %v5537_v46 = vsub.f32 %v5459_v21, %v7644_v57  ;;  %v8186_v3 = vand.u32 4294901760, %v8185_v35  ;;  %v5563_v4 = vsub.f32 %v66_v51, %v5515_v34  ;;  %v5584_v51 = vand.u32 4294901760, %v59_v53  ;;  %v8202_v57 = vld [vmem:[#allocation99_spill] sm:$0xff] }
  0xd1   :  { %1237 = vmatpush2.msra.mxu0 %v8172_v17  ;;  %1382 = vmatpush2.msra.mxu1 %v8039_v19  ;;  %v8178_v19 = vld [vmem:[#allocation87_spill] sm:$0xff]  ;;  %v5555_v47 = vand.u32 4294901760, %v63_v44  ;;  %v7641_v56 = vand.u32 4294901760, %v5508_v20  ;;  %v5574_v17 = vsub.f32 %v67_v31, %v5513_v22  ;;  %v7645_v31 = vand.u32 4294901760, %v5526_v8 }
  0xd2   :  { %1241 = vmatprep.subr.mxu0 %v8176_v60  ;;  %1384 = vmatprep.subr.mxu1 %v8041_v32  ;;  %v8179_v6 = vand.u32 4294901760, %v8178_v19  ;;  %v5542_v32 = vsub.f32 %v5453_v42, %v7643_v59  ;;  %8187 = vst [vmem:[#allocation61_spill] sm:$0xff] %v5563_v4  ;;  %v8190_v60 = vand.u32 4294901760, %v8189_v24  ;;  %8191 = vst [vmem:[#allocation65_spill] sm:$0xff] %v5584_v51  ;;  %v7646_v24 = vand.u32 4294901760, %v5532_v28 }
  0xd3   :  { %1386 = vmatpush2.msra.mxu1 %v8042_v26  ;;  %v58_v26 = vld [vmem:[%s7419_s0 + $0x130] sm:$0xff]  ;;  %8184 = vst [vmem:[#allocation59_spill] sm:$0xff] %v5555_v47  ;;  %8188 = vst [vmem:[#allocation63_spill] sm:$0xff] %v5574_v17  ;;  %v8203_v35 = vand.u32 4294901760, %v8202_v57  ;;  %v8206_v57 = vld [vmem:[#allocation100_spill] sm:$0xff] }
  0xd4   :  { %1245 = vmatpush2.msra.mxu0 %v8179_v6  ;;  %1388 = vmatprep.subr.mxu1 %v8043_v63  ;;  %v54_v63 = vld [vmem:[%s7419_s0 + $0x110] sm:$0xff]  ;;  %v5586_v19 = vand.u32 4294901760, %v58_v26  ;;  %v55_v6 = vld [vmem:[%s7419_s0 + $0x118] sm:$0xff] }
  0xd5   :  { %1249 = vmatprep.subr.mxu0 %v8183_v29  ;;  %1390 = vmatpush2.msra.mxu1 %v8044_v13  ;;  %v5582_v13 = vsub.f32 %v5481_v18, %v7639_v15  ;;  %v8194_v29 = vand.u32 4294901760, %v8193_v54  ;;  %v5607_v54 = vsub.f32 %v5508_v20, %v7641_v56  ;;  %v5629_v56 = vand.u32 4294901760, %v55_v6 }
  0xd6   :  { %1253 = vmatpush2.msra.mxu0 %v8186_v3  ;;  %1392 = vmatprep.subr.mxu1 %v8045_v36  ;;  %8192 = vst [vmem:[#allocation67_spill] sm:$0xff] %v5586_v19  ;;  %v5598_v3 = vsub.f32 %v62_v9, %v5544_v48  ;;  %v51_v9 = vld [vmem:[%s7419_s0 + $0xf8] sm:$0xff] }
  0xd7   :  { %1257 = vmatprep.subr.mxu0 %v8190_v60  ;;  %1394 = vmatpush2.msra.mxu1 %v8046_v27  ;;  %v8196_v60 = vld [vmem:[#allocation96_spill] sm:$0xff]  ;;  %v5612_v27 = vsub.f32 %v5502_v5, %v7640_v23  ;;  %8201 = vst [vmem:[#allocation83_spill] sm:$0xff] %v5629_v56  ;;  %v5649_v23 = vsub.f32 %v59_v53, %v5584_v51  ;;  %v8217_v53 = vand.u32 4294901760, %v5574_v17 }
  0xd8   :  { %1261 = vmatpush2.msra.mxu0 %v8194_v29  ;;  %8195 = vst [vmem:[#allocation69_spill] sm:$0xff] %v5598_v3  ;;  %v8197_v15 = vand.u32 4294901760, %v8196_v60  ;;  %1396 = vmatprep.subr.mxu1 %v8047_v1  ;;  %v5614_v29 = vand.u32 4294901760, %v54_v63  ;;  %v50_v1 = vld [vmem:[%s7419_s0 + $0xf0] sm:$0xff]  ;;  %v8200_v60 = vand.u32 4294901760, %v5103_v33  ;;  %v5638_v33 = vsub.f32 %v58_v26, %v5586_v19  ;;  %v47_v36 = vld [vmem:[%s7419_s0 + $0xd8] sm:$0xff] }
  0xd9   :  { %1398 = vmatpush2.msra.mxu1 %v8048_v12  ;;  %v5643_v12 = vsub.f32 %v5526_v8, %v7645_v31  ;;  %8205 = vst [vmem:[#allocation28_spill] sm:$0xff] %v5649_v23  ;;  %v5657_v26 = vsub.f32 %v5532_v28, %v7646_v24  ;;  %v5661_v31 = vand.u32 4294901760, %v50_v1  ;;  %v8216_v28 = vld [vmem:[#allocation90_spill] sm:$0xff]  ;;  %v5698_v14 = vsub.f32 %v55_v6, %v5629_v56 }
  0xda   :  { %1265 = vmatprep.subr.mxu0 %v8197_v15  ;;  %8198 = vst [vmem:[#allocation71_spill] sm:$0xff] %v5614_v29  ;;  %v5623_v15 = vsub.f32 %v63_v44, %v5555_v47  ;;  %1400 = vmatprep.subr.mxu1 %v8049_v30  ;;  %8204 = vst [vmem:[#allocation85_spill] sm:$0xff] %v5638_v33  ;;  %v8208_v30 = vld [vmem:[#allocation73_spill] sm:$0xff]  ;;  %v5659_v44 = vand.u32 4294901760, %v51_v9  ;;  %v5673_v59 = vsub.f32 %v54_v63, %v5614_v29  ;;  %v43_v63 = vld [vmem:[%s7419_s0 + $0xb8] sm:$0xff] }
  0xdb   :  { %1269 = vmatpush2.msra.mxu0 %v8200_v60  ;;  %v46_v60 = vld [vmem:[%s7419_s0 + $0xd0] sm:$0xff]  ;;  %1402 = vmatpush2.msra.mxu1 %v8208_v30  ;;  %8210 = vst [vmem:[#allocation30_spill] sm:$0xff] %v5661_v31  ;;  %8220 = vst [vmem:[#allocation10_spill] sm:$0xff] %v5698_v14  ;;  %v8222_v30 = vld [vmem:[#allocation92_spill] sm:$0xff]  ;;  %v5703_v16 = vand.u32 4294901760, %v47_v36  ;;  %v5711_v6 = vsub.f32 %v50_v1, %v5661_v31  ;;  %v5731_v8 = vand.u32 4294901760, %v43_v63 }
  0xdc   :  { %8199 = vst [vmem:[#allocation81_spill] sm:$0xff] %v5623_v15  ;;  %1273 = vmatprep.subr.mxu0 %v8203_v35  ;;  %v8207_v35 = vand.u32 4294901760, %v8206_v57  ;;  %8209 = vst [vmem:[#allocation8_spill] sm:$0xff] %v5659_v44  ;;  %v8211_v57 = vand.u32 4294901760, %v5142_v43  ;;  %1287 = vmatprep.mubr.f32.mxu0 %v8216_v28  ;;  %v5682_v43 = vsub.f32 %v5574_v17, %v8217_v53  ;;  %v5689_v24 = vand.u32 4294901760, %v46_v60  ;;  %v8221_v53 = vld [vmem:[#allocation77_spill] sm:$0xff] }
  0xdd   :  { %8213 = vst [vmem:[#allocation9_spill] sm:$0xff] %v5673_v59  ;;  %8223 = vst [vmem:[#allocation34_spill] sm:$0xff] %v5703_v16  ;;  %v5722_v17 = vsub.f32 %v51_v9, %v5659_v44  ;;  %1424 = vmatprep.mubr.f32.mxu1 %v8216_v28 }
  0xde   :  { %1277 = vmatpush2.msra.mxu0 %v8207_v35  ;;  %v8212_v35 = vld [vmem:[#allocation75_spill] sm:$0xff]  ;;  %8219 = vst [vmem:[#allocation32_spill] sm:$0xff] %v5689_v24  ;;  %8224 = vst [vmem:[#allocation11_spill] sm:$0xff] %v5711_v6 }
  0xdf   :  { %1281 = vmatprep.subr.mxu0 %v8211_v57  ;;  %1404 = vmatprep.subr.mxu1 %v8212_v35  ;;  %v8218_v57 = vand.u32 4294901760, %v5563_v4  ;;  %8226 = vst [vmem:[#allocation36_spill] sm:$0xff] %v5722_v17  ;;  %8228 = vst [vmem:[#allocation12_spill] sm:$0xff] %v5731_v8 }
  0xe0   :  { %1285 = vmatpush2.msra.mxu0 %v8215_v37  ;;  %v42_v37 = vld [vmem:[%s7419_s0 + $0xb0] sm:$0xff]  ;;  %1406 = vmatpush2.msra.mxu1 %v8221_v53  ;;  %v8225_v53 = vand.u32 4294901760, %v5598_v3 }
  0xe1   :  { %v5687_v35 = vsub.f32 %v5563_v4, %v8218_v57  ;;  %1289 = vmatmul.mubr.f32.vlgmr.msra.gmra.mxu0 %v8222_v30  ;;  %1408 = vmatprep.subr.mxu1 %v4938_v2  ;;  %v38_v57 = vld [vmem:[%s7419_s0 + $0x90] sm:$0xff]  ;;  %v8227_v2 = vand.u32 4294901760, %v5623_v15  ;;  %v39_v4 = vld [vmem:[%s7419_s0 + $0x98] sm:$0xff] }
  0xe2   :  { %1433 = vmatprep.subr.mxu0 %v5423_v40  ;;  %v5716_v5 = vsub.f32 %v5598_v3, %v8225_v53  ;;  %1410 = vmatpush2.msra.mxu1 %v4952_v62  ;;  %v5733_v53 = vand.u32 4294901760, %v42_v37  ;;  %v5759_v3 = vand.u32 4294901760, %v38_v57 }
  0xe3   :  { %1435 = vmatpush1.msra.mxu0 %v5425_v45  ;;  %v5729_v1 = vsub.f32 %v5623_v15, %v8227_v2  ;;  %1412 = vmatprep.subr.mxu1 %v8055_v52  ;;  %v5744_v2 = vsub.f32 %v46_v60, %v5689_v24  ;;  %v8231_v45 = vand.u32 4294901760, %v5649_v23  ;;  %v8232_v52 = vand.u32 4294901760, %v5638_v33  ;;  %v35_v60 = vld [vmem:[%s7419_s0 + $0x78] sm:$0xff] }
  0xe4   :  { %8229 = vst [vmem:[#allocation38_spill] sm:$0xff] %v5733_v53  ;;  %1437 = vmatprep.subr.mxu0 %v5436_v11  ;;  %1414 = vmatpush2.msra.mxu1 %v8057_v7  ;;  %8233 = vst [vmem:[#allocation40_spill] sm:$0xff] %v5759_v3  ;;  %v34_v7 = vld [vmem:[%s7419_s0 + $0x70] sm:$0xff]  ;;  %v5768_v15 = vsub.f32 %v47_v36, %v5703_v16  ;;  %v5781_v36 = vsub.f32 %v42_v37, %v5733_v53  ;;  %v8249_v11 = vand.u32 4294901760, %v5542_v32 }
  0xe5   :  { %8230 = vst [vmem:[#allocation13_spill] sm:$0xff] %v5744_v2  ;;  %1439 = vmatpush1.msra.mxu0 %v5447_v55  ;;  %v5752_v9 = vsub.f32 %v5649_v23, %v8231_v45  ;;  %v5757_v62 = vsub.f32 %v5638_v33, %v8232_v52  ;;  %1416 = vmatprep.subr.mxu1 %v8059_v38  ;;  %v5773_v52 = vand.u32 4294901760, %v39_v4  ;;  %v8237_v38 = vand.u32 4294901760, %v5673_v59  ;;  %v30_v45 = vld [vmem:[%s7419_s0 + $0x50] sm:$0xff]  ;;  %v31_v33 = vld [vmem:[%s7419_s0 + $0x58] sm:$0xff] }
  0xe6   :  { %8234 = vst [vmem:[#allocation14_spill] sm:$0xff] %v5768_v15  ;;  %1441 = vmatprep.subr.mxu0 %v5464_v61  ;;  %1418 = vmatpush2.msra.mxu1 %v5016_v58  ;;  %8236 = vst [vmem:[#allocation15_spill] sm:$0xff] %v5781_v36  ;;  %v5792_v23 = vsub.f32 %v43_v63, %v5731_v8  ;;  %v8239_v58 = vand.u32 4294901760, %v5698_v14  ;;  %v5801_v55 = vand.u32 4294901760, %v35_v60  ;;  %v8254_v32 = vand.u32 4294901760, %v5768_v15 }
  0xe7   :  { %8235 = vst [vmem:[#allocation42_spill] sm:$0xff] %v5773_v52  ;;  %1443 = vmatpush1.msra.mxu0 %v5466_v50  ;;  %v5786_v61 = vsub.f32 %v5673_v59, %v8237_v38  ;;  %1420 = vmatprep.subr.mxu1 %v5032_v39  ;;  %v5803_v38 = vand.u32 4294901760, %v34_v7  ;;  %v5829_v59 = vand.u32 4294901760, %v30_v45 }
  0xe8   :  { %8238 = vst [vmem:[#allocation44_spill] sm:$0xff] %v5792_v23  ;;  %1445 = vmatprep.subr.mxu0 %v5483_v25  ;;  %v5799_v37 = vsub.f32 %v5698_v14, %v8239_v58  ;;  %8240 = vst [vmem:[#allocation16_spill] sm:$0xff] %v5801_v55  ;;  %1422 = vmatpush2.msra.mxu1 %v5054_v49  ;;  %v5814_v58 = vsub.f32 %v38_v57, %v5759_v3  ;;  %v8243_v14 = vand.u32 4294901760, %v5722_v17  ;;  %v27_v57 = vld [vmem:[%s7419_s0 + $0x38] sm:$0xff]  ;;  %v26_v25 = vld [vmem:[%s7419_s0 + $0x30] sm:$0xff] }
  0xe9   :  { %8241 = vst [vmem:[#allocation46_spill] sm:$0xff] %v5803_v38  ;;  %1447 = vmatpush1.msra.mxu0 %v5494_v0  ;;  %1426 = vmatmul.mubr.f32.vlgmr.msra.gmra.mxu1 %v8222_v30  ;;  %v8244_v49 = vand.u32 4294901760, %v5711_v6  ;;  %8245 = vst [vmem:[#allocation48_spill] sm:$0xff] %v5829_v59  ;;  %v5838_v0 = vsub.f32 %v39_v4, %v5773_v52  ;;  %v5864_v50 = vsub.f32 %v35_v60, %v5801_v55 }
  0xea   :  { %8242 = vst [vmem:[#allocation17_spill] sm:$0xff] %v5814_v58  ;;  %v5822_v63 = vsub.f32 %v5722_v17, %v8243_v14  ;;  %1449 = vmatprep.subr.mxu0 %v5513_v22  ;;  %v8247_v14 = vand.u32 4294901760, %v5537_v46  ;;  %v5853_v22 = vsub.f32 %v34_v7, %v5803_v38  ;;  %v8251_v46 = vand.u32 4294901760, %v5744_v2  ;;  %v23_v17 = vld [vmem:[%s7419_s0 + $0x18] sm:$0xff]  ;;  %1962 = vmatprep.mubr.f32.mxu1 %v8216_v28  ;;  %v8404_v28 = vld [vmem:[#allocation45_spill] sm:$0xff] }
  0xeb   :  { %v5827_v39 = vsub.f32 %v5711_v6, %v8244_v49  ;;  %8246 = vst [vmem:[#allocation18_spill] sm:$0xff] %v5838_v0  ;;  %v5844_v6 = vand.u32 4294901760, %v31_v33  ;;  %1451 = vmatpush1.msra.mxu0 %v5515_v34  ;;  %v22_v49 = vld [vmem:[%s7419_s0 + $0x10] sm:$0xff]  ;;  %8252 = vst [vmem:[#allocation52_spill] sm:$0xff] %v5864_v50  ;;  %v5872_v7 = vsub.f32 %v5768_v15, %v8254_v32  ;;  %v5874_v4 = vand.u32 4294901760, %v27_v57 }
  0xec   :  { %1582 = vmatprep.subr.mxu1 %v8247_v14  ;;  %8250 = vst [vmem:[#allocation19_spill] sm:$0xff] %v5853_v22  ;;  %v5858_v14 = vsub.f32 %v5744_v2, %v8251_v46  ;;  %1453 = vmatprep.subr.mxu0 %v5555_v47  ;;  %v5876_v46 = vand.u32 4294901760, %v26_v25  ;;  %v5888_v2 = vsub.f32 %v30_v45, %v5829_v59  ;;  %v8259_v15 = vand.u32 4294901760, %v5607_v54  ;;  %v147_v45 = vld [vmem:[%s7419_s0 + $0x3f8] sm:$0xff]  ;;  %v146_v54 = vld [vmem:[%s7419_s0 + $0x3f0] sm:$0xff] }
  0xed   :  { %8248 = vst [vmem:[#allocation50_spill] sm:$0xff] %v5844_v6  ;;  %1588 = vmatpush1.msra.mxu1 %v8249_v11  ;;  %v8253_v11 = vand.u32 4294901760, %v5568_v10  ;;  %8255 = vst [vmem:[#allocation20_spill] sm:$0xff] %v5874_v4  ;;  %1455 = vmatpush1.msra.mxu0 %v5544_v48  ;;  %v8257_v10 = vand.u32 4294901760, %v5582_v13  ;;  %v8260_v60 = vand.u32 4294901760, %v5792_v23  ;;  %v8261_v13 = vand.u32 4294901760, %v5781_v36 }
  0xee   :  { %8256 = vst [vmem:[#allocation54_spill] sm:$0xff] %v5876_v46  ;;  %8258 = vst [vmem:[#allocation21_spill] sm:$0xff] %v5888_v2  ;;  %1457 = vmatprep.subr.mxu0 %v5584_v51  ;;  %v5904_v32 = vand.u32 4294901760, %v22_v49  ;;  %v8266_v51 = vand.u32 4294901760, %v5643_v12  ;;  %v8271_v12 = vand.u32 4294901760, %v5838_v0  ;;  %v5954_v47 = vand.u32 4294901760, %v146_v54 }
  0xef   :  { %1594 = vmatprep.subr.mxu1 %v8253_v11  ;;  %v5897_v48 = vsub.f32 %v5792_v23, %v8260_v60  ;;  %1459 = vmatpush1.msra.mxu0 %v5586_v19  ;;  %v8264_v60 = vand.u32 4294901760, %v5612_v27  ;;  %v5919_v11 = vand.u32 4294901760, %v23_v17  ;;  %v5928_v19 = vsub.f32 %v26_v25, %v5876_v46 }
  0xf0   :  { %1600 = vmatpush1.msra.mxu1 %v8257_v10  ;;  %v5902_v10 = vsub.f32 %v5781_v36, %v8261_v13  ;;  %8262 = vst [vmem:[#allocation56_spill] sm:$0xff] %v5904_v32  ;;  %1461 = vmatprep.subr.mxu0 %v5629_v56  ;;  %v8268_v27 = vand.u32 4294901760, %v5814_v58  ;;  %v143_v13 = vld [vmem:[%s7419_s0 + $0x3d8] sm:$0xff]  ;;  %v142_v36 = vld [vmem:[%s7419_s0 + $0x3d0] sm:$0xff]  ;;  %v8270_v25 = vand.u32 4294901760, %v5657_v26  ;;  %8273 = vst [vmem:[#allocation62_spill] sm:$0xff] %v5954_v47 }
  0xf1   :  { %1606 = vmatprep.subr.mxu1 %v8259_v15  ;;  %v5913_v15 = vsub.f32 %v31_v33, %v5844_v6  ;;  %8265 = vst [vmem:[#allocation58_spill] sm:$0xff] %v5919_v11  ;;  %8267 = vst [vmem:[#allocation25_spill] sm:$0xff] %v5928_v19  ;;  %1463 = vmatpush1.msra.mxu0 %v5614_v29  ;;  %v5952_v33 = vand.u32 4294901760, %v147_v45  ;;  %v8276_v56 = vand.u32 4294901760, %v5687_v35  ;;  %v5979_v26 = vand.u32 4294901760, %v143_v13  ;;  %v139_v29 = vld [vmem:[%s7419_s0 + $0x3b8] sm:$0xff] }
  0xf2   :  { %1612 = vmatpush1.msra.mxu1 %v8264_v60  ;;  %v5933_v60 = vsub.f32 %v5814_v58, %v8268_v27  ;;  %v5950_v27 = vsub.f32 %v5838_v0, %v8271_v12  ;;  %1465 = vmatprep.subr.mxu0 %v5659_v44  ;;  %v8277_v58 = vand.u32 4294901760, %v5864_v50  ;;  %v8281_v35 = vand.u32 4294901760, %v5729_v1 }
  0xf3   :  { %8263 = vst [vmem:[#allocation23_spill] sm:$0xff] %v5913_v15  ;;  %1618 = vmatprep.subr.mxu1 %v8266_v51  ;;  %v5942_v51 = vsub.f32 %v27_v57, %v5874_v4  ;;  %8272 = vst [vmem:[#allocation27_spill] sm:$0xff] %v5952_v33  ;;  %v8274_v57 = vand.u32 4294901760, %v5682_v43  ;;  %1467 = vmatpush1.msra.mxu0 %v5661_v31  ;;  %v8278_v43 = vand.u32 4294901760, %v5853_v22  ;;  %v6027_v1 = vand.u32 4294901760, %v139_v29 }
  0xf4   :  { %1624 = vmatpush1.msra.mxu1 %v8270_v25  ;;  %v5963_v25 = vsub.f32 %v22_v49, %v5904_v32  ;;  %v5972_v44 = vsub.f32 %v5864_v50, %v8277_v58  ;;  %8279 = vst [vmem:[#allocation64_spill] sm:$0xff] %v5979_v26  ;;  %v5981_v49 = vand.u32 4294901760, %v142_v36  ;;  %1469 = vmatprep.subr.mxu0 %v5703_v16  ;;  %v8283_v16 = vand.u32 4294901760, %v5716_v5 }
  0xf5   :  { %8269 = vst [vmem:[#allocation60_spill] sm:$0xff] %v5942_v51  ;;  %1630 = vmatprep.subr.mxu1 %v8274_v57  ;;  %v5977_v57 = vsub.f32 %v5853_v22, %v8278_v43  ;;  %v5996_v31 = vsub.f32 %v23_v17, %v5919_v11  ;;  %v134_v22 = vld [vmem:[%s7419_s0 + $0x390] sm:$0xff]  ;;  %1471 = vmatpush1.msra.mxu0 %v5689_v24  ;;  %v8285_v58 = vand.u32 4294901760, %v5888_v2  ;;  %v135_v17 = vld [vmem:[%s7419_s0 + $0x398] sm:$0xff]  ;;  %v8287_v5 = vand.u32 4294901760, %v5752_v9 }
  0xf6   :  { %8275 = vst [vmem:[#allocation29_spill] sm:$0xff] %v5963_v25  ;;  %1636 = vmatpush1.msra.mxu1 %v8276_v56  ;;  %8280 = vst [vmem:[#allocation31_spill] sm:$0xff] %v5981_v49  ;;  %v138_v56 = vld [vmem:[%s7419_s0 + $0x3b0] sm:$0xff]  ;;  %v6017_v43 = vsub.f32 %v147_v45, %v5952_v33  ;;  %1473 = vmatprep.subr.mxu0 %v5731_v8  ;;  %v8291_v45 = vand.u32 4294901760, %v5757_v62  ;;  %v8295_v24 = vand.u32 4294901760, %v5942_v51  ;;  %v8296_v62 = vand.u32 4294901760, %v5928_v19 }
  0xf7   :  { %1642 = vmatprep.subr.mxu1 %v8281_v35  ;;  %8282 = vst [vmem:[#allocation66_spill] sm:$0xff] %v5996_v31  ;;  %v6006_v35 = vsub.f32 %v146_v54, %v5954_v47  ;;  %v6011_v12 = vsub.f32 %v5888_v2, %v8285_v58  ;;  %8289 = vst [vmem:[#allocation35_spill] sm:$0xff] %v6027_v1  ;;  %v6029_v58 = vand.u32 4294901760, %v138_v56  ;;  %1475 = vmatpush1.msra.mxu0 %v5733_v53  ;;  %v131_v8 = vld [vmem:[%s7419_s0 + $0x378] sm:$0xff] }
  0xf8   :  { %1648 = vmatpush1.msra.mxu1 %v8283_v16  ;;  %8286 = vst [vmem:[#allocation68_spill] sm:$0xff] %v6017_v43  ;;  %v8288_v16 = vand.u32 4294901760, %v5913_v15  ;;  %1477 = vmatprep.subr.mxu0 %v5773_v52  ;;  %v8294_v2 = vand.u32 4294901760, %v5799_v37  ;;  %v6048_v53 = vsub.f32 %v5942_v51, %v8295_v24  ;;  %v6055_v9 = vand.u32 4294901760, %v135_v17 }
  0xf9   :  { %8284 = vst [vmem:[#allocation33_spill] sm:$0xff] %v6006_v35  ;;  %1654 = vmatprep.subr.mxu1 %v8287_v5  ;;  %8290 = vst [vmem:[#allocation70_spill] sm:$0xff] %v6029_v58  ;;  %v6038_v5 = vsub.f32 %v142_v36, %v5981_v49  ;;  %1479 = vmatpush1.msra.mxu0 %v5759_v3  ;;  %v8298_v24 = vand.u32 4294901760, %v5786_v61  ;;  %v6071_v36 = vsub.f32 %v143_v13, %v5979_v26  ;;  %v127_v13 = vld [vmem:[%s7419_s0 + $0x358] sm:$0xff] }
  0xfa   :  { %v6025_v54 = vsub.f32 %v5913_v15, %v8288_v16  ;;  %1660 = vmatpush1.msra.mxu1 %v8291_v45  ;;  %v6040_v16 = vand.u32 4294901760, %v134_v22  ;;  %v6053_v45 = vsub.f32 %v5928_v19, %v8296_v62  ;;  %8297 = vst [vmem:[#allocation39_spill] sm:$0xff] %v6055_v9  ;;  %v126_v19 = vld [vmem:[%s7419_s0 + $0x350] sm:$0xff]  ;;  %1481 = vmatprep.subr.mxu0 %v5801_v55  ;;  %v8300_v3 = vand.u32 4294901760, %v5822_v63 }
  0xfb   :  { %8292 = vst [vmem:[#allocation37_spill] sm:$0xff] %v6038_v5  ;;  %1666 = vmatprep.subr.mxu1 %v8294_v2  ;;  %v130_v2 = vld [vmem:[%s7419_s0 + $0x370] sm:$0xff]  ;;  %8299 = vst [vmem:[#allocation74_spill] sm:$0xff] %v6071_v36  ;;  %v8302_v37 = vand.u32 4294901760, %v5963_v25  ;;  %v6092_v62 = vsub.f32 %v139_v29, %v6027_v1  ;;  %1483 = vmatpush1.msra.mxu0 %v5803_v38  ;;  %v8308_v55 = vand.u32 4294901760, %v5872_v7  ;;  %v8311_v7 = vand.u32 4294901760, %v5858_v14 }
  0xfc   :  { %8293 = vst [vmem:[#allocation72_spill] sm:$0xff] %v6040_v16  ;;  %1672 = vmatpush1.msra.mxu1 %v8298_v24  ;;  %v6081_v24 = vsub.f32 %v138_v56, %v6029_v58  ;;  %v6098_v63 = vsub.f32 %v134_v22, %v6040_v16  ;;  %v6100_v56 = vand.u32 4294901760, %v131_v8  ;;  %v6102_v61 = vand.u32 4294901760, %v130_v2  ;;  %1485 = vmatprep.subr.mxu0 %v5844_v6 }
  0xfd   :  { %1678 = vmatprep.subr.mxu1 %v8300_v3  ;;  %v6086_v52 = vsub.f32 %v5963_v25, %v8302_v37  ;;  %8303 = vst [vmem:[#allocation76_spill] sm:$0xff] %v6092_v62  ;;  %v8304_v3 = vand.u32 4294901760, %v5827_v39  ;;  %v8309_v39 = vand.u32 4294901760, %v5996_v31  ;;  %v122_v37 = vld [vmem:[%s7419_s0 + $0x330] sm:$0xff]  ;;  %1487 = vmatpush1.msra.mxu0 %v5829_v59  ;;  %v8313_v29 = vand.u32 4294901760, %v6006_v35  ;;  %v123_v59 = vld [vmem:[%s7419_s0 + $0x338] sm:$0xff] }
  0xfe   :  { %8301 = vst [vmem:[#allocation41_spill] sm:$0xff] %v6081_v24  ;;  %8305 = vst [vmem:[#allocation43_spill] sm:$0xff] %v6098_v63  ;;  %v6133_v6 = vand.u32 4294901760, %v127_v13  ;;  %1489 = vmatprep.subr.mxu0 %v5874_v4  ;;  %v8315_v14 = vand.u32 4294901760, %v5897_v48  ;;  %v118_v25 = vld [vmem:[%s7419_s0 + $0x310] sm:$0xff]  ;;  %v8317_v4 = vand.u32 4294901760, %v5902_v10  ;;  %v6155_v48 = vsub.f32 %v130_v2, %v6102_v61 }
  0xff   :  { %1684 = vmatpush1.msra.mxu1 %v8304_v3  ;;  %8306 = vst [vmem:[#allocation78_spill] sm:$0xff] %v6100_v56  ;;  %8307 = vst [vmem:[#allocation79_spill] sm:$0xff] %v6102_v61  ;;  %v6113_v22 = vsub.f32 %v5996_v31, %v8309_v39  ;;  %v6115_v3 = vand.u32 4294901760, %v126_v19  ;;  %v6131_v39 = vsub.f32 %v6006_v35, %v8313_v29  ;;  %1491 = vmatpush1.msra.mxu0 %v5876_v46 }
 0x100   :  { %1690 = vmatprep.subr.mxu1 %v8308_v55  ;;  %v8312_v55 = vand.u32 4294901760, %v6017_v43  ;;  %8314 = vst [vmem:[#allocation82_spill] sm:$0xff] %v6133_v6  ;;  %v6146_v35 = vsub.f32 %v135_v17, %v6055_v9  ;;  %8318 = vst [vmem:[#allocation86_spill] sm:$0xff] %v6155_v48  ;;  %v6162_v29 = vand.u32 4294901760, %v122_v37  ;;  %v119_v17 = vld [vmem:[%s7419_s0 + $0x318] sm:$0xff]  ;;  %1493 = vmatprep.subr.mxu0 %v5919_v11  ;;  %v8330_v11 = vand.u32 4294901760, %v6081_v24 }
 0x101   :  { %8310 = vst [vmem:[#allocation80_spill] sm:$0xff] %v6115_v3  ;;  %1696 = vmatpush1.msra.mxu1 %v8311_v7  ;;  %v1761_v10 = vand.u32 4294901760, %v6113_v22  ;;  %v6175_v2 = vsub.f32 %v126_v19, %v6115_v3  ;;  %1495 = vmatpush1.msra.mxu0 %v5904_v32  ;;  %v6190_v19 = vand.u32 4294901760, %v118_v25  ;;  %v6208_v46 = vand.u32 4294901760, %v119_v17  ;;  %v110_v32 = vld [vmem:[%s7419_s0 + $0x2d0] sm:$0xff] }
 0x102   :  { %v6126_v38 = vsub.f32 %v6017_v43, %v8312_v55  ;;  %1702 = vmatprep.subr.mxu1 %v8315_v14  ;;  %8316 = vst [vmem:[#allocation84_spill] sm:$0xff] %v6146_v35  ;;  %v8319_v14 = vand.u32 4294901760, %v6038_v5  ;;  %8320 = vst [vmem:[#allocation87_spill] sm:$0xff] %v6162_v29  ;;  %v6168_v55 = vsub.f32 %v131_v8, %v6100_v56  ;;  %1497 = vmatprep.subr.mxu0 %v5952_v33  ;;  %v115_v33 = vld [vmem:[%s7419_s0 + $0x2f8] sm:$0xff] }
 0x103   :  { %1708 = vmatpush1.msra.mxu1 %v8317_v4  ;;  %v8322_v4 = vand.u32 4294901760, %v5950_v27  ;;  %8323 = vst [vmem:[#allocation89_spill] sm:$0xff] %v6175_v2  ;;  %v8326_v27 = vand.u32 4294901760, %v6071_v36  ;;  %8327 = vst [vmem:[#allocation94_spill] sm:$0xff] %v6190_v19  ;;  %1499 = vmatpush2.msra.mxu0 %v5954_v47  ;;  %v8335_v47 = vand.u32 4294901760, %v6025_v54 }
 0x104   :  { %v6160_v7 = vsub.f32 %v6038_v5, %v8319_v14  ;;  %8321 = vst [vmem:[#allocation88_spill] sm:$0xff] %v6168_v55  ;;  %v6177_v14 = vand.u32 4294901760, %v123_v59  ;;  %v8325_v5 = vand.u32 4294901760, %v5933_v60  ;;  %v1773_v8 = vand.u32 4294901760, %v6126_v38  ;;  %8331 = vst [vmem:[#allocation96_spill] sm:$0xff] %v6208_v46  ;;  %1501 = vmatprep.subr.mxu0 %v5979_v26 }
 0x105   :  { %1714 = vmatprep.subr.mxu1 %v8322_v4  ;;  %v6188_v22 = vsub.f32 %v6071_v36, %v8326_v27  ;;  %v114_v4 = vld [vmem:[%s7419_s0 + $0x2f0] sm:$0xff]  ;;  %v8328_v60 = vand.u32 4294901760, %v5972_v44  ;;  %v8329_v38 = vand.u32 4294901760, %v6092_v62  ;;  %v6206_v27 = vsub.f32 %v6081_v24, %v8330_v11  ;;  %1503 = vmatpush2.msra.mxu0 %v5981_v49 }
 0x106   :  { %8324 = vst [vmem:[#allocation91_spill] sm:$0xff] %v6177_v14  ;;  %1720 = vmatpush1.msra.mxu1 %v8325_v5  ;;  %v8332_v44 = vand.u32 4294901760, %v5977_v57  ;;  %v6223_v24 = vsub.f32 %v127_v13, %v6133_v6  ;;  %v8336_v57 = vand.u32 4294901760, %v6098_v63  ;;  %v111_v13 = vld [vmem:[%s7419_s0 + $0x2d8] sm:$0xff]  ;;  %v6243_v11 = vsub.f32 %v123_v59, %v6177_v14  ;;  %1505 = vmatprep.subr.mxu0 %v6027_v1 }
 0x107   :  { %1726 = vmatprep.subr.mxu1 %v8328_v60  ;;  %v6201_v5 = vsub.f32 %v6092_v62, %v8329_v38  ;;  %v6219_v38 = vsub.f32 %v122_v37, %v6162_v29  ;;  %v6236_v37 = vand.u32 4294901760, %v114_v4  ;;  %v1785_v54 = vand.u32 4294901760, %v6188_v22  ;;  %1507 = vmatpush2.msra.mxu0 %v6029_v58  ;;  %v107_v60 = vld [vmem:[%s7419_s0 + $0x2b8] sm:$0xff] }
 0x108   :  { %1732 = vmatpush1.msra.mxu1 %v8332_v44  ;;  %8334 = vst [vmem:[#allocation100_spill] sm:$0xff] %v6223_v24  ;;  %v6234_v44 = vsub.f32 %v6098_v63, %v8336_v57  ;;  %8338 = vst [vmem:[#allocation75_spill] sm:$0xff] %v6243_v11  ;;  %v6250_v57 = vsub.f32 %v118_v25, %v6190_v19  ;;  %v6252_v26 = vand.u32 4294901760, %v115_v33  ;;  %v8342_v63 = vand.u32 4294901760, %v6048_v53 }
 0x109   :  { %8333 = vst [vmem:[#allocation99_spill] sm:$0xff] %v6219_v38  ;;  %1738 = vmatprep.subr.mxu1 %v8335_v47  ;;  %8337 = vst [vmem:[#allocation73_spill] sm:$0xff] %v6236_v37  ;;  %v8339_v47 = vand.u32 4294901760, %v6011_v12  ;;  %v1797_v59 = vand.u32 4294901760, %v6201_v5  ;;  %v1803_v49 = vand.u32 4294901760, %v6206_v27  ;;  %v8343_v12 = vand.u32 4294901760, %v6146_v35  ;;  %1509 = vmatprep.subr.mxu0 %v6055_v9 }
 0x10a   :  { %8340 = vst [vmem:[#allocation103_spill] sm:$0xff] %v6250_v57  ;;  %8341 = vst [vmem:[#allocation77_spill] sm:$0xff] %v6252_v26  ;;  %v6265_v25 = vand.u32 4294901760, %v110_v32  ;;  %v8345_v53 = vand.u32 4294901760, %v6053_v45  ;;  %v6278_v27 = vand.u32 4294901760, %v111_v13  ;;  %v6285_v1 = vsub.f32 %v119_v17, %v6208_v46  ;;  %v102_v17 = vld [vmem:[%s7419_s0 + $0x290] sm:$0xff]  ;;  %1511 = vmatpush2.msra.mxu0 %v6040_v16 }
 0x10b   :  { %1744 = vmatpush1.msra.mxu1 %v8339_v47  ;;  %v6263_v22 = vsub.f32 %v6146_v35, %v8343_v12  ;;  %v106_v47 = vld [vmem:[%s7419_s0 + $0x2b0] sm:$0xff]  ;;  %v1815_v45 = vand.u32 4294901760, %v6234_v44  ;;  %v8352_v44 = vand.u32 4294901760, %v6175_v2  ;;  %v103_v12 = vld [vmem:[%s7419_s0 + $0x298] sm:$0xff]  ;;  %1513 = vmatprep.subr.mxu0 %v6100_v56  ;;  %v6324_v16 = vsub.f32 %v115_v33, %v6252_v26 }
 0x10c   :  { %1750 = vmatprep.subr.mxu1 %v8342_v63  ;;  %8344 = vst [vmem:[#allocation104_spill] sm:$0xff] %v6265_v25  ;;  %v8346_v63 = vand.u32 4294901760, %v6168_v55  ;;  %8347 = vst [vmem:[#allocation105_spill] sm:$0xff] %v6278_v27  ;;  %v6309_v9 = vand.u32 4294901760, %v106_v47  ;;  %1515 = vmatpush2.msra.mxu0 %v6102_v61  ;;  %v8358_v56 = vand.u32 4294901760, %v6223_v24  ;;  %v99_v33 = vld [vmem:[%s7419_s0 + $0x278] sm:$0xff] }
 0x10d   :  { %1756 = vmatpush1.msra.mxu1 %v8345_v53  ;;  %8348 = vst [vmem:[#allocation106_spill] sm:$0xff] %v6285_v1  ;;  %v6290_v53 = vsub.f32 %v114_v4, %v6236_v37  ;;  %v6307_v4 = vsub.f32 %v6175_v2, %v8352_v44  ;;  %v6321_v44 = vand.u32 4294901760, %v107_v60  ;;  %8356 = vst [vmem:[#allocation111_spill] sm:$0xff] %v6324_v16  ;;  %v98_v61 = vld [vmem:[%s7419_s0 + $0x270] sm:$0xff]  ;;  %1517 = vmatprep.subr.mxu0 %v6133_v6 }
 0x10e   :  { %v6276_v5 = vsub.f32 %v6168_v55, %v8346_v63  ;;  %1762 = vmatprep.subr.mxu1 %v1761_v10  ;;  %v8350_v63 = vand.u32 4294901760, %v6155_v48  ;;  %v8351_v10 = vand.u32 4294901760, %v6086_v52  ;;  %8353 = vst [vmem:[#allocation108_spill] sm:$0xff] %v6309_v9  ;;  %v1809_v52 = vand.u32 4294901760, %v6263_v22  ;;  %1519 = vmatpush2.msra.mxu0 %v6115_v3 }
 0x10f   :  { %8349 = vst [vmem:[#allocation107_spill] sm:$0xff] %v6290_v53  ;;  %8355 = vst [vmem:[#allocation110_spill] sm:$0xff] %v6321_v44  ;;  %v6352_v22 = vsub.f32 %v111_v13, %v6278_v27  ;;  %v8361_v2 = vand.u32 4294901760, %v6160_v7  ;;  %v1839_v6 = vand.u32 4294901760, %v6307_v4  ;;  %v94_v7 = vld [vmem:[%s7419_s0 + $0x250] sm:$0xff]  ;;  %1521 = vmatprep.subr.mxu0 %v6177_v14  ;;  %v6378_v4 = vand.u32 4294901760, %v98_v61 }
 0x110   :  { %v6295_v58 = vsub.f32 %v6155_v48, %v8350_v63  ;;  %1768 = vmatpush1.msra.mxu1 %v8351_v10  ;;  %v6319_v10 = vsub.f32 %v110_v32, %v6265_v25  ;;  %v8357_v63 = vand.u32 4294901760, %v6131_v39  ;;  %v1821_v48 = vand.u32 4294901760, %v6276_v5  ;;  %1523 = vmatpush2.msra.mxu0 %v6162_v29 }
 0x111   :  { %1774 = vmatprep.subr.mxu1 %v1773_v8  ;;  %v1832_v8 = vsub.f32 %v6223_v24, %v8358_v56  ;;  %v6334_v32 = vand.u32 4294901760, %v102_v17  ;;  %v8359_v5 = vand.u32 4294901760, %v6243_v11  ;;  %8360 = vst [vmem:[#allocation112_spill] sm:$0xff] %v6352_v22  ;;  %v8366_v14 = vand.u32 4294901760, %v6285_v1  ;;  %1525 = vmatprep.subr.mxu0 %v6208_v46 }
 0x112   :  { %8354 = vst [vmem:[#allocation109_spill] sm:$0xff] %v6319_v10  ;;  %1780 = vmatpush2.msra.mxu1 %v8357_v63  ;;  %v1827_v39 = vand.u32 4294901760, %v6295_v58  ;;  %v6349_v63 = vand.u32 4294901760, %v103_v12  ;;  %v8363_v58 = vand.u32 4294901760, %v6219_v38  ;;  %v6397_v24 = vand.u32 4294901760, %v94_v7  ;;  %1527 = vmatpush2.msra.mxu0 %v6190_v19 }
 0x113   :  { %1786 = vmatprep.subr.mxu1 %v1785_v54  ;;  %v6347_v56 = vsub.f32 %v6243_v11, %v8359_v5  ;;  %v6359_v54 = vsub.f32 %v106_v47, %v6309_v9  ;;  %v8364_v11 = vand.u32 4294901760, %v6250_v57  ;;  %v1833_v3 = vand.u32 4294901760, %v1832_v8  ;;  %1529 = vmatprep.subr.mxu0 %v6252_v26 }
 0x114   :  { %1792 = vmatpush2.msra.mxu1 %v8361_v2  ;;  %v6364_v5 = vsub.f32 %v6219_v38, %v8363_v58  ;;  %v6375_v2 = vand.u32 4294901760, %v99_v33  ;;  %v95_v58 = vld [vmem:[%s7419_s0 + $0x258] sm:$0xff]  ;;  %1531 = vmatpush2.msra.mxu0 %v6236_v37  ;;  %v8370_v26 = vand.u32 4294901760, %v6290_v53 }
 0x115   :  { %8362 = vst [vmem:[#allocation113_spill] sm:$0xff] %v6359_v54  ;;  %v6369_v13 = vsub.f32 %v6250_v57, %v8364_v11  ;;  %1798 = vmatprep.subr.mxu1 %v1797_v59  ;;  %v6384_v11 = vsub.f32 %v107_v60, %v6321_v44  ;;  %v1856_v59 = vsub.f32 %v6285_v1, %v8366_v14  ;;  %v1845_v38 = vand.u32 4294901760, %v6347_v56  ;;  %v90_v60 = vld [vmem:[%s7419_s0 + $0x230] sm:$0xff] }
 0x116   :  { %1804 = vmatpush2.msra.mxu1 %v1803_v49  ;;  %v6391_v57 = vsub.f32 %v102_v17, %v6334_v32  ;;  %v91_v49 = vld [vmem:[%s7419_s0 + $0x238] sm:$0xff]  ;;  %v6403_v14 = vsub.f32 %v103_v12, %v6349_v63  ;;  %v1851_v17 = vand.u32 4294901760, %v6364_v5  ;;  %v6408_v8 = vand.u32 4294901760, %v95_v58  ;;  %v86_v5 = vld [vmem:[%s7419_s0 + $0x210] sm:$0xff]  ;;  %1533 = vmatprep.subr.mxu0 %v6278_v27 }
 0x117   :  { %8365 = vst [vmem:[#allocation114_spill] sm:$0xff] %v6384_v11  ;;  %1810 = vmatprep.subr.mxu1 %v1809_v52  ;;  %v1863_v52 = vand.u32 4294901760, %v6369_v13  ;;  %v8369_v12 = vand.u32 4294901760, %v6324_v16  ;;  %v87_v13 = vld [vmem:[%s7419_s0 + $0x218] sm:$0xff]  ;;  %v6426_v56 = vsub.f32 %v99_v33, %v6375_v2  ;;  %v6432_v19 = vand.u32 4294901760, %v91_v49  ;;  %1535 = vmatpush2.msra.mxu0 %v6265_v25 }
 0x118   :  { %8367 = vst [vmem:[#allocation115_spill] sm:$0xff] %v6391_v57  ;;  %8368 = vst [vmem:[#allocation116_spill] sm:$0xff] %v6403_v14  ;;  %1816 = vmatpush2.msra.mxu1 %v1815_v45  ;;  %v6419_v45 = vsub.f32 %v98_v61, %v6378_v4  ;;  %v8371_v33 = vand.u32 4294901760, %v6352_v22  ;;  %v6445_v37 = vand.u32 4294901760, %v90_v60  ;;  %v8373_v61 = vand.u32 4294901760, %v6319_v10  ;;  %1537 = vmatprep.subr.mxu0 %v6321_v44 }
 0x119   :  { %1822 = vmatprep.subr.mxu1 %v1821_v48  ;;  %v1868_v47 = vsub.f32 %v6324_v16, %v8369_v12  ;;  %v1857_v48 = vand.u32 4294901760, %v1856_v59  ;;  %v1874_v12 = vsub.f32 %v6290_v53, %v8370_v26  ;;  %v6443_v59 = vsub.f32 %v94_v7, %v6397_v24  ;;  %1539 = vmatpush2.msra.mxu0 %v6309_v9 }
 0x11a   :  { %1828 = vmatpush2.msra.mxu1 %v1827_v39  ;;  %v1880_v39 = vsub.f32 %v6352_v22, %v8371_v33  ;;  %v1886_v46 = vsub.f32 %v6319_v10, %v8373_v61  ;;  %v6452_v27 = vand.u32 4294901760, %v87_v13  ;;  %v6456_v33 = vsub.f32 %v95_v58, %v6408_v8  ;;  %1541 = vmatprep.subr.mxu0 %v6349_v63 }
 0x11b   :  { %1834 = vmatprep.subr.mxu1 %v1833_v3  ;;  %8372 = vst [vmem:[#allocation117_spill] sm:$0xff] %v6443_v59  ;;  %v1869_v7 = vand.u32 4294901760, %v1868_v47  ;;  %v8375_v26 = vand.u32 4294901760, %v6384_v11  ;;  %v1875_v61 = vand.u32 4294901760, %v1874_v12  ;;  %v8376_v3 = vand.u32 4294901760, %v6359_v54  ;;  %1543 = vmatpush2.msra.mxu0 %v6334_v32 }
 0x11c   :  { %1840 = vmatpush2.msra.mxu1 %v1839_v6  ;;  %8374 = vst [vmem:[#allocation118_spill] sm:$0xff] %v6456_v33  ;;  %v6462_v6 = vand.u32 4294901760, %v86_v5  ;;  %v6470_v44 = vsub.f32 %v91_v49, %v6432_v19  ;;  %v6474_v47 = vsub.f32 %v90_v60, %v6445_v37  ;;  %v1887_v12 = vand.u32 4294901760, %v1886_v46  ;;  %1545 = vmatprep.subr.mxu0 %v6375_v2 }
 0x11d   :  { %1846 = vmatprep.subr.mxu1 %v1845_v38  ;;  %v1892_v25 = vsub.f32 %v6384_v11, %v8375_v26  ;;  %v1898_v58 = vsub.f32 %v6359_v54, %v8376_v3  ;;  %v1881_v38 = vand.u32 4294901760, %v1880_v39  ;;  %v8377_v26 = vand.u32 4294901760, %v6403_v14  ;;  %1547 = vmatpush2.msra.mxu0 %v6378_v4 }
 0x11e   :  { %1852 = vmatpush2.msra.mxu1 %v1851_v17  ;;  %v8378_v49 = vand.u32 4294901760, %v6391_v57  ;;  %v6486_v39 = vsub.f32 %v87_v13, %v6452_v27  ;;  %v8380_v17 = vand.u32 4294901760, %v6426_v56  ;;  %v7811_v13 = vand.u32 4294901760, %v6470_v44  ;;  %1549 = vmatprep.subr.mxu0 %v6408_v8 }
 0x11f   :  { %1858 = vmatprep.subr.mxu1 %v1857_v48  ;;  %v1904_v29 = vsub.f32 %v6403_v14, %v8377_v26  ;;  %v1893_v60 = vand.u32 4294901760, %v1892_v25  ;;  %v6490_v26 = vsub.f32 %v86_v5, %v6462_v6  ;;  %v8381_v25 = vand.u32 4294901760, %v6419_v45  ;;  %1551 = vmatpush2.msra.mxu0 %v6397_v24 }
 0x120   :  { %1864 = vmatpush2.msra.mxu1 %v1863_v52  ;;  %v1910_v3 = vsub.f32 %v6391_v57, %v8378_v49  ;;  %v1916_v46 = vsub.f32 %v6426_v56, %v8380_v17  ;;  %v1899_v49 = vand.u32 4294901760, %v1898_v58  ;;  %v8382_v52 = vand.u32 4294901760, %v6456_v33  ;;  %1553 = vmatprep.subr.mxu0 %v6432_v19 }
 0x121   :  { %1870 = vmatprep.subr.mxu1 %v1869_v7  ;;  %8379 = vst [vmem:[#allocation119_spill] sm:$0xff] %v6490_v26  ;;  %v1905_v7 = vand.u32 4294901760, %v1904_v29  ;;  %v1922_v5 = vsub.f32 %v6419_v45, %v8381_v25  ;;  %v7813_v58 = vand.u32 4294901760, %v6486_v39  ;;  %v7812_v48 = vand.u32 4294901760, %v6490_v26  ;;  %1555 = vmatpush2.msra.mxu0 %v6445_v37 }
 0x122   :  { %1876 = vmatpush2.msra.mxu1 %v1875_v61  ;;  %v1911_v17 = vand.u32 4294901760, %v1910_v3  ;;  %v1928_v61 = vsub.f32 %v6456_v33, %v8382_v52  ;;  %v1917_v29 = vand.u32 4294901760, %v1916_v46  ;;  %1557 = vmatprep.subr.mxu0 %v6452_v27 }
 0x123   :  { %1882 = vmatprep.subr.mxu1 %v1881_v38  ;;  %v8383_v38 = vand.u32 4294901760, %v6443_v59  ;;  %v1923_v3 = vand.u32 4294901760, %v1922_v5  ;;  %1559 = vmatpush2.msra.mxu0 %v6462_v6  ;;  %v8386_v5 = vld [vmem:[#allocation102_spill] sm:$0xff] }
 0x124   :  { %1888 = vmatpush2.msra.mxu1 %v1887_v12  ;;  %v1940_v12 = vsub.f32 %v6470_v44, %v7811_v13  ;;  %v1929_v52 = vand.u32 4294901760, %v1928_v61  ;;  %1972 = vmatprep.subr.mxu0 %v5459_v21 }
 0x125   :  { %1894 = vmatprep.subr.mxu1 %v1893_v60  ;;  %v1934_v25 = vsub.f32 %v6443_v59, %v8383_v38  ;;  %v8384_v60 = vand.u32 4294901760, %v6474_v47  ;;  %v8385_v38 = vld [vmem:[#allocation101_spill] sm:$0xff] }
 0x126   :  { %1900 = vmatpush2.msra.mxu1 %v1899_v49  ;;  %v1952_v49 = vsub.f32 %v6486_v39, %v7813_v58  ;;  %1565 = vmatprep.mubr.f32.mxu0 %v8385_v38  ;;  %v8394_v38 = vld [vmem:[#allocation5_spill] sm:$0xff]  ;;  %v8402_v58 = vld [vmem:[#allocation7_spill] sm:$0xff] }
 0x127   :  { %1906 = vmatprep.subr.mxu1 %v1905_v7  ;;  %v1946_v46 = vsub.f32 %v6474_v47, %v8384_v60  ;;  %v1935_v13 = vand.u32 4294901760, %v1934_v25  ;;  %v1958_v7 = vsub.f32 %v6490_v26, %v7812_v48  ;;  %1571 = vmatmul.mubr.f32.vlgmr.msra.gmra.mxu0 %v8386_v5  ;;  %v1941_v60 = vand.u32 4294901760, %v1940_v12  ;;  %v8387_v25 = vld [vmem:[#allocation47_spill] sm:$0xff]  ;;  %v8388_v12 = vld [vmem:[#allocation53_spill] sm:$0xff]  ;;  %v8396_v5 = vld [vmem:[#allocation24_spill] sm:$0xff] }
 0x128   :  { %1912 = vmatpush2.msra.mxu1 %v1911_v17  ;;  %1975 = vmatpush1.msra.mxu0 %v5453_v42  ;;  %v1953_v61 = vand.u32 4294901760, %v1952_v49  ;;  %v8393_v49 = vld [vmem:[#allocation81_spill] sm:$0xff]  ;;  %v8401_v48 = vld [vmem:[#allocation10_spill] sm:$0xff] }
 0x129   :  { %1918 = vmatprep.subr.mxu1 %v1917_v29  ;;  %v1947_v17 = vand.u32 4294901760, %v1946_v46  ;;  %1978 = vmatprep.subr.mxu0 %v5475_v41  ;;  %v1959_v29 = vand.u32 4294901760, %v1958_v7  ;;  %v8391_v46 = vld [vmem:[#allocation61_spill] sm:$0xff] }
 0x12a   :  { %1924 = vmatpush2.msra.mxu1 %v1923_v3  ;;  %1981 = vmatpush1.msra.mxu0 %v5481_v18  ;;  %v8389_v3 = vld [vmem:[#allocation55_spill] sm:$0xff]  ;;  %v8395_v7 = vld [vmem:[#allocation69_spill] sm:$0xff] }
 0x12b   :  { %1930 = vmatprep.subr.mxu1 %v1929_v52  ;;  %1984 = vmatprep.subr.mxu0 %v5508_v20  ;;  %v8392_v52 = vld [vmem:[#allocation22_spill] sm:$0xff] }
 0x12c   :  { %1936 = vmatpush2.msra.mxu1 %v1935_v13  ;;  %1987 = vmatpush1.msra.mxu0 %v8387_v25  ;;  %v8390_v13 = vld [vmem:[#allocation63_spill] sm:$0xff] }
 0x12d   :  { %1942 = vmatprep.subr.mxu1 %v1941_v60  ;;  %1990 = vmatprep.subr.mxu0 %v8388_v12  ;;  %v8397_v60 = vld [vmem:[#allocation28_spill] sm:$0xff] }
 0x12e   :  { %1948 = vmatpush2.msra.mxu1 %v1947_v17  ;;  %1993 = vmatpush1.msra.mxu0 %v8389_v3  ;;  %v8398_v17 = vld [vmem:[#allocation6_spill] sm:$0xff] }
 0x12f   :  { %1954 = vmatprep.subr.mxu1 %v1953_v61  ;;  %1996 = vmatprep.subr.mxu0 %v8390_v13  ;;  %v8399_v61 = vld [vmem:[#allocation85_spill] sm:$0xff] }
 0x130   :  { %1960 = vmatpush2.msra.mxu1 %v1959_v29  ;;  %1999 = vmatpush1.msra.mxu0 %v8391_v46  ;;  %v8400_v29 = vld [vmem:[#allocation26_spill] sm:$0xff] }
 0x131   :  { %1964 = vmatmul.mubr.f32.vlgmr.msra.gmra.mxu1 %v8222_v30  ;;  %2174 = vmatprep.subr.mxu1 %v5423_v40  ;;  %v8403_v30 = vld [vmem:[#allocation9_spill] sm:$0xff] }
 0x132   :  { %2176 = vmatpush1.msra.mxu1 %v8392_v52  ;;  %2002 = vmatprep.subr.mxu0 %v8393_v49 }
 0x133   :  { %2178 = vmatprep.subr.mxu1 %v8394_v38  ;;  %2005 = vmatpush1.msra.mxu0 %v8395_v7  ;;  %v8405_v38 = vld [vmem:[#allocation36_spill] sm:$0xff]  ;;  %v8406_v7 = vld [vmem:[#allocation49_spill] sm:$0xff] }
 0x134   :  { %2180 = vmatpush1.msra.mxu1 %v8396_v5  ;;  %2008 = vmatprep.subr.mxu0 %v8397_v60  ;;  %v8407_v5 = vld [vmem:[#allocation11_spill] sm:$0xff] }
 0x135   :  { %2182 = vmatprep.subr.mxu1 %v8398_v17  ;;  %2011 = vmatpush1.msra.mxu0 %v8399_v61  ;;  %v8408_v17 = vld [vmem:[#allocation14_spill] sm:$0xff]  ;;  %v8409_v61 = vld [vmem:[#allocation59_spill] sm:$0xff] }
 0x136   :  { %2184 = vmatpush1.msra.mxu1 %v8400_v29  ;;  %2014 = vmatprep.subr.mxu0 %v8401_v48  ;;  %v8410_v29 = vld [vmem:[#allocation13_spill] sm:$0xff] }
 0x137   :  { %2186 = vmatprep.subr.mxu1 %v8402_v58  ;;  %2017 = vmatpush1.msra.mxu0 %v8403_v30  ;;  %v8411_v48 = vld [vmem:[#allocation57_spill] sm:$0xff] }
 0x138   :  { %2188 = vmatpush1.msra.mxu1 %v8404_v28  ;;  %2020 = vmatprep.subr.mxu0 %v8405_v38  ;;  %v8412_v30 = vld [vmem:[#allocation65_spill] sm:$0xff]  ;;  %v8413_v28 = vld [vmem:[#allocation15_spill] sm:$0xff] }
 0x139   :  { %2190 = vmatprep.subr.mxu1 %v8406_v7  ;;  %2023 = vmatpush1.msra.mxu0 %v8407_v5  ;;  %v8414_v38 = vld [vmem:[#allocation67_spill] sm:$0xff] }
 0x13a   :  { %2192 = vmatpush1.msra.mxu1 %v5515_v34  ;;  %2026 = vmatprep.subr.mxu0 %v8408_v17  ;;  %v8415_v5 = vld [vmem:[#allocation83_spill] sm:$0xff]  ;;  %v8416_v34 = vld [vmem:[#allocation17_spill] sm:$0xff] }
 0x13b   :  { %2194 = vmatprep.subr.mxu1 %v8409_v61  ;;  %2029 = vmatpush1.msra.mxu0 %v8410_v29  ;;  %v8417_v17 = vld [vmem:[#allocation71_spill] sm:$0xff]  ;;  %v8418_v29 = vld [vmem:[#allocation8_spill] sm:$0xff] }
 0x13c   :  { %2196 = vmatpush1.msra.mxu1 %v8411_v48  ;;  %2032 = vmatprep.subr.mxu0 %v5792_v23  ;;  %v8419_v48 = vld [vmem:[#allocation19_spill] sm:$0xff]  ;;  %v8420_v23 = vld [vmem:[#allocation30_spill] sm:$0xff] }
 0x13d   :  { %2198 = vmatprep.subr.mxu1 %v8412_v30  ;;  %2035 = vmatpush1.msra.mxu0 %v8413_v28  ;;  %v8421_v28 = vld [vmem:[#allocation34_spill] sm:$0xff] }
 0x13e   :  { %2200 = vmatpush1.msra.mxu1 %v8414_v38  ;;  %2038 = vmatprep.subr.mxu0 %v5838_v0  ;;  %v8422_v38 = vld [vmem:[#allocation21_spill] sm:$0xff]  ;;  %v8423_v0 = vld [vmem:[#allocation32_spill] sm:$0xff] }
 0x13f   :  { %2202 = vmatprep.subr.mxu1 %v8415_v5  ;;  %2041 = vmatpush1.msra.mxu0 %v8416_v34  ;;  %v8424_v34 = vld [vmem:[#allocation12_spill] sm:$0xff] }
 0x140   :  { %2204 = vmatpush1.msra.mxu1 %v8417_v17  ;;  %2044 = vmatprep.subr.mxu0 %v5864_v50  ;;  %v8425_v17 = vld [vmem:[#allocation25_spill] sm:$0xff]  ;;  %v8426_v50 = vld [vmem:[#allocation38_spill] sm:$0xff] }
 0x141   :  { %2206 = vmatprep.subr.mxu1 %v8418_v29  ;;  %2047 = vmatpush1.msra.mxu0 %v8419_v48  ;;  %v8427_v48 = vld [vmem:[#allocation42_spill] sm:$0xff] }
 0x142   :  { %2208 = vmatpush1.msra.mxu1 %v8420_v23  ;;  %2050 = vmatprep.subr.mxu0 %v5913_v15  ;;  %v8428_v23 = vld [vmem:[#allocation29_spill] sm:$0xff]  ;;  %v8429_v15 = vld [vmem:[#allocation40_spill] sm:$0xff] }
 0x143   :  { %2210 = vmatprep.subr.mxu1 %v8421_v28  ;;  %2053 = vmatpush1.msra.mxu0 %v8422_v38  ;;  %v8430_v38 = vld [vmem:[#allocation16_spill] sm:$0xff] }
 0x144   :  { %2212 = vmatpush1.msra.mxu1 %v8423_v0  ;;  %2056 = vmatprep.subr.mxu0 %v5942_v51  ;;  %v8431_v0 = vld [vmem:[#allocation33_spill] sm:$0xff]  ;;  %v8432_v51 = vld [vmem:[#allocation46_spill] sm:$0xff] }
 0x145   :  { %2214 = vmatprep.subr.mxu1 %v8424_v34  ;;  %2059 = vmatpush1.msra.mxu0 %v8425_v17  ;;  %v8433_v17 = vld [vmem:[#allocation50_spill] sm:$0xff] }
 0x146   :  { %2216 = vmatpush1.msra.mxu1 %v8426_v50  ;;  %2062 = vmatprep.subr.mxu0 %v5996_v31  ;;  %v8434_v50 = vld [vmem:[#allocation37_spill] sm:$0xff]  ;;  %v8435_v31 = vld [vmem:[#allocation48_spill] sm:$0xff] }
 0x147   :  { %2218 = vmatprep.subr.mxu1 %v8427_v48  ;;  %2065 = vmatpush1.msra.mxu0 %v8428_v23  ;;  %v8436_v23 = vld [vmem:[#allocation20_spill] sm:$0xff] }
 0x148   :  { %2220 = vmatpush1.msra.mxu1 %v8429_v15  ;;  %2068 = vmatprep.subr.mxu0 %v6017_v43  ;;  %v8437_v15 = vld [vmem:[#allocation41_spill] sm:$0xff]  ;;  %v8438_v43 = vld [vmem:[#allocation54_spill] sm:$0xff] }
 0x149   :  { %2222 = vmatprep.subr.mxu1 %v8430_v38  ;;  %2071 = vmatpush2.msra.mxu0 %v8431_v0  ;;  %v8439_v0 = vld [vmem:[#allocation58_spill] sm:$0xff] }
 0x14a   :  { %2224 = vmatpush1.msra.mxu1 %v8432_v51  ;;  %2074 = vmatprep.subr.mxu0 %v6071_v36  ;;  %v8440_v51 = vld [vmem:[#allocation43_spill] sm:$0xff]  ;;  %v8441_v36 = vld [vmem:[#allocation56_spill] sm:$0xff] }
 0x14b   :  { %2226 = vmatprep.subr.mxu1 %v8433_v17  ;;  %2077 = vmatpush2.msra.mxu0 %v8434_v50  ;;  %v8442_v50 = vld [vmem:[#allocation27_spill] sm:$0xff] }
 0x14c   :  { %2228 = vmatpush1.msra.mxu1 %v8435_v31  ;;  %2080 = vmatprep.subr.mxu0 %v6092_v62  ;;  %v8443_v31 = vld [vmem:[#allocation86_spill] sm:$0xff] }
 0x14d   :  { %2230 = vmatprep.subr.mxu1 %v8436_v23  ;;  %2083 = vmatpush2.msra.mxu0 %v8437_v15  ;;  %v8444_v62 = vld [vmem:[#allocation62_spill] sm:$0xff]  ;;  %v8445_v23 = vld [vmem:[#allocation100_spill] sm:$0xff] }
 0x14e   :  { %2232 = vmatpush1.msra.mxu1 %v8438_v43  ;;  %2086 = vmatprep.subr.mxu0 %v6146_v35  ;;  %v8446_v15 = vld [vmem:[#allocation64_spill] sm:$0xff]  ;;  %v8447_v43 = vld [vmem:[#allocation89_spill] sm:$0xff]  ;;  %v8448_v35 = vld [vmem:[#allocation31_spill] sm:$0xff] }
 0x14f   :  { %2234 = vmatprep.subr.mxu1 %v8439_v0  ;;  %2089 = vmatpush2.msra.mxu0 %v8440_v51  ;;  %v8449_v0 = vld [vmem:[#allocation75_spill] sm:$0xff] }
 0x150   :  { %2236 = vmatpush1.msra.mxu1 %v8441_v36  ;;  %2092 = vmatprep.subr.mxu0 %v6168_v55  ;;  %v8450_v51 = vld [vmem:[#allocation35_spill] sm:$0xff]  ;;  %v8452_v55 = vld [vmem:[#allocation70_spill] sm:$0xff] }
 0x151   :  { %2238 = vmatprep.subr.mxu1 %v8442_v50  ;;  %2095 = vmatpush2.msra.mxu0 %v8443_v31  ;;  %v8451_v36 = vld [vmem:[#allocation99_spill] sm:$0xff] }
 0x152   :  { %2240 = vmatpush2.msra.mxu1 %v8444_v62  ;;  %2098 = vmatprep.subr.mxu0 %v8445_v23  ;;  %v8453_v31 = vld [vmem:[#allocation39_spill] sm:$0xff]  ;;  %v8455_v23 = vld [vmem:[#allocation72_spill] sm:$0xff] }
 0x153   :  { %2242 = vmatprep.subr.mxu1 %v8446_v15  ;;  %2101 = vmatpush2.msra.mxu0 %v8447_v43  ;;  %v8454_v62 = vld [vmem:[#allocation103_spill] sm:$0xff]  ;;  %v8456_v43 = vld [vmem:[#allocation78_spill] sm:$0xff] }
 0x154   :  { %2244 = vmatpush2.msra.mxu1 %v8448_v35  ;;  %2104 = vmatprep.subr.mxu0 %v8449_v0  ;;  %v8457_v0 = vld [vmem:[#allocation79_spill] sm:$0xff] }
 0x155   :  { %2246 = vmatprep.subr.mxu1 %v8450_v51  ;;  %2107 = vmatpush2.msra.mxu0 %v8451_v36  ;;  %v8458_v36 = vld [vmem:[#allocation82_spill] sm:$0xff] }
 0x156   :  { %2248 = vmatpush2.msra.mxu1 %v8452_v55  ;;  %2110 = vmatprep.subr.mxu0 %v6285_v1  ;;  %v8459_v1 = vld [vmem:[#allocation80_spill] sm:$0xff] }
 0x157   :  { %2250 = vmatprep.subr.mxu1 %v8453_v31  ;;  %2113 = vmatpush2.msra.mxu0 %v8454_v62  ;;  %v8460_v62 = vld [vmem:[#allocation91_spill] sm:$0xff] }
 0x158   :  { %2252 = vmatpush2.msra.mxu1 %v8455_v23  ;;  %2116 = vmatprep.subr.mxu0 %v6324_v16  ;;  %v8461_v16 = vld [vmem:[#allocation87_spill] sm:$0xff] }
 0x159   :  { %2254 = vmatprep.subr.mxu1 %v8456_v43  ;;  %2119 = vmatpush2.msra.mxu0 %v6290_v53  ;;  %v8462_v53 = vld [vmem:[#allocation96_spill] sm:$0xff] }
 0x15a   :  { %2256 = vmatpush2.msra.mxu1 %v8457_v0  ;;  %2122 = vmatprep.subr.mxu0 %v6352_v22  ;;  %v8463_v22 = vld [vmem:[#allocation94_spill] sm:$0xff] }
 0x15b   :  { %2258 = vmatprep.subr.mxu1 %v8458_v36  ;;  %2125 = vmatpush2.msra.mxu0 %v6319_v10  ;;  %v8464_v10 = vld [vmem:[#allocation77_spill] sm:$0xff] }
 0x15c   :  { %2260 = vmatpush2.msra.mxu1 %v8459_v1  ;;  %2128 = vmatprep.subr.mxu0 %v6384_v11  ;;  %v8465_v11 = vld [vmem:[#allocation73_spill] sm:$0xff] }
 0x15d   :  { %2262 = vmatprep.subr.mxu1 %v8460_v62  ;;  %2131 = vmatpush2.msra.mxu0 %v6359_v54  ;;  %v8466_v54 = vld [vmem:[#allocation105_spill] sm:$0xff] }
 0x15e   :  { %2264 = vmatpush2.msra.mxu1 %v8461_v16  ;;  %2134 = vmatprep.subr.mxu0 %v6403_v14  ;;  %v8467_v14 = vld [vmem:[#allocation104_spill] sm:$0xff] }
 0x15f   :  { %2266 = vmatprep.subr.mxu1 %v8462_v53  ;;  %2137 = vmatpush2.msra.mxu0 %v6391_v57  ;;  %v8468_v57 = vld [vmem:[#allocation110_spill] sm:$0xff] }
 0x160   :  { %2268 = vmatpush2.msra.mxu1 %v8463_v22  ;;  %2140 = vmatprep.subr.mxu0 %v6426_v56 }
 0x161   :  { %2270 = vmatprep.subr.mxu1 %v8464_v10  ;;  %2143 = vmatpush2.msra.mxu0 %v6419_v45 }
 0x162   :  { %2272 = vmatpush2.msra.mxu1 %v8465_v11  ;;  %2146 = vmatprep.subr.mxu0 %v6456_v33  ;;  %v8469_v33 = vld [vmem:[#allocation93_spill] sm:$0xff] }
 0x163   :  { %2274 = vmatprep.subr.mxu1 %v8466_v54  ;;  %2149 = vmatpush2.msra.mxu0 %v6443_v59  ;;  %v8470_v59 = vld [vmem:[#allocation95_spill] sm:$0xff] }
 0x164   :  { %2276 = vmatpush2.msra.mxu1 %v8467_v14  ;;  %2152 = vmatprep.subr.mxu0 %v6470_v44 }
 0x165   :  { %2278 = vmatprep.subr.mxu1 %v8468_v57  ;;  %2155 = vmatpush2.msra.mxu0 %v6474_v47  ;;  %v8471_v57 = vand.u32 4294901760, %v5459_v21  ;;  %v8475_v21 = vand.u32 4294901760, %v5508_v20  ;;  %v8481_v20 = vand.u32 4294901760, %v8390_v13  ;;  %v8488_v13 = vand.u32 4294901760, %v8397_v60 }
 0x166   :  { %2280 = vmatpush2.msra.mxu1 %v6309_v9  ;;  %2158 = vmatprep.subr.mxu0 %v6486_v39  ;;  %v8472_v9 = vand.u32 4294901760, %v5453_v42  ;;  %v8476_v42 = vand.u32 4294901760, %v8387_v25  ;;  %v8484_v25 = vld [vmem:[#allocation5_spill] sm:$0xff] }
 0x167   :  { %2282 = vmatprep.subr.mxu1 %v6349_v63  ;;  %2161 = vmatpush2.msra.mxu0 %v6490_v26  ;;  %v8473_v26 = vand.u32 4294901760, %v5475_v41  ;;  %v8477_v41 = vand.u32 4294901760, %v8388_v12  ;;  %v8485_v12 = vld [vmem:[#allocation69_spill] sm:$0xff] }
 0x168   :  { %2164 = vmatprep.mubr.f32.mxu0 %v8469_v33  ;;  %2284 = vmatpush2.msra.mxu1 %v6334_v32  ;;  %v8474_v33 = vand.u32 4294901760, %v5481_v18  ;;  %v8479_v18 = vand.u32 4294901760, %v8389_v3  ;;  %v8486_v3 = vand.u32 4294901760, %v8485_v12 }
 0x169   :  { %2167 = vmatmul.mubr.f32.vlgmr.msra.gmra.mxu0 %v8470_v59  ;;  %2286 = vmatprep.subr.mxu1 %v6375_v2  ;;  %v8482_v59 = vand.u32 4294901760, %v8391_v46 }
 0x16a   :  { %2317 = vmatprep.subr.mxu0 %v8471_v57  ;;  %2288 = vmatpush2.msra.mxu1 %v6378_v4  ;;  %v8480_v57 = vld [vmem:[#allocation98_spill] sm:$0xff] }
 0x16b   :  { %2321 = vmatpush1.msra.mxu0 %v8472_v9  ;;  %2290 = vmatprep.subr.mxu1 %v6408_v8  ;;  %v8478_v9 = vld [vmem:[#allocation97_spill] sm:$0xff] }
 0x16c   :  { %2325 = vmatprep.subr.mxu0 %v8473_v26  ;;  %2292 = vmatpush2.msra.mxu1 %v6397_v24  ;;  %v8483_v26 = vand.u32 4294901760, %v8393_v49 }
 0x16d   :  { %2329 = vmatpush1.msra.mxu0 %v8474_v33  ;;  %2294 = vmatprep.subr.mxu1 %v6432_v19  ;;  %v8487_v33 = vld [vmem:[#allocation24_spill] sm:$0xff] }
 0x16e   :  { %2333 = vmatprep.subr.mxu0 %v8475_v21  ;;  %2296 = vmatpush2.msra.mxu1 %v6445_v37  ;;  %v8489_v21 = vld [vmem:[#allocation6_spill] sm:$0xff] }
 0x16f   :  { %2337 = vmatpush1.msra.mxu0 %v8476_v42  ;;  %2298 = vmatprep.subr.mxu1 %v6452_v27  ;;  %v8492_v42 = vld [vmem:[#allocation26_spill] sm:$0xff] }
 0x170   :  { %2341 = vmatprep.subr.mxu0 %v8477_v41  ;;  %2300 = vmatpush2.msra.mxu1 %v6462_v6  ;;  %v8495_v41 = vld [vmem:[#allocation9_spill] sm:$0xff] }
 0x171   :  { %2304 = vmatprep.mubr.f32.mxu1 %v8478_v9  ;;  %2345 = vmatpush1.msra.mxu0 %v8479_v18  ;;  %v8496_v9 = vand.u32 4294901760, %v8495_v41  ;;  %v8497_v18 = vld [vmem:[#allocation45_spill] sm:$0xff]  ;;  %v8517_v41 = vld [vmem:[#allocation71_spill] sm:$0xff] }
 0x172   :  { %2308 = vmatmul.mubr.f32.vlgmr.msra.gmra.mxu1 %v8480_v57  ;;  %2349 = vmatprep.subr.mxu0 %v8481_v20  ;;  %v8498_v57 = vld [vmem:[#allocation36_spill] sm:$0xff]  ;;  %v8500_v20 = vld [vmem:[#allocation11_spill] sm:$0xff] }
 0x173   :  { %2580 = vmatprep.subr.mxu1 %v5423_v40  ;;  %2353 = vmatpush1.msra.mxu0 %v8482_v59  ;;  %v8490_v40 = vld [vmem:[#allocation85_spill] sm:$0xff]  ;;  %v8499_v60 = vand.u32 4294901760, %v8498_v57  ;;  %v8501_v59 = vand.u32 4294901760, %v8500_v20  ;;  %v8523_v20 = vld [vmem:[#allocation23_spill] sm:$0xff] }
 0x174   :  { %2582 = vmatpush1.msra.mxu1 %v8392_v52  ;;  %2357 = vmatprep.subr.mxu0 %v8483_v26  ;;  %v8491_v46 = vand.u32 4294901760, %v8490_v40  ;;  %v8493_v52 = vld [vmem:[#allocation10_spill] sm:$0xff]  ;;  %v8502_v26 = vld [vmem:[#allocation51_spill] sm:$0xff] }
 0x175   :  { %2584 = vmatprep.subr.mxu1 %v8484_v25  ;;  %2361 = vmatpush1.msra.mxu0 %v8486_v3  ;;  %v8494_v49 = vand.u32 4294901760, %v8493_v52  ;;  %v8503_v25 = vld [vmem:[#allocation14_spill] sm:$0xff] }
 0x176   :  { %2586 = vmatpush1.msra.mxu1 %v8487_v33  ;;  %2365 = vmatprep.subr.mxu0 %v8488_v13  ;;  %v8504_v12 = vand.u32 4294901760, %v8503_v25  ;;  %v8507_v33 = vld [vmem:[#allocation57_spill] sm:$0xff]  ;;  %v8508_v13 = vld [vmem:[#allocation44_spill] sm:$0xff] }
 0x177   :  { %2588 = vmatprep.subr.mxu1 %v8489_v21  ;;  %2369 = vmatpush1.msra.mxu0 %v8491_v46  ;;  %v8509_v21 = vand.u32 4294901760, %v8508_v13  ;;  %v8512_v46 = vld [vmem:[#allocation67_spill] sm:$0xff]  ;;  %v8527_v25 = vld [vmem:[#allocation32_spill] sm:$0xff]  ;;  %v8533_v13 = vld [vmem:[#allocation66_spill] sm:$0xff] }
 0x178   :  { %2590 = vmatpush1.msra.mxu1 %v8492_v42  ;;  %2373 = vmatprep.subr.mxu0 %v8494_v49  ;;  %v8513_v42 = vld [vmem:[#allocation18_spill] sm:$0xff] }
 0x179   :  { %2592 = vmatprep.subr.mxu1 %v8402_v58  ;;  %2377 = vmatpush1.msra.mxu0 %v8496_v9  ;;  %v8505_v58 = vld [vmem:[#allocation13_spill] sm:$0xff]  ;;  %v8514_v52 = vand.u32 4294901760, %v8513_v42  ;;  %v8518_v9 = vld [vmem:[#allocation52_spill] sm:$0xff] }
 0x17a   :  { %2594 = vmatpush1.msra.mxu1 %v8497_v18  ;;  %2381 = vmatprep.subr.mxu0 %v8499_v60  ;;  %v8506_v3 = vand.u32 4294901760, %v8505_v58  ;;  %v8519_v18 = vand.u32 4294901760, %v8518_v9  ;;  %v8522_v60 = vld [vmem:[#allocation30_spill] sm:$0xff] }
 0x17b   :  { %2596 = vmatprep.subr.mxu1 %v8406_v7  ;;  %2385 = vmatpush1.msra.mxu0 %v8501_v59  ;;  %v8510_v7 = vld [vmem:[#allocation15_spill] sm:$0xff]  ;;  %v8524_v59 = vand.u32 4294901760, %v8523_v20 }
 0x17c   :  { %2598 = vmatpush1.msra.mxu1 %v8502_v26  ;;  %2389 = vmatprep.subr.mxu0 %v8504_v12  ;;  %v8511_v40 = vand.u32 4294901760, %v8510_v7  ;;  %v8528_v12 = vld [vmem:[#allocation60_spill] sm:$0xff] }
 0x17d   :  { %2600 = vmatprep.subr.mxu1 %v8409_v61  ;;  %2393 = vmatpush1.msra.mxu0 %v8506_v3  ;;  %v8515_v61 = vld [vmem:[#allocation17_spill] sm:$0xff]  ;;  %v8529_v58 = vand.u32 4294901760, %v8528_v12 }
 0x17e   :  { %2602 = vmatpush1.msra.mxu1 %v8507_v33  ;;  %2397 = vmatprep.subr.mxu0 %v8509_v21  ;;  %v8516_v49 = vand.u32 4294901760, %v8515_v61  ;;  %v8532_v33 = vld [vmem:[#allocation38_spill] sm:$0xff]  ;;  %v8534_v21 = vand.u32 4294901760, %v8533_v13 }
 0x17f   :  { %2604 = vmatprep.subr.mxu1 %v8412_v30  ;;  %2401 = vmatpush1.msra.mxu0 %v8511_v40  ;;  %v8520_v30 = vld [vmem:[#allocation19_spill] sm:$0xff]  ;;  %v8537_v40 = vld [vmem:[#allocation40_spill] sm:$0xff]  ;;  %v8542_v61 = vld [vmem:[#allocation46_spill] sm:$0xff] }
 0x180   :  { %2606 = vmatpush1.msra.mxu1 %v8512_v46  ;;  %2405 = vmatprep.subr.mxu0 %v8514_v52  ;;  %v8521_v57 = vand.u32 4294901760, %v8520_v30  ;;  %v8538_v46 = vld [vmem:[#allocation68_spill] sm:$0xff] }
 0x181   :  { %2608 = vmatprep.subr.mxu1 %v8415_v5  ;;  %2409 = vmatpush1.msra.mxu0 %v8516_v49  ;;  %v8525_v5 = vld [vmem:[#allocation21_spill] sm:$0xff]  ;;  %v8539_v42 = vand.u32 4294901760, %v8538_v46  ;;  %v8543_v49 = vld [vmem:[#allocation74_spill] sm:$0xff]  ;;  %v8548_v30 = vld [vmem:[#allocation76_spill] sm:$0xff] }
 0x182   :  { %2610 = vmatpush1.msra.mxu1 %v8517_v41  ;;  %2413 = vmatprep.subr.mxu0 %v8519_v18  ;;  %v8526_v26 = vand.u32 4294901760, %v8525_v5  ;;  %v8544_v41 = vand.u32 4294901760, %v8543_v49  ;;  %v8547_v18 = vld [vmem:[#allocation48_spill] sm:$0xff] }
 0x183   :  { %2612 = vmatprep.subr.mxu1 %v8418_v29  ;;  %2417 = vmatpush1.msra.mxu0 %v8521_v57  ;;  %v8530_v29 = vld [vmem:[#allocation25_spill] sm:$0xff]  ;;  %v8549_v57 = vand.u32 4294901760, %v8548_v30  ;;  %v8554_v5 = vld [vmem:[#allocation84_spill] sm:$0xff] }
 0x184   :  { %2614 = vmatpush1.msra.mxu1 %v8522_v60  ;;  %2421 = vmatprep.subr.mxu0 %v8524_v59  ;;  %v8531_v3 = vand.u32 4294901760, %v8530_v29  ;;  %v8550_v60 = vld [vmem:[#allocation20_spill] sm:$0xff]  ;;  %v8553_v59 = vld [vmem:[#allocation54_spill] sm:$0xff] }
 0x185   :  { %2616 = vmatprep.subr.mxu1 %v8421_v28  ;;  %2425 = vmatpush1.msra.mxu0 %v8526_v26  ;;  %v8535_v28 = vld [vmem:[#allocation29_spill] sm:$0xff]  ;;  %v8555_v26 = vand.u32 4294901760, %v8554_v5  ;;  %v8560_v29 = vld [vmem:[#allocation88_spill] sm:$0xff] }
 0x186   :  { %2618 = vmatpush1.msra.mxu1 %v8527_v25  ;;  %2429 = vmatprep.subr.mxu0 %v8529_v58  ;;  %v8536_v7 = vand.u32 4294901760, %v8535_v28  ;;  %v8556_v25 = vld [vmem:[#allocation58_spill] sm:$0xff]  ;;  %v8559_v58 = vld [vmem:[#allocation56_spill] sm:$0xff] }
 0x187   :  { %2620 = vmatprep.subr.mxu1 %v8424_v34  ;;  %2433 = vmatpush1.msra.mxu0 %v8531_v3  ;;  %v8540_v34 = vld [vmem:[#allocation33_spill] sm:$0xff]  ;;  %v8561_v3 = vand.u32 4294901760, %v8560_v29  ;;  %v8565_v28 = vld [vmem:[#allocation100_spill] sm:$0xff] }
 0x188   :  { %2622 = vmatpush1.msra.mxu1 %v8532_v33  ;;  %2437 = vmatprep.subr.mxu0 %v8534_v21  ;;  %v8541_v52 = vand.u32 4294901760, %v8540_v34  ;;  %v8562_v33 = vld [vmem:[#allocation86_spill] sm:$0xff]  ;;  %v8589_v5 = vld [vmem:[#allocation116_spill] sm:$0xff] }
 0x189   :  { %2624 = vmatprep.subr.mxu1 %v8427_v48  ;;  %2441 = vmatpush1.msra.mxu0 %v8536_v7  ;;  %v8545_v48 = vld [vmem:[#allocation37_spill] sm:$0xff]  ;;  %v8563_v13 = vand.u32 4294901760, %v8562_v33  ;;  %v8564_v21 = vld [vmem:[#allocation62_spill] sm:$0xff]  ;;  %v8566_v7 = vand.u32 4294901760, %v8565_v28 }
 0x18a   :  { %2626 = vmatpush1.msra.mxu1 %v8537_v40  ;;  %2445 = vmatprep.subr.mxu0 %v8539_v42  ;;  %v8546_v9 = vand.u32 4294901760, %v8545_v48  ;;  %v8567_v40 = vld [vmem:[#allocation89_spill] sm:$0xff]  ;;  %v8569_v42 = vld [vmem:[#allocation75_spill] sm:$0xff] }
 0x18b   :  { %2628 = vmatprep.subr.mxu1 %v8430_v38  ;;  %2449 = vmatpush2.msra.mxu0 %v8541_v52  ;;  %v8551_v38 = vld [vmem:[#allocation41_spill] sm:$0xff]  ;;  %v8568_v46 = vand.u32 4294901760, %v8567_v40  ;;  %v8570_v34 = vand.u32 4294901760, %v8569_v42  ;;  %v8599_v42 = vand.u32 4294901760, %v6470_v44 }
 0x18c   :  { %2630 = vmatpush1.msra.mxu1 %v8542_v61  ;;  %2453 = vmatprep.subr.mxu0 %v8544_v41  ;;  %v8552_v20 = vand.u32 4294901760, %v8551_v38  ;;  %v8573_v61 = vld [vmem:[#allocation106_spill] sm:$0xff]  ;;  %v2725_v44 = vld [vmem:[%s7420_s1 + $0x40] sm:$0xff] }
 0x18d   :  { %2632 = vmatprep.subr.mxu1 %v8433_v17  ;;  %2457 = vmatpush2.msra.mxu0 %v8546_v9  ;;  %v8557_v17 = vld [vmem:[#allocation43_spill] sm:$0xff]  ;;  %v8574_v49 = vand.u32 4294901760, %v8573_v61  ;;  %v8601_v61 = vand.u32 4294901760, %v6474_v47 }
 0x18e   :  { %2634 = vmatpush1.msra.mxu1 %v8547_v18  ;;  %2461 = vmatprep.subr.mxu0 %v8549_v57  ;;  %v8558_v12 = vand.u32 4294901760, %v8557_v17 }
 0x18f   :  { %2636 = vmatprep.subr.mxu1 %v8550_v60  ;;  %2465 = vmatpush2.msra.mxu0 %v8552_v20  ;;  %v8585_v60 = vld [vmem:[#allocation114_spill] sm:$0xff]  ;;  %v8587_v20 = vld [vmem:[#allocation113_spill] sm:$0xff] }
 0x190   :  { %2638 = vmatpush1.msra.mxu1 %v8553_v59  ;;  %2469 = vmatprep.subr.mxu0 %v8555_v26  ;;  %v8586_v38 = vand.u32 4294901760, %v8585_v60  ;;  %v8588_v59 = vand.u32 4294901760, %v8587_v20 }
 0x191   :  { %2640 = vmatprep.subr.mxu1 %v8556_v25  ;;  %2473 = vmatpush2.msra.mxu0 %v8558_v12  ;;  %v8591_v25 = vld [vmem:[#allocation115_spill] sm:$0xff]  ;;  %v2734_v12 = vld [vmem:[%s7420_s1 + $0x88] sm:$0xff] }
 0x192   :  { %2642 = vmatpush1.msra.mxu1 %v8559_v58  ;;  %2477 = vmatprep.subr.mxu0 %v8561_v3  ;;  %v8592_v17 = vand.u32 4294901760, %v8591_v25  ;;  %v8593_v58 = vand.u32 4294901760, %v6426_v56  ;;  %v8594_v3 = vand.u32 4294901760, %v6419_v45  ;;  %v2730_v56 = vld [vmem:[%s7420_s1 + $0x68] sm:$0xff] }
 0x193   :  { %2644 = vmatprep.subr.mxu1 %v8442_v50  ;;  %2481 = vmatpush2.msra.mxu0 %v8563_v13  ;;  %v8571_v50 = vld [vmem:[#allocation99_spill] sm:$0xff]  ;;  %v8595_v13 = vld [vmem:[#allocation118_spill] sm:$0xff] }
 0x194   :  { %2646 = vmatpush2.msra.mxu1 %v8564_v21  ;;  %2485 = vmatprep.subr.mxu0 %v8566_v7  ;;  %v8572_v52 = vand.u32 4294901760, %v8571_v50  ;;  %v8596_v21 = vand.u32 4294901760, %v8595_v13  ;;  %v8597_v7 = vld [vmem:[#allocation117_spill] sm:$0xff]  ;;  %v6886_v50 = vand.u32 4294901760, %v2730_v56 }
 0x195   :  { %2648 = vmatprep.subr.mxu1 %v8446_v15  ;;  %2489 = vmatpush2.msra.mxu0 %v8568_v46  ;;  %v8575_v15 = vld [vmem:[#allocation103_spill] sm:$0xff]  ;;  %v8598_v40 = vand.u32 4294901760, %v8597_v7 }
 0x196   :  { %2650 = vmatpush2.msra.mxu1 %v8448_v35  ;;  %2493 = vmatprep.subr.mxu0 %v8570_v34  ;;  %v8576_v41 = vand.u32 4294901760, %v8575_v15  ;;  %v8577_v35 = vld [vmem:[#allocation111_spill] sm:$0xff]  ;;  %v8600_v34 = vld [vmem:[#allocation110_spill] sm:$0xff] }
 0x197   :  { %2652 = vmatprep.subr.mxu1 %v8450_v51  ;;  %2497 = vmatpush2.msra.mxu0 %v8572_v52  ;;  %v8578_v48 = vand.u32 4294901760, %v8577_v35  ;;  %v2742_v51 = vld [vmem:[%s7420_s1 + $0xc8] sm:$0x1]  ;;  %v8603_v35 = vand.u32 4294901760, %v6486_v39 }
 0x198   :  { %2654 = vmatpush2.msra.mxu1 %v8452_v55  ;;  %2501 = vmatprep.subr.mxu0 %v8574_v49  ;;  %v8579_v55 = vld [vmem:[#allocation107_spill] sm:$0xff]  ;;  %v2754_v57 = vsel %vm2749_vm0, %v2742_v51, 0  ;;  %v8602_v49 = vld [vmem:[#allocation108_spill] sm:$0xff]  ;;  %v2722_v51 = vld [vmem:[%s7420_s1 + $0x28] sm:$0xff] }
 0x199   :  { %2656 = vmatprep.subr.mxu1 %v8453_v31  ;;  %2505 = vmatpush2.msra.mxu0 %v8576_v41  ;;  %v8580_v9 = vand.u32 4294901760, %v8579_v55  ;;  %v2741_v31 = vld [vmem:[%s7420_s1 + $0xc0] sm:$0x1]  ;;  %v6832_v26 = vand.u32 4294901760, %v2754_v57  ;;  %v6942_v20 = vand.u32 4294901760, %v2722_v51 }
 0x19a   :  { %2658 = vmatpush2.msra.mxu1 %v8455_v23  ;;  %2509 = vmatprep.subr.mxu0 %v8578_v48  ;;  %v8581_v23 = vld [vmem:[#allocation112_spill] sm:$0xff] }
 0x19b   :  { %2660 = vmatprep.subr.mxu1 %v8456_v43  ;;  %2513 = vmatpush2.msra.mxu0 %v8580_v9  ;;  %v8582_v18 = vand.u32 4294901760, %v8581_v23  ;;  %v8583_v43 = vld [vmem:[#allocation109_spill] sm:$0xff]  ;;  %v6870_v28 = vsub.f32 %v2754_v57, %v6832_v26  ;;  %v8604_v9 = vld [vmem:[#allocation119_spill] sm:$0xff]  ;;  %v8606_v23 = vld [vmem:[#allocation90_spill] sm:$0xff]  ;;  %v6931_v57 = vand.u32 4294901760, %v2725_v44 }
 0x19c   :  { %2662 = vmatpush2.msra.mxu1 %v8457_v0  ;;  %v8584_v30 = vand.u32 4294901760, %v8583_v43  ;;  %v2751_v0 = vsel %vm2749_vm0, %v2741_v31, 0  ;;  %v8605_v31 = vand.u32 4294901760, %v8604_v9  ;;  %2571 = vmatprep.mubr.f32.mxu0 %v8606_v23  ;;  %v2721_v43 = vld [vmem:[%s7420_s1 + $0x20] sm:$0xff] }
 0x19d   :  { %2517 = vmatprep.subr.mxu0 %v8582_v18  ;;  %2664 = vmatprep.subr.mxu1 %v8458_v36  ;;  %v2738_v36 = vld [vmem:[%s7420_s1 + $0xa8] sm:$0xff]  ;;  %v2872_v47 = vand.u32 4294901760, %v6870_v28 }
 0x19e   :  { %2521 = vmatpush2.msra.mxu0 %v8584_v30  ;;  %2666 = vmatpush2.msra.mxu1 %v8459_v1  ;;  %v8590_v1 = vand.u32 4294901760, %v8589_v5  ;;  %v6851_v29 = vand.u32 4294901760, %v2738_v36  ;;  %v8607_v30 = vld [vmem:[#allocation92_spill] sm:$0xff] }
 0x19f   :  { %2525 = vmatprep.subr.mxu0 %v8586_v38  ;;  %2668 = vmatprep.subr.mxu1 %v8460_v62  ;;  %v2737_v62 = vld [vmem:[%s7420_s1 + $0xa0] sm:$0xff]  ;;  %v2718_v38 = vld [vmem:[%s7420_s1 + $0x8] sm:$0xff] }
 0x1a0   :  { %2529 = vmatpush2.msra.mxu0 %v8588_v59  ;;  %2670 = vmatpush2.msra.mxu1 %v8461_v16  ;;  %v6840_v16 = vand.u32 4294901760, %v2751_v0  ;;  %v6859_v33 = vand.u32 4294901760, %v2737_v62  ;;  %v6892_v52 = vsub.f32 %v2738_v36, %v6851_v29  ;;  %v2717_v59 = vld [vmem:[%s7420_s1] sm:$0xff]  ;;  %v6967_v25 = vand.u32 4294901760, %v2718_v38 }
 0x1a1   :  { %2533 = vmatprep.subr.mxu0 %v8590_v1  ;;  %2672 = vmatprep.subr.mxu1 %v8462_v53  ;;  %v2716_v53 = vld [vmem:[%s7422_s3] sm:$0xff]  ;;  %v6959_v1 = vand.u32 4294901760, %v2721_v43 }
 0x1a2   :  { %2537 = vmatpush2.msra.mxu0 %v8592_v17  ;;  %2674 = vmatpush2.msra.mxu1 %v8463_v22  ;;  %v2733_v22 = vld [vmem:[%s7420_s1 + $0x80] sm:$0xff]  ;;  %v2747_v45 = vsel %vm2745_vm1, %v2716_v53, 0  ;;  %v6898_v15 = vsub.f32 %v2737_v62, %v6859_v33  ;;  %v2884_v60 = vand.u32 4294901760, %v6892_v52  ;;  %v6976_v53 = vsub.f32 %v2725_v44, %v6931_v57 }
 0x1a3   :  { %2541 = vmatprep.subr.mxu0 %v8593_v58  ;;  %2676 = vmatprep.subr.mxu1 %v8464_v10  ;;  %v6867_v10 = vand.u32 4294901760, %v2734_v12  ;;  %v6878_v46 = vand.u32 4294901760, %v2733_v22  ;;  %v6903_v41 = vand.u32 4294901760, %v2747_v45  ;;  %v6981_v58 = vand.u32 4294901760, %v2717_v59 }
 0x1a4   :  { %2545 = vmatpush2.msra.mxu0 %v8594_v3  ;;  %2678 = vmatpush2.msra.mxu1 %v8465_v11  ;;  %v6876_v11 = vsub.f32 %v2751_v0, %v6840_v16  ;;  %v6938_v0 = vsub.f32 %v2730_v56, %v6886_v50  ;;  %v6993_v56 = vsub.f32 %v2722_v51, %v6942_v20 }
 0x1a5   :  { %2549 = vmatprep.subr.mxu0 %v8596_v21  ;;  %2680 = vmatprep.subr.mxu1 %v8466_v54  ;;  %v2729_v54 = vld [vmem:[%s7420_s1 + $0x60] sm:$0xff]  ;;  %v6915_v55 = vsub.f32 %v2734_v12, %v6867_v10  ;;  %v6921_v39 = vsub.f32 %v2733_v22, %v6878_v46  ;;  %v6949_v36 = vsub.f32 %v2747_v45, %v6903_v41 }
 0x1a6   :  { %2553 = vmatpush2.msra.mxu0 %v8598_v40  ;;  %2682 = vmatpush2.msra.mxu1 %v8467_v14  ;;  %v2726_v14 = vld [vmem:[%s7420_s1 + $0x48] sm:$0xff]  ;;  %v6908_v48 = vand.u32 4294901760, %v2729_v54  ;;  %v2878_v18 = vand.u32 4294901760, %v6876_v11  ;;  %v2908_v22 = vand.u32 4294901760, %v6938_v0  ;;  %v6998_v21 = vsub.f32 %v2721_v43, %v6959_v1 }
 0x1a7   :  { %2557 = vmatprep.subr.mxu0 %v8599_v42  ;;  %2684 = vmatprep.subr.mxu1 %v8600_v34  ;;  %v2896_v62 = vand.u32 4294901760, %v6915_v55  ;;  %v2902_v17 = vand.u32 4294901760, %v6921_v39  ;;  %v6990_v3 = vand.u32 4294901760, %v6949_v36  ;;  %v7016_v34 = vsub.f32 %v2717_v59, %v6981_v58 }
 0x1a8   :  { %2561 = vmatpush2.msra.mxu0 %v8601_v61  ;;  %2686 = vmatpush2.msra.mxu1 %v8602_v49  ;;  %v6954_v5 = vsub.f32 %v2729_v54, %v6908_v48  ;;  %v7011_v54 = vsub.f32 %v2718_v38, %v6967_v25  ;;  %v2932_v49 = vand.u32 4294901760, %v6993_v56  ;;  %v2938_v51 = vand.u32 4294901760, %v6998_v21 }
 0x1a9   :  { %2565 = vmatprep.subr.mxu0 %v8603_v35  ;;  %2688 = vmatprep.subr.mxu1 %v6349_v63  ;;  %v6923_v63 = vand.u32 4294901760, %v2726_v14  ;;  %v2950_v38 = vand.u32 4294901760, %v7016_v34 }
 0x1aa   :  { %2569 = vmatpush2.msra.mxu0 %v8605_v31  ;;  %2690 = vmatpush2.msra.mxu1 %v6334_v32  ;;  %v2890_v32 = vand.u32 4294901760, %v6898_v15  ;;  %v2914_v45 = vand.u32 4294901760, %v6954_v5 }
 0x1ab   :  { %2573 = vmatmul.mubr.f32.vlgmr.msra.gmra.mxu0 %v8607_v30  ;;  %2692 = vmatprep.subr.mxu1 %v6375_v2  ;;  %v2873_v2 = vsub.f32 %v6870_v28, %v2872_v47  ;;  %v6971_v12 = vsub.f32 %v2726_v14, %v6923_v63  ;;  %v2926_v14 = vand.u32 4294901760, %v6976_v53 }
 0x1ac   :  { %2781 = vmatprep.subr.mxu0 %v6832_v26  ;;  %2694 = vmatpush2.msra.mxu1 %v6378_v4  ;;  %v2879_v4 = vsub.f32 %v6876_v11, %v2878_v18  ;;  %v2915_v35 = vsub.f32 %v6954_v5, %v2914_v45 }
 0x1ad   :  { %2783 = vmatpush1.msra.mxu0 %v6840_v16  ;;  %2696 = vmatprep.subr.mxu1 %v6408_v8  ;;  %v2885_v8 = vsub.f32 %v6892_v52, %v2884_v60  ;;  %v2874_v13 = vand.u32 4294901760, %v2873_v2  ;;  %v2920_v40 = vand.u32 4294901760, %v6971_v12  ;;  %v2933_v2 = vsub.f32 %v6993_v56, %v2932_v49 }
 0x1ae   :  { %2785 = vmatprep.subr.mxu0 %v6851_v29  ;;  %2698 = vmatpush2.msra.mxu1 %v6397_v24  ;;  %v2891_v24 = vsub.f32 %v6898_v15, %v2890_v32  ;;  %v2880_v7 = vand.u32 4294901760, %v2879_v4  ;;  %v2916_v4 = vand.u32 4294901760, %v2915_v35  ;;  %v2743_v35 = vld [vmem:[%s7420_s1 + $0xd0] sm:$0x1] }
 0x1af   :  { %2787 = vmatpush1.msra.mxu0 %v6859_v33  ;;  %2700 = vmatprep.subr.mxu1 %v6432_v19  ;;  %v2897_v19 = vsub.f32 %v6915_v55, %v2896_v62  ;;  %v2886_v42 = vand.u32 4294901760, %v2885_v8  ;;  %v2921_v31 = vsub.f32 %v6971_v12, %v2920_v40  ;;  %v2939_v8 = vsub.f32 %v6998_v21, %v2938_v51 }
 0x1b0   :  { %2789 = vmatprep.subr.mxu0 %v6867_v10  ;;  %2702 = vmatpush2.msra.mxu1 %v6445_v37  ;;  %v2903_v37 = vsub.f32 %v6921_v39, %v2902_v17  ;;  %v2892_v61 = vand.u32 4294901760, %v2891_v24 }
 0x1b1   :  { %2791 = vmatpush1.msra.mxu0 %v6878_v46  ;;  %2704 = vmatprep.subr.mxu1 %v6452_v27  ;;  %v2909_v27 = vsub.f32 %v6938_v0, %v2908_v22  ;;  %v2898_v44 = vand.u32 4294901760, %v2897_v19  ;;  %v2922_v24 = vand.u32 4294901760, %v2921_v31  ;;  %v4051_v19 = vmov 0.0  }
 0x1b2   :  { %2793 = vmatprep.subr.mxu0 %v6886_v50  ;;  %2706 = vmatpush2.msra.mxu1 %v6462_v6  ;;  %v2844_v6 = vsub.f32 %v6949_v36, %v6990_v3  ;;  %v2904_v9 = vand.u32 4294901760, %v2903_v37  ;;  %v2951_v37 = vsub.f32 %v7016_v34, %v2950_v38 }
 0x1b3   :  { %2708 = vmatprep.mubr.f32.mxu1 %v8606_v23  ;;  %2795 = vmatpush1.msra.mxu0 %v6908_v48  ;;  %v2944_v23 = vand.u32 4294901760, %v7011_v54  ;;  %v2910_v43 = vand.u32 4294901760, %v2909_v27  ;;  %v2940_v27 = vand.u32 4294901760, %v2939_v8 }
 0x1b4   :  { %2710 = vmatmul.mubr.f32.vlgmr.msra.gmra.mxu1 %v8607_v30  ;;  %2797 = vmatprep.subr.mxu0 %v6923_v63  ;;  %v2927_v30 = vsub.f32 %v6976_v53, %v2926_v14  ;;  %v7043_v59 = vand.u32 4294901760, %v2844_v6  ;;  %v2952_v6 = vand.u32 4294901760, %v2951_v37 }
 0x1b5   :  { %2875 = vmatprep.subr.mxu1 %v2874_v13  ;;  %2799 = vmatpush1.msra.mxu0 %v6931_v57  ;;  %v2945_v13 = vsub.f32 %v7011_v54, %v2944_v23 }
 0x1b6   :  { %2881 = vmatpush1.msra.mxu1 %v2880_v7  ;;  %2801 = vmatprep.subr.mxu0 %v6942_v20  ;;  %v2928_v7 = vand.u32 4294901760, %v2927_v30 }
 0x1b7   :  { %2887 = vmatprep.subr.mxu1 %v2886_v42  ;;  %2803 = vmatpush1.msra.mxu0 %v6959_v1  ;;  %v2934_v42 = vand.u32 4294901760, %v2933_v2 }
 0x1b8   :  { %2893 = vmatpush1.msra.mxu1 %v2892_v61  ;;  %2805 = vmatprep.subr.mxu0 %v6967_v25  ;;  %v2946_v61 = vand.u32 4294901760, %v2945_v13 }
 0x1b9   :  { %2899 = vmatprep.subr.mxu1 %v2898_v44  ;;  %2807 = vmatpush1.msra.mxu0 %v6981_v58  ;;  %v2744_v44 = vld [vmem:[%s7420_s1 + $0xd8] sm:$0x1] }
 0x1ba   :  { %2905 = vmatpush1.msra.mxu1 %v2904_v9  ;;  %2840 = vmatprep.mubr.f32.mxu0 %v4051_v19  ;;  %v2760_v9 = vsel %vm2749_vm0, %v2744_v44, 0 }
 0x1bb   :  { %2911 = vmatprep.subr.mxu1 %v2910_v43  ;;  %3014 = vmatprep.subr.mxu0 %v6870_v28  ;;  %v2757_v28 = vsel %vm2749_vm0, %v2743_v35, 0  ;;  %v2719_v43 = vld [vmem:[%s7420_s1 + $0x10] sm:$0xff] }
 0x1bc   :  { %2846 = vmatmul.mubr.f32.vlgmr.msra.gmra.mxu0 %v7043_v59  ;;  %2917 = vmatpush1.msra.mxu1 %v2916_v4 }
 0x1bd   :  { %3017 = vmatpush1.msra.mxu0 %v6876_v11  ;;  %2923 = vmatprep.subr.mxu1 %v2922_v24  ;;  %v2740_v11 = vld [vmem:[%s7420_s1 + $0xb8] sm:$0xff] }
 0x1be   :  { %3020 = vmatprep.subr.mxu0 %v6892_v52  ;;  %2929 = vmatpush1.msra.mxu1 %v2928_v7  ;;  %v7114_v52 = vand.u32 4294901760, %v2760_v9  ;;  %v7254_v7 = vand.u32 4294901760, %v2719_v43 }
 0x1bf   :  { %3023 = vmatpush1.msra.mxu0 %v6898_v15  ;;  %2935 = vmatprep.subr.mxu1 %v2934_v42  ;;  %v2739_v15 = vld [vmem:[%s7420_s1 + $0xb0] sm:$0xff] }
 0x1c0   :  { %3026 = vmatprep.subr.mxu0 %v6915_v55  ;;  %2941 = vmatpush1.msra.mxu1 %v2940_v27  ;;  %v2736_v55 = vld [vmem:[%s7420_s1 + $0x98] sm:$0xff] }
 0x1c1   :  { %3029 = vmatpush1.msra.mxu0 %v6921_v39  ;;  %2947 = vmatprep.subr.mxu1 %v2946_v61  ;;  %v7129_v39 = vand.u32 4294901760, %v2740_v11 }
 0x1c2   :  { %3032 = vmatprep.subr.mxu0 %v6938_v0  ;;  %2953 = vmatpush1.msra.mxu1 %v2952_v6  ;;  %v2732_v0 = vld [vmem:[%s7420_s1 + $0x78] sm:$0xff] }
 0x1c3   :  { %2986 = vmatprep.mubr.f32.mxu1 %v4051_v19  ;;  %3035 = vmatpush1.msra.mxu0 %v6954_v5 }
 0x1c4   :  { %2988 = vmatmul.mubr.f32.vlgmr.msra.gmra.mxu1 %v6903_v41  ;;  %3038 = vmatprep.subr.mxu0 %v6971_v12  ;;  %v2731_v12 = vld [vmem:[%s7420_s1 + $0x70] sm:$0xff] }
 0x1c5   :  { %3114 = vmatprep.subr.mxu1 %v6832_v26  ;;  %3041 = vmatpush1.msra.mxu0 %v6976_v53  ;;  %v7170_v53 = vsub.f32 %v2740_v11, %v7129_v39  ;;  %v7286_v11 = vsub.f32 %v2719_v43, %v7254_v7 }
 0x1c6   :  { %3116 = vmatpush1.msra.mxu1 %v6840_v16  ;;  %3044 = vmatprep.subr.mxu0 %v6993_v56  ;;  %v7184_v56 = vand.u32 4294901760, %v2731_v12 }
 0x1c7   :  { %3118 = vmatprep.subr.mxu1 %v6851_v29  ;;  %3047 = vmatpush1.msra.mxu0 %v6998_v21  ;;  %v3571_v43 = vand.u32 4294901760, %v7286_v11 }
 0x1c8   :  { %3120 = vmatpush1.msra.mxu1 %v6859_v33  ;;  %3050 = vmatprep.subr.mxu0 %v7011_v54  ;;  %v7227_v30 = vsub.f32 %v2731_v12, %v7184_v56 }
 0x1c9   :  { %3122 = vmatprep.subr.mxu1 %v6867_v10  ;;  %3053 = vmatpush1.msra.mxu0 %v7016_v34  ;;  %v3505_v34 = vand.u32 4294901760, %v7170_v53 }
 0x1ca   :  { %3086 = vmatprep.mubr.f32.mxu0 %v4051_v19  ;;  %3124 = vmatpush1.msra.mxu1 %v6878_v46  ;;  %v3535_v6 = vand.u32 4294901760, %v7227_v30 }
 0x1cb   :  { %3089 = vmatmul.mubr.f32.vlgmr.msra.gmra.mxu0 %v6949_v36  ;;  %3126 = vmatprep.subr.mxu1 %v6886_v50 }
 0x1cc   :  { %3204 = vmatprep.subr.mxu0 %v2872_v47  ;;  %3128 = vmatpush1.msra.mxu1 %v6908_v48  ;;  %v7122_v47 = vand.u32 4294901760, %v2757_v28 }
 0x1cd   :  { %3208 = vmatpush1.msra.mxu0 %v2878_v18  ;;  %3130 = vmatprep.subr.mxu1 %v6923_v63  ;;  %v2735_v18 = vld [vmem:[%s7420_s1 + $0x90] sm:$0xff] }
 0x1ce   :  { %3212 = vmatprep.subr.mxu0 %v2884_v60  ;;  %3132 = vmatpush1.msra.mxu1 %v6931_v57  ;;  %v7137_v60 = vand.u32 4294901760, %v2739_v15  ;;  %v7154_v5 = vsub.f32 %v2757_v28, %v7122_v47 }
 0x1cf   :  { %3216 = vmatpush1.msra.mxu0 %v2890_v32  ;;  %3134 = vmatprep.subr.mxu1 %v6942_v20  ;;  %v7145_v32 = vand.u32 4294901760, %v2736_v55 }
 0x1d0   :  { %3220 = vmatprep.subr.mxu0 %v2896_v62  ;;  %3136 = vmatpush1.msra.mxu1 %v6959_v1  ;;  %v7148_v62 = vsub.f32 %v2760_v9, %v7114_v52  ;;  %v3499_v54 = vand.u32 4294901760, %v7154_v5 }
 0x1d1   :  { %3224 = vmatpush1.msra.mxu0 %v2902_v17  ;;  %3138 = vmatprep.subr.mxu1 %v6967_v25  ;;  %v7156_v17 = vand.u32 4294901760, %v2735_v18  ;;  %v7191_v21 = vsub.f32 %v2736_v55, %v7145_v32 }
 0x1d2   :  { %3228 = vmatprep.subr.mxu0 %v2908_v22  ;;  %3140 = vmatpush1.msra.mxu1 %v6981_v58  ;;  %v7176_v22 = vsub.f32 %v2739_v15, %v7137_v60 }
 0x1d3   :  { %3173 = vmatprep.mubr.f32.mxu1 %v4051_v19  ;;  %3232 = vmatpush1.msra.mxu0 %v2914_v45  ;;  %v3493_v45 = vand.u32 4294901760, %v7148_v62  ;;  %v3517_v2 = vand.u32 4294901760, %v7191_v21 }
 0x1d4   :  { %3177 = vmatmul.mubr.f32.vlgmr.msra.gmra.mxu1 %v6990_v3  ;;  %3236 = vmatprep.subr.mxu0 %v2920_v40  ;;  %v7197_v40 = vsub.f32 %v2735_v18, %v7156_v17 }
 0x1d5   :  { %3316 = vmatprep.subr.mxu1 %v6832_v26  ;;  %3240 = vmatpush1.msra.mxu0 %v2926_v14  ;;  %v7164_v26 = vand.u32 4294901760, %v2732_v0  ;;  %v2723_v14 = vld [vmem:[%s7420_s1 + $0x30] sm:$0xff] }
 0x1d6   :  { %3318 = vmatpush1.msra.mxu1 %v6840_v16  ;;  %3244 = vmatprep.subr.mxu0 %v2932_v49  ;;  %v2728_v16 = vld [vmem:[%s7420_s1 + $0x58] sm:$0xff]  ;;  %v3523_v8 = vand.u32 4294901760, %v7197_v40 }
 0x1d7   :  { %3320 = vmatprep.subr.mxu1 %v6851_v29  ;;  %3248 = vmatpush1.msra.mxu0 %v2938_v51  ;;  %v2727_v29 = vld [vmem:[%s7420_s1 + $0x50] sm:$0xff]  ;;  %v2720_v51 = vld [vmem:[%s7420_s1 + $0x18] sm:$0xff]  ;;  %v7214_v31 = vsub.f32 %v2732_v0, %v7164_v26  ;;  %v3536_v0 = vsub.f32 %v7227_v30, %v3535_v6 }
 0x1d8   :  { %3322 = vmatpush1.msra.mxu1 %v6859_v33  ;;  %3252 = vmatprep.subr.mxu0 %v2944_v23  ;;  %v2724_v33 = vld [vmem:[%s7420_s1 + $0x38] sm:$0xff]  ;;  %v7207_v49 = vand.u32 4294901760, %v2727_v29  ;;  %v7240_v4 = vand.u32 4294901760, %v2720_v51  ;;  %s4052_s1 = smov [#allocation2]  }
 0x1d9   :  { %3324 = vmatprep.subr.mxu1 %v6867_v10  ;;  %3256 = vmatpush1.msra.mxu0 %v2950_v38  ;;  %v7199_v10 = vand.u32 4294901760, %v2728_v16  ;;  %v7218_v23 = vand.u32 4294901760, %v2724_v33  ;;  %v7232_v38 = vand.u32 4294901760, %v2723_v14  ;;  %v3529_v37 = vand.u32 4294901760, %v7214_v31  ;;  %s4019_s0 = sshll.u32 %s4052_s1, 4  ;;  %s4020_s0 = int_to_ptr.vmem [resolvable:$true] %s4019_s0 }
 0x1da   :  { %3289 = vmatprep.mubr.f32.mxu0 %v4051_v19  ;;  %3326 = vmatpush1.msra.mxu1 %v6878_v46  ;;  %v3511_v46 = vand.u32 4294901760, %v7176_v22  ;;  %v7249_v13 = vsub.f32 %v2727_v29, %v7207_v49  ;;  %v7281_v9 = vsub.f32 %v2720_v51, %v7240_v4  ;;  %s4029_s10 = scalar_lea.vmem %s4020_s0, 512  ;;  %p4034_p1 = scmp.lt.s32.totalorder %s4020_s0, %s4020_s0 }
 0x1db   :  { %3291 = vmatmul.mubr.f32.vlgmr.msra.gmra.mxu0 %v6903_v41  ;;  %3328 = vmatprep.subr.mxu1 %v6886_v50  ;;  %v3494_v50 = vsub.f32 %v7148_v62, %v3493_v45  ;;  %v7244_v24 = vsub.f32 %v2728_v16, %v7199_v10  ;;  %v7263_v42 = vsub.f32 %v2724_v33, %v7218_v23  ;;  %p4030_p0 = scmp.ne.s32.totalorder %s4020_s0, %s4029_s10  ;;  %p4035_p2 = scmp.lt.s32.totalorder %s4029_s10, %s4029_s10 }
 0x1dc   :  { %3402 = vmatprep.subr.mxu0 %v7114_v52  ;;  %3330 = vmatpush1.msra.mxu1 %v6908_v48  ;;  %v3500_v48 = vsub.f32 %v7154_v5, %v3499_v54  ;;  %v7268_v61 = vsub.f32 %v2723_v14, %v7232_v38  ;;  %v3547_v15 = vand.u32 4294901760, %v7249_v13  ;;  %v3565_v33 = vand.u32 4294901760, %v7281_v9 }
 0x1dd   :  { %3404 = vmatpush1.msra.mxu0 %v7122_v47  ;;  %3332 = vmatprep.subr.mxu1 %v6923_v63  ;;  %v3506_v63 = vsub.f32 %v7170_v53, %v3505_v34  ;;  %v3495_v27 = vand.u32 4294901760, %v3494_v50  ;;  %v3541_v35 = vand.u32 4294901760, %v7244_v24  ;;  %v3553_v18 = vand.u32 4294901760, %v7263_v42  ;;  %p4036_p3 = por %p4035_p2, %p4034_p1 }
 0x1de   :  { %3406 = vmatprep.subr.mxu0 %v7129_v39  ;;  %3334 = vmatpush1.msra.mxu1 %v6931_v57  ;;  %v3512_v57 = vsub.f32 %v7176_v22, %v3511_v46  ;;  %v3501_v44 = vand.u32 4294901760, %v3500_v48  ;;  %v3559_v12 = vand.u32 4294901760, %v7268_v61  ;;  %v3548_v51 = vsub.f32 %v7249_v13, %v3547_v15 }
 0x1df   :  { %3408 = vmatpush1.msra.mxu0 %v7137_v60  ;;  %3336 = vmatprep.subr.mxu1 %v6942_v20  ;;  %v3518_v20 = vsub.f32 %v7191_v21, %v3517_v2  ;;  %v3507_v28 = vand.u32 4294901760, %v3506_v63  ;;  %v3542_v29 = vsub.f32 %v7244_v24, %v3541_v35  ;;  %v3554_v50 = vsub.f32 %v7263_v42, %v3553_v18  ;;  %p4037_p4 = pnand %p4036_p3, %p4030_p0 }
 0x1e0   :  { %3410 = vmatprep.subr.mxu0 %v7145_v32  ;;  %3338 = vmatpush1.msra.mxu1 %v6959_v1  ;;  %v3524_v1 = vsub.f32 %v7197_v40, %v3523_v8  ;;  %v3513_v55 = vand.u32 4294901760, %v3512_v57  ;;  %v3537_v48 = vand.u32 4294901760, %v3536_v0  ;;  %v3560_v63 = vsub.f32 %v7268_v61, %v3559_v12 }
 0x1e1   :  { %3412 = vmatpush1.msra.mxu0 %v7156_v17  ;;  %3340 = vmatprep.subr.mxu1 %v6967_v25  ;;  %v3530_v25 = vsub.f32 %v7214_v31, %v3529_v37  ;;  %v3543_v57 = vand.u32 4294901760, %v3542_v29 }
 0x1e2   :  { %3414 = vmatprep.subr.mxu0 %v7164_v26  ;;  %3342 = vmatpush1.msra.mxu1 %v6981_v58  ;;  %v3519_v58 = vand.u32 4294901760, %v3518_v20  ;;  %v3525_v16 = vand.u32 4294901760, %v3524_v1  ;;  %v3549_v20 = vand.u32 4294901760, %v3548_v51  ;;  %v3555_v1 = vand.u32 4294901760, %v3554_v50 }
 0x1e3   :  { %3375 = vmatprep.mubr.f32.mxu1 %v4051_v19  ;;  %3416 = vmatpush1.msra.mxu0 %v7184_v56  ;;  %v3531_v14 = vand.u32 4294901760, %v3530_v25 }
 0x1e4   :  { %3377 = vmatmul.mubr.f32.vlgmr.msra.gmra.mxu1 %v6903_v41  ;;  %3418 = vmatprep.subr.mxu0 %v7199_v10 }
 0x1e5   :  { %3496 = vmatprep.subr.mxu1 %v3495_v27  ;;  %3420 = vmatpush1.msra.mxu0 %v7207_v49  ;;  %v3566_v27 = vsub.f32 %v7281_v9, %v3565_v33 }
 0x1e6   :  { %3502 = vmatpush1.msra.mxu1 %v3501_v44  ;;  %3422 = vmatprep.subr.mxu0 %v7218_v23  ;;  %v3572_v44 = vsub.f32 %v7286_v11, %v3571_v43 }
 0x1e7   :  { %3508 = vmatprep.subr.mxu1 %v3507_v28  ;;  %3424 = vmatpush1.msra.mxu0 %v7232_v38  ;;  %v3561_v28 = vand.u32 4294901760, %v3560_v63  ;;  %v3567_v25 = vand.u32 4294901760, %v3566_v27 }
 0x1e8   :  { %3514 = vmatpush1.msra.mxu1 %v3513_v55  ;;  %3426 = vmatprep.subr.mxu0 %v7240_v4  ;;  %v3573_v55 = vand.u32 4294901760, %v3572_v44 }
 0x1e9   :  { %3520 = vmatprep.subr.mxu1 %v3519_v58  ;;  %3428 = vmatpush1.msra.mxu0 %v7254_v7 }
 0x1ea   :  { %3526 = vmatpush1.msra.mxu1 %v3525_v16  ;;  %3461 = vmatprep.mubr.f32.mxu0 %v4051_v19 }
 0x1eb   :  { %3532 = vmatprep.subr.mxu1 %v3531_v14  ;;  %3635 = vmatprep.subr.mxu0 %v7148_v62 }
 0x1ec   :  { %3467 = vmatmul.mubr.f32.vlgmr.msra.gmra.mxu0 %v7043_v59  ;;  %3538 = vmatpush1.msra.mxu1 %v3537_v48  ;;  %v681_v59 = vpop.f32.mrf.mxu1 }
 0x1ed   :  { %3638 = vmatpush1.msra.mxu0 %v7154_v5  ;;  %3544 = vmatprep.subr.mxu1 %v3543_v57 }
 0x1ee   :  { %3641 = vmatprep.subr.mxu0 %v7170_v53  ;;  %3550 = vmatpush1.msra.mxu1 %v3549_v20 }
 0x1ef   :  { %3644 = vmatpush1.msra.mxu0 %v7176_v22  ;;  %3556 = vmatprep.subr.mxu1 %v3555_v1 }
 0x1f0   :  { %3647 = vmatprep.subr.mxu0 %v7191_v21  ;;  %3562 = vmatpush1.msra.mxu1 %v3561_v28 }
 0x1f1   :  { %3650 = vmatpush1.msra.mxu0 %v7197_v40  ;;  %3568 = vmatprep.subr.mxu1 %v3567_v25 }
 0x1f2   :  { %3653 = vmatprep.subr.mxu0 %v7214_v31  ;;  %3574 = vmatpush1.msra.mxu1 %v3573_v55 }
 0x1f3   :  { %3607 = vmatprep.mubr.f32.mxu1 %v4051_v19  ;;  %3656 = vmatpush1.msra.mxu0 %v7227_v30 }
 0x1f4   :  { %3609 = vmatmul.mubr.f32.vlgmr.msra.gmra.mxu1 %v6903_v41  ;;  %3659 = vmatprep.subr.mxu0 %v7244_v24 }
 0x1f5   :  { %3735 = vmatprep.subr.mxu1 %v7114_v52  ;;  %3662 = vmatpush1.msra.mxu0 %v7249_v13 }
 0x1f6   :  { %3737 = vmatpush1.msra.mxu1 %v7122_v47  ;;  %3665 = vmatprep.subr.mxu0 %v7263_v42 }
 0x1f7   :  { %3739 = vmatprep.subr.mxu1 %v7129_v39  ;;  %3668 = vmatpush1.msra.mxu0 %v7268_v61 }
 0x1f8   :  { %3741 = vmatpush1.msra.mxu1 %v7137_v60  ;;  %3671 = vmatprep.subr.mxu0 %v7281_v9 }
 0x1f9   :  { %3743 = vmatprep.subr.mxu1 %v7145_v32  ;;  %3674 = vmatpush1.msra.mxu0 %v7286_v11 }
 0x1fa   :  { %3707 = vmatprep.mubr.f32.mxu0 %v4051_v19  ;;  %3745 = vmatpush1.msra.mxu1 %v7156_v17 }
 0x1fb   :  { %3710 = vmatmul.mubr.f32.vlgmr.msra.gmra.mxu0 %v6949_v36  ;;  %3747 = vmatprep.subr.mxu1 %v7164_v26  ;;  %v288_v36 = vpop.f32.mrf.mxu0 }
 0x1fc   :  { %3825 = vmatprep.subr.mxu0 %v3493_v45  ;;  %3749 = vmatpush1.msra.mxu1 %v7184_v56 }
 0x1fd   :  { %3829 = vmatpush1.msra.mxu0 %v3499_v54  ;;  %3751 = vmatprep.subr.mxu1 %v7199_v10 }
 0x1fe   :  { %3833 = vmatprep.subr.mxu0 %v3505_v34  ;;  %3753 = vmatpush1.msra.mxu1 %v7207_v49 }
 0x1ff   :  { %3837 = vmatpush1.msra.mxu0 %v3511_v46  ;;  %3755 = vmatprep.subr.mxu1 %v7218_v23 }
 0x200   :  { %3841 = vmatprep.subr.mxu0 %v3517_v2  ;;  %3757 = vmatpush1.msra.mxu1 %v7232_v38 }
 0x201   :  { %3845 = vmatpush1.msra.mxu0 %v3523_v8  ;;  %3759 = vmatprep.subr.mxu1 %v7240_v4  ;;  %v682_v8 = vadd.f32 %v681_v59, %v288_v36 }
 0x202   :  { %3849 = vmatprep.subr.mxu0 %v3529_v37  ;;  %3761 = vmatpush1.msra.mxu1 %v7254_v7 }
 0x203   :  { %3794 = vmatprep.mubr.f32.mxu1 %v4051_v19  ;;  %3853 = vmatpush1.msra.mxu0 %v3535_v6 }
 0x204   :  { %3798 = vmatmul.mubr.f32.vlgmr.msra.gmra.mxu1 %v6990_v3  ;;  %3857 = vmatprep.subr.mxu0 %v3541_v35  ;;  %v290_v3 = vpop.f32.mrf.mxu0 }
 0x205   :  { %3937 = vmatprep.subr.mxu1 %v7114_v52  ;;  %3861 = vmatpush1.msra.mxu0 %v3547_v15  ;;  %v683_v52 = vpop.f32.mrf.mxu1 }
 0x206   :  { %3939 = vmatpush1.msra.mxu1 %v7122_v47  ;;  %3865 = vmatprep.subr.mxu0 %v3553_v18 }
 0x207   :  { %3941 = vmatprep.subr.mxu1 %v7129_v39  ;;  %3869 = vmatpush1.msra.mxu0 %v3559_v12  ;;  %v1025_v39 = vpop.f32.mrf.mxu1 }
 0x208   :  { %3943 = vmatpush1.msra.mxu1 %v7137_v60  ;;  %3873 = vmatprep.subr.mxu0 %v3565_v33 }
 0x209   :  { %3945 = vmatprep.subr.mxu1 %v7145_v32  ;;  %3877 = vmatpush1.msra.mxu0 %v3571_v43  ;;  %v1027_v32 = vpop.f32.mrf.mxu1 }
 0x20a   :  { %3910 = vmatprep.mubr.f32.mxu0 %v4051_v19  ;;  %3947 = vmatpush1.msra.mxu1 %v7156_v17 }
 0x20b   :  { %3912 = vmatmul.mubr.f32.vlgmr.msra.gmra.mxu0 %v6903_v41  ;;  %3949 = vmatprep.subr.mxu1 %v7164_v26  ;;  %v1427_v5 = vpop.f32.mrf.mxu1 }
 0x20c   :  { %3996 = vmatprep.mubr.f32.mxu1 %v4051_v19  ;;  %3951 = vmatpush1.msra.mxu1 %v7184_v56  ;;  %v884_v19 = vpop.f32.mrf.mxu0 }
 0x20d   :  { %3953 = vmatprep.subr.mxu1 %v7199_v10  ;;  %v1429_v26 = vpop.f32.mrf.mxu1  ;;  %v885_v37 = vadd.f32 %v884_v19, %v682_v8 }
 0x20e   :  { %3955 = vmatpush1.msra.mxu1 %v7207_v49  ;;  %v886_v47 = vpop.f32.mrf.mxu0 }
 0x20f   :  { %3957 = vmatprep.subr.mxu1 %v7218_v23  ;;  %v1965_v22 = vpop.f32.mrf.mxu1  ;;  %v1026_v9 = vadd.f32 %v1025_v39, %v885_v37 }
 0x210   :  { %3959 = vmatpush1.msra.mxu1 %v7232_v38  ;;  %v1290_v60 = vpop.f32.mrf.mxu0 }
 0x211   :  { %3961 = vmatprep.subr.mxu1 %v7240_v4  ;;  %v1967_v45 = vpop.f32.mrf.mxu1  ;;  %v1291_v0 = vadd.f32 %v1290_v60, %v1026_v9 }
 0x212   :  { %3963 = vmatpush1.msra.mxu1 %v7254_v7  ;;  %v1292_v62 = vpop.f32.mrf.mxu0  ;;  %v684_v7 = vadd.f32 %v683_v52, %v290_v3 }
 0x213   :  { %3998 = vmatmul.mubr.f32.vlgmr.msra.gmra.mxu1 %v6903_v41  ;;  %v1428_v14 = vadd.f32 %v1427_v5, %v1291_v0 }
 0x214   :  { %v1572_v17 = vpop.f32.mrf.mxu0  ;;  %v887_v35 = vadd.f32 %v886_v47, %v684_v7 }
 0x215   :  { %v1966_v3 = vadd.f32 %v1965_v22, %v1572_v17 }
 0x216   :  { %v1574_v53 = vpop.f32.mrf.mxu0  ;;  %v1028_v58 = vadd.f32 %v1027_v32, %v887_v35 }
 0x217   :  { %v1968_v52 = vadd.f32 %v1967_v45, %v1574_v53 }
 0x218   :  { %v1293_v33 = vadd.f32 %v1292_v62, %v1028_v58 }
 0x21a   :  { %v1430_v48 = vadd.f32 %v1429_v26, %v1293_v33 }
 0x229   :  { %v2168_v56 = vpop.f32.mrf.mxu0 }
 0x22a   :  { %v2169_v47 = vadd.f32 %v2168_v56, %v1966_v3 }
 0x22b   :  { %v2170_v21 = vpop.f32.mrf.mxu0 }
 0x22c   :  { %v2171_v62 = vadd.f32 %v2170_v21, %v1968_v52 }
 0x232   :  { %v2309_v40 = vpop.f32.mrf.mxu1 }
 0x233   :  { %v2310_v5 = vadd.f32 %v2309_v40, %v2169_v47 }
 0x234   :  { %v2311_v10 = vpop.f32.mrf.mxu1 }
 0x26b   :  { %v2574_v41 = vpop.f32.mrf.mxu0 }
 0x26d   :  { %v7407_v54 = vpop.f32.mrf.mxu0 }
 0x274   :  { %v7409_v49 = vpop.f32.mrf.mxu1 }
 0x276   :  { %v7411_v31 = vpop.f32.mrf.mxu1 }
 0x27c   :  { %v2847_v34 = vpop.f32.mrf.mxu0 }
 0x27e   :  { %v2849_v23 = vpop.f32.mrf.mxu0 }
 0x284   :  { %v2989_v46 = vpop.f32.mrf.mxu1 }
 0x285   :  { %v2990_v24 = vadd.f32 %v2989_v46, %v2847_v34  ;;  %v2312_v46 = vadd.f32 %v2311_v10, %v2171_v62 }
 0x286   :  { %v2991_v38 = vpop.f32.mrf.mxu1 }
 0x287   :  { %v2992_v42 = vadd.f32 %v2991_v38, %v2849_v23  ;;  %v2577_v8 = vadd.f32 %v7407_v54, %v2312_v46 }
 0x289   :  { %v2714_v45 = vadd.f32 %v7411_v31, %v2577_v8 }
 0x28b   :  { %v3090_v30 = vpop.f32.mrf.mxu0 }
 0x28c   :  { %v3091_v61 = vadd.f32 %v3090_v30, %v2990_v24  ;;  %v2575_v30 = vadd.f32 %v2574_v41, %v2310_v5 }
 0x28d   :  { %v3092_v2 = vpop.f32.mrf.mxu0 }
 0x28e   :  { %v3093_v11 = vadd.f32 %v3092_v2, %v2992_v42  ;;  %v2712_v17 = vadd.f32 %v7409_v49, %v2575_v30 }
 0x294   :  { %v3178_v4 = vpop.f32.mrf.mxu1 }
 0x295   :  { %v3179_v15 = vadd.f32 %v3178_v4, %v3091_v61 }
 0x296   :  { %v3180_v6 = vpop.f32.mrf.mxu1 }
 0x297   :  { %v3181_v12 = vadd.f32 %v3180_v6, %v3093_v11 }
 0x29b   :  { %v3292_v13 = vpop.f32.mrf.mxu0 }
 0x29c   :  { %v3293_v16 = vadd.f32 %v3292_v13, %v3179_v15 }
 0x29d   :  { %v3294_v18 = vpop.f32.mrf.mxu0 }
 0x29e   :  { %v3295_v51 = vadd.f32 %v3294_v18, %v3181_v12 }
 0x2a4   :  { %v3378_v29 = vpop.f32.mrf.mxu1 }
 0x2a5   :  { %v3379_v43 = vadd.f32 %v3378_v29, %v3293_v16 }
 0x2a6   :  { %v3380_v50 = vpop.f32.mrf.mxu1 }
 0x2a7   :  { %v4004_v63 = vmul.f32 %v3379_v43, %v1428_v14  ;;  %v3381_v57 = vadd.f32 %v3380_v50, %v3295_v51 }
 0x2a9   :  { %4008 = vst [vmem:[#allocation2] sm:$0xff] %v4004_v63  ;;  %v4005_v27 = vmul.f32 %v3381_v57, %v1430_v48 }
 0x2ab   :  { %4009 = vst [vmem:[#allocation2 + $0x8] sm:$0xff] %v4005_v27 }
 0x2ac   :  { %v3468_v20 = vpop.f32.mrf.mxu0 }
 0x2ae   :  { %v3470_v44 = vpop.f32.mrf.mxu0 }
 0x2b4   :  { %v3610_v1 = vpop.f32.mrf.mxu1 }
 0x2b5   :  { %v3611_v59 = vadd.f32 %v3610_v1, %v3468_v20 }
 0x2b6   :  { %v3612_v25 = vpop.f32.mrf.mxu1 }
 0x2b7   :  { %v3613_v39 = vadd.f32 %v3612_v25, %v3470_v44 }
 0x2bb   :  { %v3711_v28 = vpop.f32.mrf.mxu0 }
 0x2bc   :  { %v3712_v60 = vadd.f32 %v3711_v28, %v3611_v59 }
 0x2bd   :  { %v3713_v55 = vpop.f32.mrf.mxu0 }
 0x2be   :  { %v3714_v26 = vadd.f32 %v3713_v55, %v3613_v39 }
 0x2c4   :  { %v3799_v36 = vpop.f32.mrf.mxu1 }
 0x2c5   :  { %v3800_v34 = vadd.f32 %v3799_v36, %v3712_v60 }
 0x2c6   :  { %v3801_v32 = vpop.f32.mrf.mxu1 }
 0x2c7   :  { %v3802_v38 = vadd.f32 %v3801_v32, %v3714_v26 }
 0x2cb   :  { %v3913_v19 = vpop.f32.mrf.mxu0 }
 0x2cc   :  { %v3914_v2 = vadd.f32 %v3913_v19, %v3800_v34 }
 0x2cd   :  { %v3915_v23 = vpop.f32.mrf.mxu0 }
 0x2ce   :  { %v3916_v22 = vadd.f32 %v3915_v23, %v3802_v38 }
 0x2d3   :  { %v3999_v4 = vpop.f32.mrf.mxu1 }
 0x2d4   :  { %v4000_v53 = vadd.f32 %v3999_v4, %v3914_v2 }
 0x2d5   :  { %v4001_v56 = vpop.f32.mrf.mxu1 }
 0x2d6   :  { %v4006_v21 = vmul.f32 %v4000_v53, %v2712_v17  ;;  %v4002_v40 = vadd.f32 %v4001_v56, %v3916_v22 }
 0x2d8   :  { %4010 = vst [vmem:[#allocation2 + $0x10] sm:$0xff] %v4006_v21  ;;  %v4007_v10 = vmul.f32 %v4002_v40, %v2714_v45 }
 0x2da   :  { %4012 = vst.msk [vmem:[#allocation2 + $0x18] sm:$0xff] %vm4011_vm2, %v4007_v10 }
 0x2db   :  { %4040 = shalt.err (!%p4037_p4)
}
 0x2dc   :  { %4022 = dma.vmem_to_hbm [thread:$0]  %s4020_s0, 512, %s7423_s4, [#allocation3]  }
 0x2dd   :  { %4049 = dma.done.wait [#allocation3], 512  }
 0x2de   :  { %4050 = vsyncadd [#allocation3], 4294966784 }
 0x2df   :  { %4026 = vsyncpa [#allocation3], 1 }

</bundles_post_ra>
